<compile_context>
chip_gen: v5e
topology: v5e:2x2
jax: 0.10.0
libtpu: 0.0.40
codegen_flags: <defaults>
</compile_context>

<pallas_src>
import jax
import jax.numpy as jnp
from jax import lax
from jax.experimental import pallas as pl
from jax.experimental.pallas import tpu as pltpu

EPS = 1e-5


# ----------------------------- Pallas kernel ------------------------------- #

def _make_residual_kernel(H, W, has_proj):
    """Builds the fused residual-block kernel for one batch element.

    Inputs (per grid step n):
      x_ref : (1, Cin, H*W)       input, channels on sublanes, H*W on lanes
      w1_ref: (Cout, 9*Cin)       conv1 weights (BN1 scale folded), K tap-major
      b1_ref: (Cout, 1)           folded BN1 bias
      w2_ref: (Cout, 9*Cout)      conv2 weights (BN2 scale folded)
      b2_ref: (Cout, 1)           folded BN2 bias
      w0_ref: (Cout, Cin)         1x1 projection weights (only if has_proj)
      o_ref : (1, Cout, H*W)
    Scratch:
      xpad  : (Cin,  H+2, W+2)    zero-padded input (halo in VMEM)
      col1  : (9*Cin,  H*W)       im2col for stage 1
      midpad: (Cout, H+2, W+2)    zero-padded stage-1 output (stays in VMEM)
      col2  : (9*Cout, H*W)       im2col for stage 2
    """

    def kernel(x_ref, w1_ref, b1_ref, w2_ref, b2_ref, *rest):
        if has_proj:
            w0_ref = rest[0]
            o_ref, xpad, col1, midpad, col2 = rest[1:]
        else:
            w0_ref = None
            o_ref, xpad, col1, midpad, col2 = rest

        Cin = x_ref.shape[1]
        Cout = o_ref.shape[1]
        HW = H * W

        x_flat = x_ref[0]                                   # (Cin, H*W)

        # ---- stage 1: conv1(3x3, pad=1) * bn1_scale  + bn1_bias, ReLU ----
        xpad[...] = jnp.zeros_like(xpad)
        xpad[:, 1:H + 1, 1:W + 1] = x_flat.reshape(Cin, H, W)
        for ky in range(3):
            for kx in range(3):
                tap = ky * 3 + kx
                col1[tap * Cin:(tap + 1) * Cin, :] = (
                    xpad[:, ky:ky + H, kx:kx + W].reshape(Cin, HW))
        h1 = jnp.dot(w1_ref[...], col1[...],
                     preferred_element_type=jnp.float32)     # (Cout, H*W)
        h1 = jnp.maximum(h1 + b1_ref[...], 0.0)

        # ---- stage 2: conv2(3x3, pad=1) * bn2_scale + bn2_bias ----
        midpad[...] = jnp.zeros_like(midpad)
        midpad[:, 1:H + 1, 1:W + 1] = h1.reshape(Cout, H, W)
        for ky in range(3):
            for kx in range(3):
                tap = ky * 3 + kx
                col2[tap * Cout:(tap + 1) * Cout, :] = (
                    midpad[:, ky:ky + H, kx:kx + W].reshape(Cout, HW))
        out = jnp.dot(w2_ref[...], col2[...],
                      preferred_element_type=jnp.float32) + b2_ref[...]

        # ---- identity path (+ optional 1x1 projection) + ReLU ----
        if has_proj:
            identity = jnp.dot(w0_ref[...], x_flat,
                               preferred_element_type=jnp.float32)
        else:
            identity = x_flat
        out = jnp.maximum(out + identity, 0.0)
        o_ref[0] = out.astype(o_ref.dtype)

    return kernel


# ------------------------------- wrapper ------------------------------------ #

def _fold_bn(gamma, beta, mean, var, eps=EPS):
    scale = gamma / jnp.sqrt(var + eps)
    bias = beta - mean * scale
    return scale, bias                                   # (C,), (C,)


def residual_block_forward(x_nchw, params):
    """Forward pass matching the PyTorch ResidualBlock (stride=1, eval BN)."""
    N, Cin, H, W = x_nchw.shape
    Cout = params["w1"].shape[0]
    HW = H * W

    # layout-free reshape: spatial flattened onto lanes, channels on sublanes
    x = x_nchw.astype(jnp.float32).reshape(N, Cin, HW)

    s1, b1 = _fold_bn(params["g1"], params["b1"], params["m1"], params["v1"])
    s2, b2 = _fold_bn(params["g2"], params["b2"], params["m2"], params["v2"])

    # OIHW -> (Cout, 9*C) with K ordered (ky, kx, c) tap-major; BN scale folded in.
    w1 = (jnp.transpose(params["w1"], (0, 2, 3, 1)).reshape(Cout, 9 * Cin)
          * s1[:, None]).astype(jnp.float32)
    w2 = (jnp.transpose(params["w2"], (0, 2, 3, 1)).reshape(Cout, 9 * Cout)
          * s2[:, None]).astype(jnp.float32)
    b1 = b1[:, None].astype(jnp.float32)                 # (Cout, 1)
    b2 = b2[:, None].astype(jnp.float32)

    has_proj = params.get("w0", None) is not None

    inputs = [x, w1, b1, w2, b2]
    in_specs = [
        pl.BlockSpec((1, Cin, HW), lambda n: (n, 0, 0)),
        pl.BlockSpec((Cout, 9 * Cin), lambda n: (0, 0)),
        pl.BlockSpec((Cout, 1), lambda n: (0, 0)),
        pl.BlockSpec((Cout, 9 * Cout), lambda n: (0, 0)),
        pl.BlockSpec((Cout, 1), lambda n: (0, 0)),
    ]
    if has_proj:
        w0 = params["w0"][:, :, 0, 0].astype(jnp.float32)    # (Cout, Cin)
        inputs.append(w0)
        in_specs.append(pl.BlockSpec((Cout, Cin), lambda n: (0, 0)))

    out = pl.pallas_call(
        _make_residual_kernel(H, W, has_proj),
        out_shape=jax.ShapeDtypeStruct((N, Cout, HW), jnp.float32),
        grid=(N,),
        in_specs=in_specs,
        out_specs=pl.BlockSpec((1, Cout, HW), lambda n: (n, 0, 0)),
        scratch_shapes=[
            pltpu.VMEM((Cin, H + 2, W + 2), jnp.float32),
            pltpu.VMEM((9 * Cin, HW), jnp.float32),
            pltpu.VMEM((Cout, H + 2, W + 2), jnp.float32),
            pltpu.VMEM((9 * Cout, HW), jnp.float32),
        ],
        compiler_params=pltpu.CompilerParams(
            dimension_semantics=("parallel",)),
    )(*inputs)

    return out.reshape(N, Cout, H, W)


# ----------------------- pure-JAX reference (check) ------------------------- #

def _ref_forward(x, params):
    def conv(x, w, pad):
        return lax.conv_general_dilated(
            x, w, (1, 1), [(pad, pad), (pad, pad)],
            dimension_numbers=("NCHW", "OIHW", "NCHW"))

    def bn(x, g, b, m, v):
        g, b, m, v = (t[None, :, None, None] for t in (g, b, m, v))
        return (x - m) / jnp.sqrt(v + EPS) * g + b

    out = jax.nn.relu(bn(conv(x, params["w1"], 1),
                         params["g1"], params["b1"], params["m1"], params["v1"]))
    out = bn(conv(out, params["w2"], 1),
             params["g2"], params["b2"], params["m2"], params["v2"])
    identity = x if params.get("w0", None) is None else conv(x, params["w0"], 0)
    return jax.nn.relu(out + identity)


# ---------------------------------- main ------------------------------------ #

if __name__ == "__main__":
    key = jax.random.PRNGKey(0)
    N, Cin, Cout, H, W = 2, 4, 8, 16, 16

    ks = jax.random.split(key, 12)
    params = {
        "w1": 0.1 * jax.random.normal(ks[0], (Cout, Cin, 3, 3), jnp.float32),
        "g1": 1.0 + 0.1 * jax.random.normal(ks[1], (Cout,), jnp.float32),
        "b1": 0.1 * jax.random.normal(ks[2], (Cout,), jnp.float32),
        "m1": 0.1 * jax.random.normal(ks[3], (Cout,), jnp.float32),
        "v1": jax.random.uniform(ks[4], (Cout,), jnp.float32, 0.5, 1.5),
        "w2": 0.1 * jax.random.normal(ks[5], (Cout, Cout, 3, 3), jnp.float32),
        "g2": 1.0 + 0.1 * jax.random.normal(ks[6], (Cout,), jnp.float32),
        "b2": 0.1 * jax.random.normal(ks[7], (Cout,), jnp.float32),
        "m2": 0.1 * jax.random.normal(ks[8], (Cout,), jnp.float32),
        "v2": jax.random.uniform(ks[9], (Cout,), jnp.float32, 0.5, 1.5),
        # conv0 exists because in_channels != out_channels
        "w0": 0.1 * jax.random.normal(ks[10], (Cout, Cin, 1, 1), jnp.float32),
    }
    x = jax.random.normal(ks[11], (N, Cin, H, W), jnp.float32)

    out = jax.block_until_ready(residual_block_forward(x, params))
    ref = jax.block_until_ready(_ref_forward(x, params))

    assert out.shape == (N, Cout, H, W)
    assert jnp.allclose(out, ref, atol=1e-4, rtol=1e-4), \
        f"max abs err {jnp.max(jnp.abs(out - ref))}"

    print("KERNEL_OK")
</pallas_src>

<mosaic_0001>
module attributes {stable_mosaic.version = 11 : i64} {
  func.func @kernel(%arg0: i32, %arg1: memref<1x4x256xf32, #tpu.memory_space<vmem>>, %arg2: memref<8x36xf32, #tpu.memory_space<vmem>>, %arg3: memref<8x1xf32, #tpu.memory_space<vmem>>, %arg4: memref<8x72xf32, #tpu.memory_space<vmem>>, %arg5: memref<8x1xf32, #tpu.memory_space<vmem>>, %arg6: memref<8x4xf32, #tpu.memory_space<vmem>>, %arg7: memref<1x8x256xf32, #tpu.memory_space<vmem>>, %arg8: memref<4x18x18xf32, #tpu.memory_space<vmem>>, %arg9: memref<36x256xf32, #tpu.memory_space<vmem>>, %arg10: memref<8x18x18xf32, #tpu.memory_space<vmem>>, %arg11: memref<72x256xf32, #tpu.memory_space<vmem>>) attributes {dimension_semantics = [#tpu.dimension_semantics<parallel>], iteration_bounds = array<i64: 2>, scalar_prefetch = 0 : i64, scratch_operands = 4 : i64, tpu.core_type = #tpu.core_type<tc>, window_params = [{transform_indices = @transform_0, window_bounds = array<i64: 1, 4, 256>}, {pipeline_mode = #tpu.pipeline_mode<synchronous>, transform_indices = @transform_1, window_bounds = array<i64: 8, 36>}, {pipeline_mode = #tpu.pipeline_mode<synchronous>, transform_indices = @transform_2, window_bounds = array<i64: 8, 1>}, {pipeline_mode = #tpu.pipeline_mode<synchronous>, transform_indices = @transform_3, window_bounds = array<i64: 8, 72>}, {pipeline_mode = #tpu.pipeline_mode<synchronous>, transform_indices = @transform_4, window_bounds = array<i64: 8, 1>}, {pipeline_mode = #tpu.pipeline_mode<synchronous>, transform_indices = @transform_5, window_bounds = array<i64: 8, 4>}, {transform_indices = @transform_6, window_bounds = array<i64: 1, 8, 256>}]} {
    %c0 = arith.constant 0 : index
    %c0_0 = arith.constant 0 : index
    %c0_1 = arith.constant 0 : index
    %0 = vector.load %arg1[%c0, %c0_0, %c0_1] : memref<1x4x256xf32, #tpu.memory_space<vmem>>, vector<1x4x256xf32>
    %1 = vector.shape_cast %0 : vector<1x4x256xf32> to vector<4x256xf32>
    %cst = arith.constant 0.000000e+00 : f32
    %2 = vector.broadcast %cst : f32 to vector<4x18x18xf32>
    %c0_2 = arith.constant 0 : index
    %c0_3 = arith.constant 0 : index
    %c0_4 = arith.constant 0 : index
    %3 = vector.load %arg8[%c0_2, %c0_3, %c0_4] : memref<4x18x18xf32, #tpu.memory_space<vmem>>, vector<4x18x18xf32>
    tpu.vector_store %arg8[%c0_2, %c0_3, %c0_4], %2 {strides = array<i32>} : memref<4x18x18xf32, #tpu.memory_space<vmem>>, vector<4x18x18xf32>,
    %4 = vector.shape_cast %1 : vector<4x256xf32> to vector<4x16x16xf32>
    %c0_5 = arith.constant 0 : index
    %c1 = arith.constant 1 : index
    %c1_6 = arith.constant 1 : index
    %5 = vector.load %arg8[%c0_5, %c1, %c1_6] : memref<4x18x18xf32, #tpu.memory_space<vmem>>, vector<4x16x16xf32>
    tpu.vector_store %arg8[%c0_5, %c1, %c1_6], %4 {strides = array<i32>} : memref<4x18x18xf32, #tpu.memory_space<vmem>>, vector<4x16x16xf32>,
    %c0_7 = arith.constant 0 : index
    %c0_8 = arith.constant 0 : index
    %c0_9 = arith.constant 0 : index
    %6 = vector.load %arg8[%c0_7, %c0_8, %c0_9] : memref<4x18x18xf32, #tpu.memory_space<vmem>>, vector<4x16x16xf32>
    %7 = vector.shape_cast %6 : vector<4x16x16xf32> to vector<4x256xf32>
    %c0_10 = arith.constant 0 : index
    %c0_11 = arith.constant 0 : index
    %8 = vector.load %arg9[%c0_10, %c0_11] : memref<36x256xf32, #tpu.memory_space<vmem>>, vector<4x256xf32>
    tpu.vector_store %arg9[%c0_10, %c0_11], %7 {strides = array<i32>} : memref<36x256xf32, #tpu.memory_space<vmem>>, vector<4x256xf32>,
    %c0_12 = arith.constant 0 : index
    %c0_13 = arith.constant 0 : index
    %c1_14 = arith.constant 1 : index
    %9 = vector.load %arg8[%c0_12, %c0_13, %c1_14] : memref<4x18x18xf32, #tpu.memory_space<vmem>>, vector<4x16x16xf32>
    %10 = vector.shape_cast %9 : vector<4x16x16xf32> to vector<4x256xf32>
    %c4 = arith.constant 4 : index
    %c0_15 = arith.constant 0 : index
    %11 = vector.load %arg9[%c4, %c0_15] : memref<36x256xf32, #tpu.memory_space<vmem>>, vector<4x256xf32>
    tpu.vector_store %arg9[%c4, %c0_15], %10 {strides = array<i32>} : memref<36x256xf32, #tpu.memory_space<vmem>>, vector<4x256xf32>,
    %c0_16 = arith.constant 0 : index
    %c0_17 = arith.constant 0 : index
    %c2 = arith.constant 2 : index
    %12 = vector.load %arg8[%c0_16, %c0_17, %c2] : memref<4x18x18xf32, #tpu.memory_space<vmem>>, vector<4x16x16xf32>
    %13 = vector.shape_cast %12 : vector<4x16x16xf32> to vector<4x256xf32>
    %c8 = arith.constant 8 : index
    %c0_18 = arith.constant 0 : index
    %14 = vector.load %arg9[%c8, %c0_18] : memref<36x256xf32, #tpu.memory_space<vmem>>, vector<4x256xf32>
    tpu.vector_store %arg9[%c8, %c0_18], %13 {strides = array<i32>} : memref<36x256xf32, #tpu.memory_space<vmem>>, vector<4x256xf32>,
    %c0_19 = arith.constant 0 : index
    %c1_20 = arith.constant 1 : index
    %c0_21 = arith.constant 0 : index
    %15 = vector.load %arg8[%c0_19, %c1_20, %c0_21] : memref<4x18x18xf32, #tpu.memory_space<vmem>>, vector<4x16x16xf32>
    %16 = vector.shape_cast %15 : vector<4x16x16xf32> to vector<4x256xf32>
    %c12 = arith.constant 12 : index
    %c0_22 = arith.constant 0 : index
    %17 = vector.load %arg9[%c12, %c0_22] : memref<36x256xf32, #tpu.memory_space<vmem>>, vector<4x256xf32>
    tpu.vector_store %arg9[%c12, %c0_22], %16 {strides = array<i32>} : memref<36x256xf32, #tpu.memory_space<vmem>>, vector<4x256xf32>,
    %c0_23 = arith.constant 0 : index
    %c1_24 = arith.constant 1 : index
    %c1_25 = arith.constant 1 : index
    %18 = vector.load %arg8[%c0_23, %c1_24, %c1_25] : memref<4x18x18xf32, #tpu.memory_space<vmem>>, vector<4x16x16xf32>
    %19 = vector.shape_cast %18 : vector<4x16x16xf32> to vector<4x256xf32>
    %c16 = arith.constant 16 : index
    %c0_26 = arith.constant 0 : index
    %20 = vector.load %arg9[%c16, %c0_26] : memref<36x256xf32, #tpu.memory_space<vmem>>, vector<4x256xf32>
    tpu.vector_store %arg9[%c16, %c0_26], %19 {strides = array<i32>} : memref<36x256xf32, #tpu.memory_space<vmem>>, vector<4x256xf32>,
    %c0_27 = arith.constant 0 : index
    %c1_28 = arith.constant 1 : index
    %c2_29 = arith.constant 2 : index
    %21 = vector.load %arg8[%c0_27, %c1_28, %c2_29] : memref<4x18x18xf32, #tpu.memory_space<vmem>>, vector<4x16x16xf32>
    %22 = vector.shape_cast %21 : vector<4x16x16xf32> to vector<4x256xf32>
    %c20 = arith.constant 20 : index
    %c0_30 = arith.constant 0 : index
    %23 = vector.load %arg9[%c20, %c0_30] : memref<36x256xf32, #tpu.memory_space<vmem>>, vector<4x256xf32>
    tpu.vector_store %arg9[%c20, %c0_30], %22 {strides = array<i32>} : memref<36x256xf32, #tpu.memory_space<vmem>>, vector<4x256xf32>,
    %c0_31 = arith.constant 0 : index
    %c2_32 = arith.constant 2 : index
    %c0_33 = arith.constant 0 : index
    %24 = vector.load %arg8[%c0_31, %c2_32, %c0_33] : memref<4x18x18xf32, #tpu.memory_space<vmem>>, vector<4x16x16xf32>
    %25 = vector.shape_cast %24 : vector<4x16x16xf32> to vector<4x256xf32>
    %c24 = arith.constant 24 : index
    %c0_34 = arith.constant 0 : index
    %26 = vector.load %arg9[%c24, %c0_34] : memref<36x256xf32, #tpu.memory_space<vmem>>, vector<4x256xf32>
    tpu.vector_store %arg9[%c24, %c0_34], %25 {strides = array<i32>} : memref<36x256xf32, #tpu.memory_space<vmem>>, vector<4x256xf32>,
    %c0_35 = arith.constant 0 : index
    %c2_36 = arith.constant 2 : index
    %c1_37 = arith.constant 1 : index
    %27 = vector.load %arg8[%c0_35, %c2_36, %c1_37] : memref<4x18x18xf32, #tpu.memory_space<vmem>>, vector<4x16x16xf32>
    %28 = vector.shape_cast %27 : vector<4x16x16xf32> to vector<4x256xf32>
    %c28 = arith.constant 28 : index
    %c0_38 = arith.constant 0 : index
    %29 = vector.load %arg9[%c28, %c0_38] : memref<36x256xf32, #tpu.memory_space<vmem>>, vector<4x256xf32>
    tpu.vector_store %arg9[%c28, %c0_38], %28 {strides = array<i32>} : memref<36x256xf32, #tpu.memory_space<vmem>>, vector<4x256xf32>,
    %c0_39 = arith.constant 0 : index
    %c2_40 = arith.constant 2 : index
    %c2_41 = arith.constant 2 : index
    %30 = vector.load %arg8[%c0_39, %c2_40, %c2_41] : memref<4x18x18xf32, #tpu.memory_space<vmem>>, vector<4x16x16xf32>
    %31 = vector.shape_cast %30 : vector<4x16x16xf32> to vector<4x256xf32>
    %c32 = arith.constant 32 : index
    %c0_42 = arith.constant 0 : index
    %32 = vector.load %arg9[%c32, %c0_42] : memref<36x256xf32, #tpu.memory_space<vmem>>, vector<4x256xf32>
    tpu.vector_store %arg9[%c32, %c0_42], %31 {strides = array<i32>} : memref<36x256xf32, #tpu.memory_space<vmem>>, vector<4x256xf32>,
    %c0_43 = arith.constant 0 : index
    %c0_44 = arith.constant 0 : index
    %33 = vector.load %arg2[%c0_43, %c0_44] : memref<8x36xf32, #tpu.memory_space<vmem>>, vector<8x36xf32>
    %c0_45 = arith.constant 0 : index
    %c0_46 = arith.constant 0 : index
    %34 = vector.load %arg9[%c0_45, %c0_46] : memref<36x256xf32, #tpu.memory_space<vmem>>, vector<36x256xf32>
    %cst_47 = arith.constant dense<0.000000e+00> : vector<8x256xf32>
    %35 = tpu.matmul %33, %34, %cst_47 {dimension_numbers = #tpu.dot_dimension_numbers<[1], [0], [0], [1], [0, 0, 1, 1], [], []>} : vector<8x36xf32>, vector<36x256xf32>, vector<8x256xf32> -> vector<8x256xf32>
    %c0_48 = arith.constant 0 : index
    %c0_49 = arith.constant 0 : index
    %36 = vector.load %arg3[%c0_48, %c0_49] : memref<8x1xf32, #tpu.memory_space<vmem>>, vector<8x1xf32>
    %37 = vector.broadcast %36 : vector<8x1xf32> to vector<8x256xf32>
    %38 = arith.addf %35, %37 : vector<8x256xf32>
    %cst_50 = arith.constant 0.000000e+00 : f32
    %39 = vector.broadcast %cst_50 : f32 to vector<8x256xf32>
    %40 = arith.maximumf %38, %39 : vector<8x256xf32>
    %cst_51 = arith.constant 0.000000e+00 : f32
    %41 = vector.broadcast %cst_51 : f32 to vector<8x18x18xf32>
    %c0_52 = arith.constant 0 : index
    %c0_53 = arith.constant 0 : index
    %c0_54 = arith.constant 0 : index
    %42 = vector.load %arg10[%c0_52, %c0_53, %c0_54] : memref<8x18x18xf32, #tpu.memory_space<vmem>>, vector<8x18x18xf32>
    tpu.vector_store %arg10[%c0_52, %c0_53, %c0_54], %41 {strides = array<i32>} : memref<8x18x18xf32, #tpu.memory_space<vmem>>, vector<8x18x18xf32>,
    %43 = vector.shape_cast %40 : vector<8x256xf32> to vector<8x16x16xf32>
    %c0_55 = arith.constant 0 : index
    %c1_56 = arith.constant 1 : index
    %c1_57 = arith.constant 1 : index
    %44 = vector.load %arg10[%c0_55, %c1_56, %c1_57] : memref<8x18x18xf32, #tpu.memory_space<vmem>>, vector<8x16x16xf32>
    tpu.vector_store %arg10[%c0_55, %c1_56, %c1_57], %43 {strides = array<i32>} : memref<8x18x18xf32, #tpu.memory_space<vmem>>, vector<8x16x16xf32>,
    %c0_58 = arith.constant 0 : index
    %c0_59 = arith.constant 0 : index
    %c0_60 = arith.constant 0 : index
    %45 = vector.load %arg10[%c0_58, %c0_59, %c0_60] : memref<8x18x18xf32, #tpu.memory_space<vmem>>, vector<8x16x16xf32>
    %46 = vector.shape_cast %45 : vector<8x16x16xf32> to vector<8x256xf32>
    %c0_61 = arith.constant 0 : index
    %c0_62 = arith.constant 0 : index
    %47 = vector.load %arg11[%c0_61, %c0_62] : memref<72x256xf32, #tpu.memory_space<vmem>>, vector<8x256xf32>
    tpu.vector_store %arg11[%c0_61, %c0_62], %46 {strides = array<i32>} : memref<72x256xf32, #tpu.memory_space<vmem>>, vector<8x256xf32>,
    %c0_63 = arith.constant 0 : index
    %c0_64 = arith.constant 0 : index
    %c1_65 = arith.constant 1 : index
    %48 = vector.load %arg10[%c0_63, %c0_64, %c1_65] : memref<8x18x18xf32, #tpu.memory_space<vmem>>, vector<8x16x16xf32>
    %49 = vector.shape_cast %48 : vector<8x16x16xf32> to vector<8x256xf32>
    %c8_66 = arith.constant 8 : index
    %c0_67 = arith.constant 0 : index
    %50 = vector.load %arg11[%c8_66, %c0_67] : memref<72x256xf32, #tpu.memory_space<vmem>>, vector<8x256xf32>
    tpu.vector_store %arg11[%c8_66, %c0_67], %49 {strides = array<i32>} : memref<72x256xf32, #tpu.memory_space<vmem>>, vector<8x256xf32>,
    %c0_68 = arith.constant 0 : index
    %c0_69 = arith.constant 0 : index
    %c2_70 = arith.constant 2 : index
    %51 = vector.load %arg10[%c0_68, %c0_69, %c2_70] : memref<8x18x18xf32, #tpu.memory_space<vmem>>, vector<8x16x16xf32>
    %52 = vector.shape_cast %51 : vector<8x16x16xf32> to vector<8x256xf32>
    %c16_71 = arith.constant 16 : index
    %c0_72 = arith.constant 0 : index
    %53 = vector.load %arg11[%c16_71, %c0_72] : memref<72x256xf32, #tpu.memory_space<vmem>>, vector<8x256xf32>
    tpu.vector_store %arg11[%c16_71, %c0_72], %52 {strides = array<i32>} : memref<72x256xf32, #tpu.memory_space<vmem>>, vector<8x256xf32>,
    %c0_73 = arith.constant 0 : index
    %c1_74 = arith.constant 1 : index
    %c0_75 = arith.constant 0 : index
    %54 = vector.load %arg10[%c0_73, %c1_74, %c0_75] : memref<8x18x18xf32, #tpu.memory_space<vmem>>, vector<8x16x16xf32>
    %55 = vector.shape_cast %54 : vector<8x16x16xf32> to vector<8x256xf32>
    %c24_76 = arith.constant 24 : index
    %c0_77 = arith.constant 0 : index
    %56 = vector.load %arg11[%c24_76, %c0_77] : memref<72x256xf32, #tpu.memory_space<vmem>>, vector<8x256xf32>
    tpu.vector_store %arg11[%c24_76, %c0_77], %55 {strides = array<i32>} : memref<72x256xf32, #tpu.memory_space<vmem>>, vector<8x256xf32>,
    %c0_78 = arith.constant 0 : index
    %c1_79 = arith.constant 1 : index
    %c1_80 = arith.constant 1 : index
    %57 = vector.load %arg10[%c0_78, %c1_79, %c1_80] : memref<8x18x18xf32, #tpu.memory_space<vmem>>, vector<8x16x16xf32>
    %58 = vector.shape_cast %57 : vector<8x16x16xf32> to vector<8x256xf32>
    %c32_81 = arith.constant 32 : index
    %c0_82 = arith.constant 0 : index
    %59 = vector.load %arg11[%c32_81, %c0_82] : memref<72x256xf32, #tpu.memory_space<vmem>>, vector<8x256xf32>
    tpu.vector_store %arg11[%c32_81, %c0_82], %58 {strides = array<i32>} : memref<72x256xf32, #tpu.memory_space<vmem>>, vector<8x256xf32>,
    %c0_83 = arith.constant 0 : index
    %c1_84 = arith.constant 1 : index
    %c2_85 = arith.constant 2 : index
    %60 = vector.load %arg10[%c0_83, %c1_84, %c2_85] : memref<8x18x18xf32, #tpu.memory_space<vmem>>, vector<8x16x16xf32>
    %61 = vector.shape_cast %60 : vector<8x16x16xf32> to vector<8x256xf32>
    %c40 = arith.constant 40 : index
    %c0_86 = arith.constant 0 : index
    %62 = vector.load %arg11[%c40, %c0_86] : memref<72x256xf32, #tpu.memory_space<vmem>>, vector<8x256xf32>
    tpu.vector_store %arg11[%c40, %c0_86], %61 {strides = array<i32>} : memref<72x256xf32, #tpu.memory_space<vmem>>, vector<8x256xf32>,
    %c0_87 = arith.constant 0 : index
    %c2_88 = arith.constant 2 : index
    %c0_89 = arith.constant 0 : index
    %63 = vector.load %arg10[%c0_87, %c2_88, %c0_89] : memref<8x18x18xf32, #tpu.memory_space<vmem>>, vector<8x16x16xf32>
    %64 = vector.shape_cast %63 : vector<8x16x16xf32> to vector<8x256xf32>
    %c48 = arith.constant 48 : index
    %c0_90 = arith.constant 0 : index
    %65 = vector.load %arg11[%c48, %c0_90] : memref<72x256xf32, #tpu.memory_space<vmem>>, vector<8x256xf32>
    tpu.vector_store %arg11[%c48, %c0_90], %64 {strides = array<i32>} : memref<72x256xf32, #tpu.memory_space<vmem>>, vector<8x256xf32>,
    %c0_91 = arith.constant 0 : index
    %c2_92 = arith.constant 2 : index
    %c1_93 = arith.constant 1 : index
    %66 = vector.load %arg10[%c0_91, %c2_92, %c1_93] : memref<8x18x18xf32, #tpu.memory_space<vmem>>, vector<8x16x16xf32>
    %67 = vector.shape_cast %66 : vector<8x16x16xf32> to vector<8x256xf32>
    %c56 = arith.constant 56 : index
    %c0_94 = arith.constant 0 : index
    %68 = vector.load %arg11[%c56, %c0_94] : memref<72x256xf32, #tpu.memory_space<vmem>>, vector<8x256xf32>
    tpu.vector_store %arg11[%c56, %c0_94], %67 {strides = array<i32>} : memref<72x256xf32, #tpu.memory_space<vmem>>, vector<8x256xf32>,
    %c0_95 = arith.constant 0 : index
    %c2_96 = arith.constant 2 : index
    %c2_97 = arith.constant 2 : index
    %69 = vector.load %arg10[%c0_95, %c2_96, %c2_97] : memref<8x18x18xf32, #tpu.memory_space<vmem>>, vector<8x16x16xf32>
    %70 = vector.shape_cast %69 : vector<8x16x16xf32> to vector<8x256xf32>
    %c64 = arith.constant 64 : index
    %c0_98 = arith.constant 0 : index
    %71 = vector.load %arg11[%c64, %c0_98] : memref<72x256xf32, #tpu.memory_space<vmem>>, vector<8x256xf32>
    tpu.vector_store %arg11[%c64, %c0_98], %70 {strides = array<i32>} : memref<72x256xf32, #tpu.memory_space<vmem>>, vector<8x256xf32>,
    %c0_99 = arith.constant 0 : index
    %c0_100 = arith.constant 0 : index
    %72 = vector.load %arg4[%c0_99, %c0_100] : memref<8x72xf32, #tpu.memory_space<vmem>>, vector<8x72xf32>
    %c0_101 = arith.constant 0 : index
    %c0_102 = arith.constant 0 : index
    %73 = vector.load %arg11[%c0_101, %c0_102] : memref<72x256xf32, #tpu.memory_space<vmem>>, vector<72x256xf32>
    %cst_103 = arith.constant dense<0.000000e+00> : vector<8x256xf32>
    %74 = tpu.matmul %72, %73, %cst_103 {dimension_numbers = #tpu.dot_dimension_numbers<[1], [0], [0], [1], [0, 0, 1, 1], [], []>} : vector<8x72xf32>, vector<72x256xf32>, vector<8x256xf32> -> vector<8x256xf32>
    %c0_104 = arith.constant 0 : index
    %c0_105 = arith.constant 0 : index
    %75 = vector.load %arg5[%c0_104, %c0_105] : memref<8x1xf32, #tpu.memory_space<vmem>>, vector<8x1xf32>
    %76 = vector.broadcast %75 : vector<8x1xf32> to vector<8x256xf32>
    %77 = arith.addf %74, %76 : vector<8x256xf32>
    %c0_106 = arith.constant 0 : index
    %c0_107 = arith.constant 0 : index
    %78 = vector.load %arg6[%c0_106, %c0_107] : memref<8x4xf32, #tpu.memory_space<vmem>>, vector<8x4xf32>
    %cst_108 = arith.constant dense<0.000000e+00> : vector<8x256xf32>
    %79 = tpu.matmul %78, %1, %cst_108 {dimension_numbers = #tpu.dot_dimension_numbers<[1], [0], [0], [1], [0, 0, 1, 1], [], []>} : vector<8x4xf32>, vector<4x256xf32>, vector<8x256xf32> -> vector<8x256xf32>
    %80 = arith.addf %77, %79 : vector<8x256xf32>
    %cst_109 = arith.constant 0.000000e+00 : f32
    %81 = vector.broadcast %cst_109 : f32 to vector<8x256xf32>
    %82 = arith.maximumf %80, %81 : vector<8x256xf32>
    %c0_110 = arith.constant 0 : index
    %c0_111 = arith.constant 0 : index
    %c0_112 = arith.constant 0 : index
    %83 = vector.load %arg7[%c0_110, %c0_111, %c0_112] : memref<1x8x256xf32, #tpu.memory_space<vmem>>, vector<1x8x256xf32>
    %84 = vector.shape_cast %83 : vector<1x8x256xf32> to vector<8x256xf32>
    %85 = vector.shape_cast %82 : vector<8x256xf32> to vector<1x8x256xf32>
    tpu.vector_store %arg7[%c0_110, %c0_111, %c0_112], %85 {strides = array<i32>} : memref<1x8x256xf32, #tpu.memory_space<vmem>>, vector<1x8x256xf32>,
    return
  }
  func.func @transform_0(%arg0: i32) -> (i32, i32, i32) {
    %c0_i32 = arith.constant 0 : i32
    %c0_i32_0 = arith.constant 0 : i32
    %c0_i32_1 = arith.constant 0 : i32
    return %arg0, %c0_i32, %c0_i32_0 : i32, i32, i32
  }
  func.func @transform_1(%arg0: i32) -> (i32, i32) {
    %c0_i32 = arith.constant 0 : i32
    %c0_i32_0 = arith.constant 0 : i32
    %c0_i32_1 = arith.constant 0 : i32
    return %c0_i32, %c0_i32_0 : i32, i32
  }
  func.func @transform_2(%arg0: i32) -> (i32, i32) {
    %c0_i32 = arith.constant 0 : i32
    %c0_i32_0 = arith.constant 0 : i32
    %c0_i32_1 = arith.constant 0 : i32
    return %c0_i32, %c0_i32_0 : i32, i32
  }
  func.func @transform_3(%arg0: i32) -> (i32, i32) {
    %c0_i32 = arith.constant 0 : i32
    %c0_i32_0 = arith.constant 0 : i32
    %c0_i32_1 = arith.constant 0 : i32
    return %c0_i32, %c0_i32_0 : i32, i32
  }
  func.func @transform_4(%arg0: i32) -> (i32, i32) {
    %c0_i32 = arith.constant 0 : i32
    %c0_i32_0 = arith.constant 0 : i32
    %c0_i32_1 = arith.constant 0 : i32
    return %c0_i32, %c0_i32_0 : i32, i32
  }
  func.func @transform_5(%arg0: i32) -> (i32, i32) {
    %c0_i32 = arith.constant 0 : i32
    %c0_i32_0 = arith.constant 0 : i32
    %c0_i32_1 = arith.constant 0 : i32
    return %c0_i32, %c0_i32_0 : i32, i32
  }
  func.func @transform_6(%arg0: i32) -> (i32, i32, i32) {
    %c0_i32 = arith.constant 0 : i32
    %c0_i32_0 = arith.constant 0 : i32
    %c0_i32_1 = arith.constant 0 : i32
    return %arg0, %c0_i32, %c0_i32_0 : i32, i32, i32
  }
}

</mosaic_0001>

<bundles_post_ra>
// kernel: tpu_custom_call.1
= control target key start
LH: loop header
LB: loop body
LE: loop exit
PB: predicated region body
PF: predicated region fallthrough
CT: control target
= control target key end

     0   :  { %11 = vsyncpa [#allocation7], 0  ;;  %s12221_s0 = inlined_call_operand.vmem [shape: f32[2,4,256], index: 0, kind: input, shape index: {}]   ;;  %s12222_s1 = inlined_call_operand.vmem [shape: f32[8,36], index: 1, kind: input, shape index: {}]   ;;  %s12223_s2 = inlined_call_operand.vmem [shape: f32[8,1], index: 2, kind: input, shape index: {}]   ;;  %s12224_s3 = inlined_call_operand.hbm [shape: f32[8,72], index: 3, kind: input, shape index: {}]   ;;  %s12225_s4 = inlined_call_operand.vmem [shape: f32[8,1], index: 4, kind: input, shape index: {}]   ;;  %s12226_s5 = inlined_call_operand.vmem [shape: f32[8,4], index: 5, kind: input, shape index: {}]   ;;  %s12227_s6 = inlined_call_operand.hbm [shape: f32[2,8,256], index: 6, kind: output, shape index: {}]  }
   0x1   :  { %12 = vsyncpa [#allocation8], 0 }
   0x2   :  { %14 = vsyncpa [#allocation8 + $0x1], 0  ;;  %s7080_s21 = smov 0   ;;  %s7082_s22 = smov 0  }
   0x3   :  { %s7084_s23 = smov 0   ;;  %s7086_s24 = smov 0  }
   0x4 LB: > { %s7101_s25 = sadd.s32 4294967295, %s7028_s24   ;;  %s6311_s26 = sadd.s32 4294967294, %s7028_s24   ;;  %s7028_s24 = sphi %s7086_s24, %s12790_s24   ;;  %s7024_s23 = sphi %s7084_s23, %s12789_s23   ;;  %s7020_s22 = sphi %s7082_s22, %s12788_s22   ;;  %s7016_s21 = sphi %s7080_s21, %s12787_s21  }
   0x5   : > { %s7105_s27 = sadd.s32 1, %s7028_s24   ;;  %s158_s28 = sadd.s32 1, %s7024_s23 }
   0x6   : > { %s155_s29 = ssub.s32 %s7028_s24, %s7105_s27  ;;  %p168_p0 = scmp.ne.s32.totalorder %s7024_s23, %s7020_s22 }
   0x7   : > { %p156_p1 = scmp.eq.s32.totalorder %s155_s29, 0  ;;  %p169_p2 = scmp.eq.s32.totalorder %s7101_s25, 1 }
   0x8   : > { %p174_p3 = scmp.ne.s32.totalorder %s7020_s22, %s7016_s21  ;;  %p175_p4 = scmp.eq.s32.totalorder %s6311_s26, 1 }
   0x9   : > { %s7116_s30 = scalar_select %p156_p1, %s7024_s23, %s158_s28  }
   0xa   : > { %p7118_p5 = por %p169_p2, %p168_p0  ;;  %p7122_p6 = por %p175_p4, %p174_p3 }
   0xb   : > { %p6312_p7 = scmp.ge.s32.totalorder %s7028_s24, 1  ;;  %p182_p8 = scmp.lt.s32.totalorder %s7028_s24, 3 }
   0xc   : > { %p6355_p9 = scmp.eq.s32.totalorder %s7101_s25, 0  ;;  %s200_s11 = sshll.u32 %s12224_s3, 4  ;;  %s201_s11 = int_to_ptr.hbm [resolvable:$true] %s200_s11 }
   0xd   : > { %p183_p10 = pnand %p6312_p7, %p182_p8  ;;  %s7030_s12 = smov [#allocation6]  }
   0xe   : > { %s202_s13 = sshll.u32 %s7030_s12, 4  ;;  %s203_s13 = int_to_ptr.vmem [resolvable:$true] %s202_s13 }
   0xf   : > { %p6347_p11 = pneg %p183_p10  ;;  %229 = sbr.rel (%p183_p10) target bundleno = 2070 (0x816), region = 44 }
  0x11   : > { %p6348_p12 = pnand %p6355_p9, %p6347_p11 }
  0x13   : > { %6350 = dma.hbm_to_vmem [thread:$0]  (!%p6348_p12), %s201_s11, 128, %s203_s13, [#allocation7]  }
  0x14   : > { %7007 = dma.done.wait (%p6355_p9), [#allocation7], 128  }
  0x15   : > { %7009 = vsyncadd (%p6355_p9), [#allocation7], 4294967168  ;;  %p260_p13 = scmp.lt.s32.totalorder %s7101_s25, 1  ;;  %s7031_s19 = smov 80   ;;  %v7038_v1 = vmov 1983009808  }
  0x16   : > { %s7032_s20 = smov 112   ;;  %s7033_s26 = smov 48   ;;  %v322_v2 = vunpack.c.l.s4 %v7038_v1  ;;  %vm319_vm0 = vcmask 1047556   ;;  %v7039_v11 = vmov 1934713408   ;;  %vm266_vm1 = vcmask 146432  }
  0x17   : > { %s261_s14 = scalar_select %p260_p13, %s7101_s25, 1  ;;  %v336_v12 = vunpack.c.l.s4 %v7039_v11  ;;  %v7040_v53 = vmov 0.0   ;;  %vm269_vm2 = vcmask 140288   ;;  %vm502_vm3 = vcmask 138248  }
  0x18   : > { %s7034_s28 = smov 96   ;;  %s7035_s29 = smov 64   ;;  %v7153_v8 = vunpack.c.0.s8 %v322_v2  ;;  %268 = vst.msk [vmem:[#allocation2 + $0x8] sm:$0xff] %vm266_vm1, %v7040_v53  ;;  %vm687_vm4 = vcmask 130048   ;;  %vm689_vm5 = vcmask 261120   ;;  %vm691_vm6 = vcmask 392192  }
  0x19   : > { %s6339_s15 = sshll.u32 %s261_s14, 3  ;;  %s7036_s9 = smov 32   ;;  %v7160_v17 = vunpack.c.0.s8 %v336_v12  ;;  %270 = vst.msk [vmem:[#allocation2 + $0x10] sm:$0x3] %vm269_vm2, %v7040_v53  ;;  %vm693_vm7 = vcmask 523264   ;;  %vm695_vm8 = vcmask 654336  }
  0x1a   : > { %s264_s18 = scalar_lea.vmem %s12221_s0, %s6339_s15  ;;  %s7037_s10 = smov 16   ;;  %12361 = vst [vmem:[#allocation12_spill] sm:$0xff] %v7153_v8  ;;  %vm697_vm9 = vcmask 785408   ;;  %vm699_vm10 = vcmask 916480   ;;  %vm2483_vm11 = vcmask 1043456   ;;  %vm2479_vm12 = vcmask 293888  }
  0x1b   : > { %v7137_v0 = vld [vmem:[%s264_s18] sm:$0xff]  ;;  %12362 = vst [vmem:[#allocation13_spill] sm:$0xff] %v7160_v17  ;;  %s7041_s11 = smov 1   ;;  %s7042_s12 = smov 127   ;;  %vm6169_vm13 = vcmask 31744   ;;  %vm6121_vm14 = vcmask 588800  }
  0x1c   : > { %291 = vrot.lane.b32.xlu1 %v7137_v0, %s7031_s19  ;;  %283 = vrot.lane.b32.xlu0 %v7137_v0, %s7032_s20  ;;  %v281_v13 = vrot.slane %v7137_v0, 4  ;;  %267 = vst.msk [vmem:[#allocation2] sm:$0xff] %vm266_vm1, %v7040_v53  ;;  %s7043_s13 = smov 126  }
  0x1d   : > { %299 = vrot.lane.b32.xlu2 %v7137_v0, %s7033_s26  ;;  %271 = vst.msk [vmem:[#allocation2 + $0x18] sm:$0xff] %vm266_vm1, %v7040_v53 }
  0x1e   : > { %272 = vst.msk [vmem:[#allocation2 + $0x20] sm:$0xff] %vm266_vm1, %v7040_v53 }
  0x1f   : > { %273 = vst.msk [vmem:[#allocation2 + $0x28] sm:$0x3] %vm269_vm2, %v7040_v53 }
  0x20   : > { %274 = vst.msk [vmem:[#allocation2 + $0x30] sm:$0xff] %vm266_vm1, %v7040_v53 }
  0x21   : > { %275 = vst.msk [vmem:[#allocation2 + $0x38] sm:$0xff] %vm266_vm1, %v7040_v53 }
  0x22   : > { %276 = vst.msk [vmem:[#allocation2 + $0x40] sm:$0x3] %vm269_vm2, %v7040_v53 }
  0x23   : > { %277 = vst.msk [vmem:[#allocation2 + $0x48] sm:$0xff] %vm266_vm1, %v7040_v53 }
  0x24   : > { %287 = vrot.lane.b32.xlu0 %v7137_v0, %s7034_s28  ;;  %295 = vrot.lane.b32.xlu1 %v7137_v0, %s7035_s29  ;;  %278 = vst.msk [vmem:[#allocation2 + $0x50] sm:$0xff] %vm266_vm1, %v7040_v53 }
  0x25   : > { %303 = vrot.lane.b32.xlu2 %v7137_v0, %s7036_s9  ;;  %279 = vst.msk [vmem:[#allocation2 + $0x58] sm:$0x3] %vm269_vm2, %v7040_v53 }
  0x26   : > { %2532 = vst.msk [vmem:[#allocation4] sm:$0xff] %vm266_vm1, %v7040_v53 }
  0x27   : > { %2533 = vst.msk [vmem:[#allocation4 + $0x8] sm:$0xff] %vm266_vm1, %v7040_v53 }
  0x28   : > { %2534 = vst.msk [vmem:[#allocation4 + $0x10] sm:$0x3] %vm269_vm2, %v7040_v53 }
  0x29   : > { %2535 = vst.msk [vmem:[#allocation4 + $0x18] sm:$0xff] %vm266_vm1, %v7040_v53 }
  0x2a   : > { %2536 = vst.msk [vmem:[#allocation4 + $0x20] sm:$0xff] %vm266_vm1, %v7040_v53 }
  0x2b   : > { %2537 = vst.msk [vmem:[#allocation4 + $0x28] sm:$0x3] %vm269_vm2, %v7040_v53 }
  0x2c   : > { %307 = vrot.lane.b32.xlu0 %v7137_v0, %s7037_s10  ;;  %2538 = vst.msk [vmem:[#allocation4 + $0x30] sm:$0xff] %vm266_vm1, %v7040_v53 }
  0x2d   : > { %2539 = vst.msk [vmem:[#allocation4 + $0x38] sm:$0xff] %vm266_vm1, %v7040_v53 }
  0x2e   : > { %2540 = vst.msk [vmem:[#allocation4 + $0x40] sm:$0x3] %vm269_vm2, %v7040_v53 }
  0x2f   : > { %2541 = vst.msk [vmem:[#allocation4 + $0x48] sm:$0xff] %vm266_vm1, %v7040_v53 }
  0x30   : > { %2542 = vst.msk [vmem:[#allocation4 + $0x50] sm:$0xff] %vm266_vm1, %v7040_v53 }
  0x31   : > { %2543 = vst.msk [vmem:[#allocation4 + $0x58] sm:$0x3] %vm269_vm2, %v7040_v53 }
  0x32   : > { %2544 = vst.msk [vmem:[#allocation4 + $0x60] sm:$0xff] %vm266_vm1, %v7040_v53 }
  0x33   : > { %2545 = vst.msk [vmem:[#allocation4 + $0x68] sm:$0xff] %vm266_vm1, %v7040_v53 }
  0x34   : > { %2546 = vst.msk [vmem:[#allocation4 + $0x70] sm:$0x3] %vm269_vm2, %v7040_v53 }
  0x35   : > { %2547 = vst.msk [vmem:[#allocation4 + $0x78] sm:$0xff] %vm266_vm1, %v7040_v53 }
  0x36   : > { %2548 = vst.msk [vmem:[#allocation4 + $0x80] sm:$0xff] %vm266_vm1, %v7040_v53 }
  0x37   : > { %2549 = vst.msk [vmem:[#allocation4 + $0x88] sm:$0x3] %vm269_vm2, %v7040_v53 }
  0x38   : > { %2550 = vst.msk [vmem:[#allocation4 + $0x90] sm:$0xff] %vm266_vm1, %v7040_v53 }
  0x39   : > { %2551 = vst.msk [vmem:[#allocation4 + $0x98] sm:$0xff] %vm266_vm1, %v7040_v53 }
  0x3a   : > { %2552 = vst.msk [vmem:[#allocation4 + $0xa0] sm:$0x3] %vm269_vm2, %v7040_v53 }
  0x3b   : > { %2553 = vst.msk [vmem:[#allocation4 + $0xa8] sm:$0xff] %vm266_vm1, %v7040_v53 }
  0x3c   : > { %2554 = vst.msk [vmem:[#allocation4 + $0xb0] sm:$0xff] %vm266_vm1, %v7040_v53 }
  0x3d   : > { %2555 = vst.msk [vmem:[#allocation4 + $0xb8] sm:$0x3] %vm269_vm2, %v7040_v53 }
  0x77   : > { %v300_v3 = vpop.permute.xlu2 %299 }
  0x78   : > { %v301_v32 = vrot.slane %v300_v3, 4 }
  0x7f   : > { %v304_v20 = vpop.permute.xlu2 %303 }
  0x80   : > { %v347_v28 = vrot.slane %v304_v20, 4 }
  0x8e   : > { %v292_v4 = vpop.permute.xlu1 %291  ;;  %v284_v5 = vpop.permute.xlu0 %283 }
  0x8f   : > { %v325_v6 = vrot.slane %v292_v4, 4  ;;  %v285_v7 = vrot.slane %v284_v5, 4 }
  0x91   : > { %v382_v9 = vsel %vm319_vm0, %v292_v4, %v285_v7  ;;  %v326_v10 = vsel %vm319_vm0, %v325_v6, %v284_v5 }
  0x92   : > { %v386_v14 = vperm.slane %v382_v9, %v7153_v8  ;;  %v330_v15 = vperm.slane %v326_v10, %v7153_v8 }
  0x94   : > { %v387_v21 = vrot.slane %v386_v14, 4  ;;  %v331_v25 = vrot.slane %v330_v15, 4 }
  0x96   : > { %v288_v16 = vpop.permute.xlu0 %287  ;;  %v296_v23 = vpop.permute.xlu1 %295 }
  0x97   : > { %v318_v18 = vrot.slane %v288_v16, 4  ;;  %v376_v19 = vsel %vm319_vm0, %v288_v16, %v281_v13  ;;  %v297_v30 = vrot.slane %v296_v23, 4  ;;  %v348_v35 = vsel %vm319_vm0, %v347_v28, %v296_v23 }
  0x98   : > { %v380_v22 = vperm.slane %v376_v19, %v7153_v8  ;;  %v352_v43 = vperm.slane %v348_v35, %v7153_v8 }
  0x99   : > { %v320_v24 = vsel %vm319_vm0, %v318_v18, %v7137_v0  ;;  %v404_v37 = vsel %vm319_vm0, %v304_v20, %v297_v30 }
  0x9a   : > { %v324_v26 = vperm.slane %v320_v24, %v7153_v8  ;;  %v388_v27 = vsel %vm319_vm0, %v387_v21, %v380_v22  ;;  %v408_v46 = vperm.slane %v404_v37, %v7153_v8  ;;  %v389_v49 = vrot.slane %v380_v22, 4 }
  0x9b   : > { %v394_v29 = vperm.slane %v388_v27, %v7160_v17  ;;  %v361_v54 = vrot.slane %v352_v43, 4 }
  0x9c   : > { %v332_v31 = vsel %vm319_vm0, %v331_v25, %v324_v26  ;;  %v333_v50 = vrot.slane %v324_v26, 4  ;;  %v417_v56 = vrot.slane %v408_v46, 4  ;;  %v390_v58 = vsel %vm319_vm0, %v386_v14, %v389_v49 }
  0x9d   : > { %v399_v33 = vrot.slane %v394_v29, 4  ;;  %451 = vst [vmem:[#allocation1 + $0x10] ss:$2 sm:$0xff] %v394_v29  ;;  %v338_v34 = vperm.slane %v332_v31, %v7160_v17  ;;  %v398_v2 = vperm.slane %v390_v58, %v7160_v17 }
  0x9e   : > { %v308_v36 = vpop.permute.xlu0 %307  ;;  %v334_v61 = vsel %vm319_vm0, %v330_v15, %v333_v50 }
  0x9f   : > { %v353_v38 = vrot.slane %v308_v36, 4  ;;  %v410_v39 = vsel %vm319_vm0, %v308_v36, %v301_v32  ;;  %447 = vst [vmem:[#allocation1] ss:$2 sm:$0xff] %v338_v34  ;;  %v343_v40 = vrot.slane %v338_v34, 4  ;;  %v400_v42 = vsel %vm319_vm0, 0.0, %v399_v33 }
  0xa0   : > { %v414_v41 = vperm.slane %v410_v39, %v7153_v8  ;;  %461 = vst [vmem:[#allocation1 + $0x30] ss:$2 sm:$0xff] %v400_v42  ;;  %v342_v4 = vperm.slane %v334_v61, %v7160_v17  ;;  %v401_v10 = vrot.slane %v398_v2, 4 }
  0xa1   : > { %v354_v44 = vsel %vm319_vm0, %v353_v38, %v300_v3  ;;  %v344_v45 = vsel %vm319_vm0, 0.0, %v343_v40 }
  0xa2   : > { %v358_v47 = vperm.slane %v354_v44, %v7153_v8  ;;  %v415_v48 = vrot.slane %v414_v41, 4  ;;  %457 = vst [vmem:[#allocation1 + $0x20] ss:$2 sm:$0xff] %v344_v45  ;;  %v418_v3 = vsel %vm319_vm0, %v414_v41, %v417_v56  ;;  %v345_v11 = vrot.slane %v342_v4, 4 }
  0xa3   : > { %v426_v7 = vperm.slane %v418_v3, %v7160_v17  ;;  %v402_v16 = vsel %vm319_vm0, 0.0, %v401_v10 }
  0xa4   : > { %v359_v51 = vrot.slane %v358_v47, 4  ;;  %v416_v52 = vsel %vm319_vm0, %v415_v48, %v408_v46  ;;  %v362_v62 = vsel %vm319_vm0, %v358_v47, %v361_v54  ;;  %v346_v18 = vsel %vm319_vm0, 0.0, %v345_v11 }
  0xa5   : > { %v422_v55 = vperm.slane %v416_v52, %v7160_v17  ;;  %v370_v6 = vperm.slane %v362_v62, %v7160_v17  ;;  %v429_v14 = vrot.slane %v426_v7, 4 }
  0xa6   : > { %v360_v57 = vsel %vm319_vm0, %v359_v51, %v352_v43 }
  0xa7   : > { %453 = vst [vmem:[#allocation1 + $0x11] ss:$2 sm:$0xff] %v422_v55  ;;  %v366_v59 = vperm.slane %v360_v57, %v7160_v17  ;;  %v427_v60 = vrot.slane %v422_v55, 4  ;;  %v373_v13 = vrot.slane %v370_v6, 4  ;;  %v430_v21 = vsel %vm319_vm0, 0.0, %v429_v14 }
  0xa9   : > { %449 = vst [vmem:[#allocation1 + $0x1] ss:$2 sm:$0xff] %v366_v59  ;;  %v371_v63 = vrot.slane %v366_v59, 4  ;;  %v428_v1 = vsel %vm319_vm0, 0.0, %v427_v60  ;;  %v374_v20 = vsel %vm319_vm0, 0.0, %v373_v13 }
  0xaa   : > { %463 = vst [vmem:[#allocation1 + $0x31] ss:$2 sm:$0xff] %v428_v1 }
  0xab   : > { %v372_v5 = vsel %vm319_vm0, 0.0, %v371_v63 }
  0xac   : > { %459 = vst [vmem:[#allocation1 + $0x21] ss:$2 sm:$0xff] %v372_v5 }
  0xae   : > { %v455_v9 = vld.sshfl [vmem:[#allocation1 + $0x10] sm:$0xff pattern:$0x75316420] }
  0xaf   : > { %480 = vrot.lane.b32.xlu2 %v455_v9, %s7041_s11  ;;  %468 = vst [vmem:[#allocation1 + $0x10] ss:$2 sm:$0xff] %v398_v2 }
  0xb0   : > { %469 = vst [vmem:[#allocation1 + $0x11] ss:$2 sm:$0xff] %v426_v7  ;;  %v454_v12 = vld.sshfl [vmem:[#allocation1] sm:$0xff pattern:$0x75316420] }
  0xb1   : > { %478 = vrot.lane.b32.xlu1 %v454_v12, %s7041_s11  ;;  %466 = vst [vmem:[#allocation1] ss:$2 sm:$0xff] %v342_v4  ;;  %v465_v15 = vld.sshfl [vmem:[#allocation1 + $0x30] sm:$0xff pattern:$0x75316420] }
  0xb2   : > { %467 = vst [vmem:[#allocation1 + $0x1] ss:$2 sm:$0xff] %v370_v6 }
  0xb3   : > { %v464_v19 = vld.sshfl [vmem:[#allocation1 + $0x20] sm:$0xff pattern:$0x75316420]  ;;  %474 = vst [vmem:[#allocation1 + $0x30] ss:$2 sm:$0xff] %v402_v16 }
  0xb4   : > { %482 = vrot.lane.b32.xlu0 %v464_v19, %s7041_s11  ;;  %472 = vst [vmem:[#allocation1 + $0x20] ss:$2 sm:$0xff] %v346_v18 }
  0xb5   : > { %473 = vst [vmem:[#allocation1 + $0x21] ss:$2 sm:$0xff] %v374_v20 }
  0xb6   : > { %475 = vst [vmem:[#allocation1 + $0x31] ss:$2 sm:$0xff] %v430_v21 }
  0xb7   : > { %v471_v23 = vld.sshfl [vmem:[#allocation1 + $0x10] sm:$0xff pattern:$0x75316420] }
  0xb9   : > { %v470_v22 = vld.sshfl [vmem:[#allocation1] sm:$0xff pattern:$0x75316420]  ;;  %484 = vrot.lane.b32.xlu1 %v465_v15, %s7041_s11 }
  0xba   : > { %6166 = vst [vmem:[#allocation1] ss:$2 sm:$0xff] %v7137_v0  ;;  %486 = vrot.lane.b32.xlu2 %v470_v22, %s7041_s11 }
  0xbc   : > { %488 = vrot.lane.b32.xlu0 %v471_v23, %s7041_s11  ;;  %v476_v0 = vld.sshfl [vmem:[#allocation1 + $0x20] sm:$0xff pattern:$0x75316420] }
  0xbd   : > { %v477_v24 = vld.sshfl [vmem:[#allocation1 + $0x30] sm:$0xff pattern:$0x75316420] }
  0xc1   : > { %490 = vrot.lane.b32.xlu1 %v476_v0, %s7041_s11 }
  0xc2   : > { %492 = vrot.lane.b32.xlu2 %v477_v24, %s7041_s11 }
 0x109   : > { %v481_v25 = vpop.permute.xlu2 %480 }
 0x10a   : > { %504 = vst.msk [vmem:[#allocation2 + $0x9] sm:$0xff] %vm502_vm3, %v481_v25 }
 0x111   : > { %v7308_v45 = vld [vmem:[#allocation2 + $0x9] sm:$0xff] }
 0x112   : > { %v1230_v59 = vrot.slane %v7308_v45, 4  ;;  %v7393_v24 = vld [vmem:[#allocation2 + $0xa] sm:$0xff] }
 0x114   : > { %v487_v26 = vpop.permute.xlu2 %486 }
 0x115   : > { %507 = vst.msk [vmem:[#allocation2 + $0x31] sm:$0xff] %vm502_vm3, %v487_v26 }
 0x11c   : > { %v493_v27 = vpop.permute.xlu2 %492  ;;  %v7295_v34 = vld [vmem:[#allocation2 + $0x30] sm:$0xff] }
 0x11d   : > { %510 = vst.msk [vmem:[#allocation2 + $0x51] sm:$0xff] %vm502_vm3, %v493_v27  ;;  %v7299_v38 = vld [vmem:[#allocation2 + $0x31] sm:$0xff]  ;;  %v519_v39 = vrot.slane %v7295_v34, 4 }
 0x11e   : > { %v1172_v41 = vrot.slane %v7299_v38, 4 }
 0x123   : > { %v479_v28 = vpop.permute.xlu1 %478 }
 0x124   : > { %503 = vst.msk [vmem:[#allocation2 + $0x1] sm:$0xff] %vm502_vm3, %v479_v28  ;;  %v7318_v48 = vld [vmem:[#allocation2 + $0x51] sm:$0xff] }
 0x125   : > { %v1240_v63 = vrot.slane %v7318_v48, 4 }
 0x126   : > { %v483_v29 = vpop.permute.xlu0 %482 }
 0x127   : > { %505 = vst.msk [vmem:[#allocation2 + $0x19] sm:$0xff] %vm502_vm3, %v483_v29 }
 0x12b   : > { %v485_v30 = vpop.permute.xlu1 %484  ;;  %v7285_v31 = vld [vmem:[#allocation2 + $0x8] sm:$0xff]  ;;  %v710_v32 = vld [vmem:[#allocation2] sm:$0xff] }
 0x12c   : > { %v7287_v33 = vld [vmem:[#allocation2 + $0x1] sm:$0xff]  ;;  %506 = vst.msk [vmem:[#allocation2 + $0x21] sm:$0xff] %vm502_vm3, %v485_v30  ;;  %728 = vrot.lane.b32.xlu0 %v7285_v31, %s7042_s12  ;;  %958 = vrot.lane.b32.xlu1 %v7285_v31, %s7043_s13  ;;  %v521_v36 = vrot.slane %v710_v32, 4  ;;  %v520_v43 = vsel %vm319_vm0, %v519_v39, %v710_v32  ;;  %v577_v54 = vrot.slane %v7285_v31, 4 }
 0x12d   : > { %726 = vrot.lane.b32.xlu2 %v710_v32, %s7042_s12  ;;  %v1174_v37 = vrot.slane %v7287_v33, 4  ;;  %v7316_v47 = vld [vmem:[#allocation2 + $0x2] sm:$0xff]  ;;  %v1173_v50 = vsel %vm319_vm0, %v1172_v41, %v7287_v33  ;;  %v7337_v56 = vperm.slane %v520_v43, %v7153_v8 }
 0x12e   : > { %v489_v35 = vpop.permute.xlu0 %488  ;;  %v522_v40 = vsel %vm319_vm0, %v7295_v34, %v521_v36  ;;  %v7325_v51 = vld [vmem:[#allocation2 + $0x18] sm:$0xff]  ;;  %v1826_v1 = vrot.slane %v7316_v47, 4  ;;  %v7353_v2 = vperm.slane %v1173_v50, %v7153_v8 }
 0x12f   : > { %508 = vst.msk [vmem:[#allocation2 + $0x39] sm:$0xff] %vm502_vm3, %v489_v35  ;;  %v1175_v42 = vsel %vm319_vm0, %v7299_v38, %v1174_v37  ;;  %v7327_v52 = vld [vmem:[#allocation2 + $0x19] sm:$0xff]  ;;  %v7330_v53 = vperm.slane %v522_v40, %v7153_v8  ;;  %v533_v4 = vrot.slane %v7325_v51, 4  ;;  %v545_v12 = vrot.slane %v7337_v56, 4 }
 0x130   : > { %v7334_v55 = vperm.slane %v1175_v42, %v7153_v8  ;;  %v1186_v7 = vrot.slane %v7327_v52, 4 }
 0x131   : > { %v557_v9 = vrot.slane %v7330_v53, 4 }
 0x132   : > { %v1210_v11 = vrot.slane %v7334_v55, 4 }
 0x133   : > { %v491_v44 = vpop.permute.xlu1 %490  ;;  %v7310_v46 = vld [vmem:[#allocation2 + $0x21] sm:$0xff] }
 0x134   : > { %509 = vst.msk [vmem:[#allocation2 + $0x49] sm:$0xff] %vm502_vm3, %v491_v44  ;;  %956 = vrot.lane.b32.xlu0 %v710_v32, %s7043_s13  ;;  %1380 = vrot.lane.b32.xlu1 %v7308_v45, %s7042_s12  ;;  %v1242_v49 = vrot.slane %v7310_v46, 4  ;;  %v7344_v60 = vld [vmem:[#allocation2 + $0x20] sm:$0xff]  ;;  %v1241_v0 = vsel %vm319_vm0, %v1240_v63, %v7310_v46 }
 0x135   : > { %1604 = vrot.lane.b32.xlu2 %v7308_v45, %s7043_s13  ;;  %v7355_v3 = vld [vmem:[#allocation2 + $0x1a] sm:$0xff]  ;;  %v589_v14 = vrot.slane %v7344_v60, 4 }
 0x136   : > { %v7339_v57 = vld [vmem:[#allocation2 + $0x38] sm:$0xff]  ;;  %v1243_v6 = vsel %vm319_vm0, %v7318_v48, %v1242_v49  ;;  %v1838_v23 = vrot.slane %v7355_v3, 4 }
 0x137   : > { %v7341_v58 = vld [vmem:[#allocation2 + $0x39] sm:$0xff]  ;;  %v578_v62 = vsel %vm319_vm0, %v7339_v57, %v577_v54  ;;  %v575_v13 = vrot.slane %v7339_v57, 4  ;;  %v7384_v22 = vperm.slane %v1243_v6, %v7153_v8 }
 0x138   : > { %v7346_v61 = vld [vmem:[#allocation2 + $0x32] sm:$0xff]  ;;  %v7359_v5 = vperm.slane %v578_v62, %v7153_v8  ;;  %v1231_v10 = vsel %vm319_vm0, %v7341_v58, %v1230_v59  ;;  %v1228_v21 = vrot.slane %v7341_v58, 4 }
 0x139   : > { %v7372_v15 = vperm.slane %v1231_v10, %v7153_v8  ;;  %v1827_v16 = vsel %vm319_vm0, %v7346_v61, %v1826_v1  ;;  %v1824_v28 = vrot.slane %v7346_v61, 4  ;;  %v576_v40 = vsel %vm319_vm0, %v575_v13, %v7285_v31 }
 0x13a   : > { %v613_v27 = vrot.slane %v7359_v5, 4  ;;  %v1835_v35 = vperm.slane %v1827_v16, %v7153_v8  ;;  %v1229_v31 = vsel %vm319_vm0, %v1228_v21, %v7308_v45  ;;  %v1198_v21 = vrot.slane %v7353_v2, 4 }
 0x13b   : > { %v7376_v18 = vld [vmem:[#allocation2 + $0x48] sm:$0xff]  ;;  %v7378_v19 = vld [vmem:[#allocation2 + $0x50] sm:$0xff]  ;;  %v1235_v16 = vperm.slane %v1229_v31, %v7153_v8 }
 0x13c   : > { %v7380_v20 = vld [vmem:[#allocation2 + $0x49] sm:$0xff]  ;;  %1378 = vrot.lane.b32.xlu0 %v7287_v33, %s7042_s12  ;;  %1602 = vrot.lane.b32.xlu1 %v7287_v33, %s7043_s13  ;;  %v534_v25 = vsel %vm319_vm0, %v7376_v18, %v533_v4  ;;  %v590_v26 = vsel %vm319_vm0, %v7378_v19, %v589_v14  ;;  %v1266_v33 = vrot.slane %v7372_v15, 4  ;;  %v531_v36 = vrot.slane %v7376_v18, 4 }
 0x13d   : > { %2026 = vrot.lane.b32.xlu2 %v7393_v24, %s7042_s12  ;;  %v542_v29 = vperm.slane %v534_v25, %v7153_v8  ;;  %v7404_v30 = vld [vmem:[#allocation2 + $0x4a] sm:$0xff]  ;;  %v598_v32 = vperm.slane %v590_v26, %v7153_v8  ;;  %v587_v37 = vrot.slane %v7378_v19, 4  ;;  %v1187_v39 = vsel %vm319_vm0, %v7380_v20, %v1186_v7 }
 0x13e   : > { %v7423_v43 = vsel %vm319_vm0, %v7384_v22, %v1266_v33  ;;  %v1195_v44 = vperm.slane %v1187_v39, %v7153_v8  ;;  %v1184_v49 = vrot.slane %v7380_v20, 4  ;;  %v1836_v50 = vrot.slane %v7404_v30, 4  ;;  %v7479_v33 = vld [vmem:[#allocation2 + $0x52] sm:$0xff] }
 0x13f   : > { %v7416_v41 = vsel %vm319_vm0, %v542_v29, %v557_v9  ;;  %v7419_v42 = vsel %vm319_vm0, %v598_v32, %v613_v27  ;;  %v1839_v54 = vsel %vm319_vm0, %v7404_v30, %v1838_v23  ;;  %v1862_v63 = vrot.slane %v1835_v35, 4 }
 0x140   : > { %v7433_v59 = vsel %vm319_vm0, %v1195_v44, %v1210_v11  ;;  %v1847_v62 = vperm.slane %v1839_v54, %v7153_v8  ;;  %v555_v1 = vrot.slane %v542_v29, 4  ;;  %v7437_v4 = vperm.slane %v576_v40, %v7153_v8 }
 0x141   : > { %v588_v6 = vsel %vm319_vm0, %v587_v37, %v7344_v60  ;;  %v532_v7 = vsel %vm319_vm0, %v531_v36, %v7325_v51  ;;  %v1825_v9 = vsel %vm319_vm0, %v1824_v28, %v7316_v47  ;;  %v1264_v23 = vrot.slane %v7384_v22, 4 }
 0x142   : > { %v7446_v45 = vsel %vm319_vm0, %v1847_v62, %v1862_v63  ;;  %v7450_v10 = vsel %vm319_vm0, %v555_v1, %v7330_v53  ;;  %v594_v11 = vperm.slane %v588_v6, %v7153_v8  ;;  %v538_v13 = vperm.slane %v532_v7, %v7153_v8  ;;  %v7464_v53 = vld [vmem:[#allocation2 + $0x3a] sm:$0xff] }
 0x143   : > { %v601_v14 = vrot.slane %v7437_v4, 4  ;;  %v1831_v26 = vperm.slane %v1825_v9, %v7153_v8  ;;  %v1837_v27 = vsel %vm319_vm0, %v1836_v50, %v7355_v3  ;;  %v1247_v22 = vperm.slane %v1241_v0, %v7153_v8  ;;  %v7493_v50 = vld [vmem:[#allocation2 + $0x22] sm:$0xff] }
 0x144   : > { %2024 = vrot.lane.b32.xlu1 %v7316_v47, %s7042_s12  ;;  %962 = vrot.lane.b32.xlu0 %v7344_v60, %s7043_s13  ;;  %v7467_v25 = vsel %vm319_vm0, %v538_v13, %v545_v12  ;;  %v1185_v47 = vsel %vm319_vm0, %v1184_v49, %v7327_v52  ;;  %v1254_v29 = vrot.slane %v1235_v16, 4  ;;  %v1843_v12 = vperm.slane %v1837_v27, %v7153_v8 }
 0x145   : > { %732 = vrot.lane.b32.xlu2 %v7344_v60, %s7042_s12  ;;  %v7475_v28 = vsel %vm319_vm0, %v594_v11, %v601_v14  ;;  %v1191_v60 = vperm.slane %v1185_v47, %v7153_v8  ;;  %v1850_v36 = vrot.slane %v1831_v26, 4  ;;  %v611_v37 = vrot.slane %v598_v32, 4 }
 0x146   : > { %v1880_v39 = vrot.slane %v7464_v53, 4  ;;  %v7484_v40 = vsel %vm319_vm0, %v1247_v22, %v1254_v29  ;;  %v7491_v0 = vsel %vm319_vm0, %v1264_v23, %v7372_v15  ;;  %v1892_v31 = vrot.slane %v7479_v33, 4 }
 0x147   : > { %v7487_v49 = vsel %vm319_vm0, %v1191_v60, %v1198_v21  ;;  %v7496_v54 = vsel %vm319_vm0, %v1843_v12, %v1850_v36  ;;  %v7500_v32 = vsel %vm319_vm0, %v611_v37, %v7359_v5  ;;  %v1208_v63 = vrot.slane %v1195_v44, 4 }
 0x148   : > { %v1860_v1 = vrot.slane %v1847_v62, 4  ;;  %v1881_v15 = vsel %vm319_vm0, %v1880_v39, %v7393_v24  ;;  %v1893_v6 = vsel %vm319_vm0, %v1892_v31, %v7493_v50  ;;  %v1848_v21 = vrot.slane %v1843_v12, 4 }
 0x149   : > { %v7515_v5 = vsel %vm319_vm0, %v1208_v63, %v7334_v55  ;;  %v1887_v62 = vperm.slane %v1881_v15, %v7153_v8  ;;  %v1899_v7 = vperm.slane %v1893_v6, %v7153_v8  ;;  %v599_v47 = vrot.slane %v594_v11, 4 }
 0x14a   : > { %v7518_v44 = vsel %vm319_vm0, %v1860_v1, %v1835_v35  ;;  %v543_v35 = vrot.slane %v538_v13, 4  ;;  %v1196_v27 = vrot.slane %v1191_v60, 4  ;;  %v7666_v60 = vperm.slane %v7487_v49, %v7160_v17 }
 0x14b   : > { %v1906_v9 = vrot.slane %v1887_v62, 4  ;;  %v1904_v23 = vrot.slane %v1899_v7, 4  ;;  %v7681_v37 = vperm.slane %v7496_v54, %v7160_v17  ;;  %v7685_v39 = vperm.slane %v7500_v32, %v7160_v17 }
 0x14c   : > { %730 = vrot.lane.b32.xlu1 %v7325_v51, %s7042_s12  ;;  %1384 = vrot.lane.b32.xlu0 %v7310_v46, %s7042_s12  ;;  %v7536_v29 = vsel %vm319_vm0, %v543_v35, %v7337_v56  ;;  %v7550_v13 = vsel %vm319_vm0, %v1196_v27, %v7353_v2  ;;  %v566_v2 = vperm.slane %v7416_v41, %v7160_v17 }
 0x14d   : > { %960 = vrot.lane.b32.xlu2 %v7325_v51, %s7043_s13  ;;  %v7523_v14 = vsel %vm319_vm0, %v1899_v7, %v1906_v9  ;;  %v1252_v51 = vrot.slane %v1247_v22, 4  ;;  %v7542_v36 = vsel %vm319_vm0, %v1904_v23, %v1887_v62  ;;  %v1275_v41 = vperm.slane %v7423_v43, %v7160_v17 }
 0x14e   : > { %v1871_v43 = vperm.slane %v7446_v45, %v7160_v17  ;;  %v7709_v63 = vperm.slane %v7515_v5, %v7160_v17  ;;  %v7713_v1 = vperm.slane %v7518_v44, %v7160_v17  ;;  %v573_v5 = vrot.slane %v566_v2, 4 }
 0x14f   : > { %v7532_v55 = vsel %vm319_vm0, %v1252_v51, %v1235_v16  ;;  %v1282_v7 = vrot.slane %v1275_v41, 4  ;;  %v7729_v44 = vperm.slane %v7523_v14, %v7160_v17 }
 0x150   : > { %v574_v9 = vsel %vm319_vm0, 0.0, %v573_v5  ;;  %v1878_v27 = vrot.slane %v1871_v43, 4  ;;  %v627_v5 = vrot.slane %v7685_v39, 4 }
 0x151   : > { %v1283_v51 = vsel %vm319_vm0, 0.0, %v1282_v7 }
 0x154   : > { %1608 = vrot.lane.b32.xlu1 %v7310_v46, %s7043_s13  ;;  %1606 = vrot.lane.b32.xlu0 %v7327_v52, %s7043_s13  ;;  %v7539_v46 = vsel %vm319_vm0, %v1848_v21, %v1831_v26 }
 0x155   : > { %1382 = vrot.lane.b32.xlu2 %v7327_v52, %s7042_s12  ;;  %v7546_v52 = vsel %vm319_vm0, %v599_v47, %v7437_v4 }
 0x15c   : > { %2030 = vrot.lane.b32.xlu1 %v7493_v50, %s7042_s12  ;;  %2028 = vrot.lane.b32.xlu0 %v7355_v3, %s7042_s12 }
 0x15d   : > { %966 = vrot.lane.b32.xlu2 %v7339_v57, %s7043_s13 }
 0x164   : > { %736 = vrot.lane.b32.xlu1 %v7339_v57, %s7042_s12  ;;  %734 = vrot.lane.b32.xlu0 %v7295_v34, %s7042_s12 }
 0x165   : > { %1388 = vrot.lane.b32.xlu2 %v7341_v58, %s7042_s12 }
 0x16c   : > { %964 = vrot.lane.b32.xlu1 %v7295_v34, %s7043_s13  ;;  %1612 = vrot.lane.b32.xlu0 %v7341_v58, %s7043_s13 }
 0x16d   : > { %1610 = vrot.lane.b32.xlu2 %v7299_v38, %s7043_s13 }
 0x174   : > { %1386 = vrot.lane.b32.xlu1 %v7299_v38, %s7042_s12  ;;  %2034 = vrot.lane.b32.xlu0 %v7464_v53, %s7042_s12  ;;  %v1882_v38 = vrot.slane %v7393_v24, 4 }
 0x175   : > { %2032 = vrot.lane.b32.xlu2 %v7346_v61, %s7042_s12  ;;  %v7605_v61 = vperm.slane %v7419_v42, %v7160_v17  ;;  %v7624_v42 = vperm.slane %v7433_v59, %v7160_v17  ;;  %v7641_v59 = vperm.slane %v7450_v10, %v7160_v17  ;;  %v554_v10 = vperm.slane %v7467_v25, %v7160_v17 }
 0x176   : > { %v1883_v56 = vsel %vm319_vm0, %v7464_v53, %v1882_v38  ;;  %v7645_v53 = vperm.slane %v7475_v28, %v7160_v17  ;;  %v7662_v28 = vperm.slane %v7484_v40, %v7160_v17  ;;  %v7689_v40 = vperm.slane %v7491_v0, %v7160_v17 }
 0x177   : > { %v1891_v58 = vperm.slane %v1883_v56, %v7153_v8  ;;  %v629_v14 = vrot.slane %v7605_v61, 4 }
 0x179   : > { %v630_v56 = vsel %vm319_vm0, 0.0, %v629_v14 }
 0x17c   : > { %970 = vrot.lane.b32.xlu1 %v7378_v19, %s7043_s13  ;;  %740 = vrot.lane.b32.xlu0 %v7378_v19, %s7042_s12 }
 0x17d   : > { %738 = vrot.lane.b32.xlu2 %v7376_v18, %s7042_s12 }
 0x184   : > { %1392 = vrot.lane.b32.xlu1 %v7318_v48, %s7042_s12  ;;  %968 = vrot.lane.b32.xlu0 %v7376_v18, %s7043_s13  ;;  %v1918_v18 = vrot.slane %v1891_v58, 4 }
 0x185   : > { %1616 = vrot.lane.b32.xlu2 %v7318_v48, %s7043_s13  ;;  %v1894_v48 = vrot.slane %v7493_v50, 4 }
 0x187   : > { %v7588_v34 = vpop.permute.xlu2 %726  ;;  %v1895_v3 = vsel %vm319_vm0, %v7479_v33, %v1894_v48  ;;  %v1879_v48 = vsel %vm319_vm0, 0.0, %v1878_v27 }
 0x188   : > { %v1903_v19 = vperm.slane %v1895_v3, %v7153_v8 }
 0x18a   : > { %v1919_v24 = vsel %vm319_vm0, %v1903_v19, %v1918_v18  ;;  %v1916_v49 = vrot.slane %v1903_v19, 4  ;;  %v625_v18 = vrot.slane %v7645_v53, 4  ;;  %v569_v19 = vrot.slane %v554_v10, 4 }
 0x18c   : > { %1614 = vrot.lane.b32.xlu1 %v7380_v20, %s7043_s13  ;;  %1390 = vrot.lane.b32.xlu0 %v7380_v20, %s7042_s12  ;;  %v1917_v31 = vsel %vm319_vm0, %v1916_v49, %v1891_v58 }
 0x18d   : > { %2038 = vrot.lane.b32.xlu2 %v7479_v33, %s7042_s12  ;;  %v7705_v0 = vperm.slane %v1917_v31, %v7160_v17 }
 0x18f   : > { %v7599_v57 = vpop.permute.xlu2 %1604 }
 0x194   : > { %2036 = vrot.lane.b32.xlu1 %v7404_v30, %s7042_s12  ;;  %680 = vrot.lane.b32.xlu0 %v7605_v61, %s7034_s28  ;;  %v1927_v30 = vperm.slane %v1919_v24, %v7160_v17  ;;  %v1226_v61 = vrot.slane %v7624_v42, 4 }
 0x195   : > { %652 = vrot.lane.b32.xlu2 %v566_v2, %s7034_s28 }
 0x196   : > { %v1934_v47 = vrot.slane %v1927_v30, 4  ;;  %v1227_v24 = vsel %vm319_vm0, 0.0, %v1226_v61 }
 0x197   : > { %v7617_v20 = vpop.permute.xlu2 %2026 }
 0x198   : > { %12363 = vst [vmem:[#allocation14_spill] sm:$0xff] %v7617_v20  ;;  %v1935_v38 = vsel %vm319_vm0, 0.0, %v1934_v47 }
 0x19c   : > { %1333 = vrot.lane.b32.xlu1 %v1275_v41, %s7034_s28  ;;  %1305 = vrot.lane.b32.xlu0 %v7624_v42, %s7034_s28  ;;  %v626_v41 = vsel %vm319_vm0, 0.0, %v625_v18 }
 0x19d   : > { %1985 = vrot.lane.b32.xlu2 %v1927_v30, %s7034_s28  ;;  %v570_v30 = vsel %vm319_vm0, 0.0, %v569_v19  ;;  %v1224_v19 = vrot.slane %v7709_v63, 4 }
 0x19e   : > { %v7631_v4 = vpop.permute.xlu0 %728  ;;  %v7633_v11 = vpop.permute.xlu1 %958 }
 0x19f   : > { %v7635_v16 = vpop.permute.xlu2 %732 }
 0x1a4   : > { %1957 = vrot.lane.b32.xlu1 %v1871_v43, %s7034_s28  ;;  %644 = vrot.lane.b32.xlu0 %v7641_v59, %s7035_s29 }
 0x1a5   : > { %664 = vrot.lane.b32.xlu2 %v7645_v53, %s7036_s9  ;;  %v571_v53 = vrot.slane %v7641_v59, 4  ;;  %v628_v59 = vsel %vm319_vm0, 0.0, %v627_v5 }
 0x1a6   : > { %v7652_v26 = vpop.permute.xlu0 %956  ;;  %v7654_v22 = vpop.permute.xlu1 %1380 }
 0x1a7   : > { %v7656_v45 = vpop.permute.xlu2 %960 }
 0x1ac   : > { %636 = vrot.lane.b32.xlu1 %v554_v10, %s7036_s9  ;;  %1317 = vrot.lane.b32.xlu0 %v7662_v28, %s7036_s9  ;;  %v1222_v10 = vrot.slane %v7666_v60, 4 }
 0x1ad   : > { %1289 = vrot.lane.b32.xlu2 %v7666_v60, %s7036_s9 }
 0x1ae   : > { %v7673_v33 = vpop.permute.xlu0 %1378  ;;  %v7675_v12 = vpop.permute.xlu1 %1602  ;;  %v1223_v47 = vsel %vm319_vm0, 0.0, %v1222_v10 }
 0x1af   : > { %v7677_v25 = vpop.permute.xlu2 %1382 }
 0x1b4   : > { %1941 = vrot.lane.b32.xlu0 %v7681_v37, %s7036_s9  ;;  %672 = vrot.lane.b32.xlu1 %v7685_v39, %s7035_s29 }
 0x1b5   : > { %1325 = vrot.lane.b32.xlu2 %v7689_v40, %s7035_s29 }
 0x1b6   : > { %v7697_v50 = vpop.permute.xlu0 %962  ;;  %v7699_v54 = vpop.permute.xlu1 %2024 }
 0x1b7   : > { %12364 = vst [vmem:[#allocation15_spill] sm:$0xff] %v7699_v54  ;;  %v7701_v32 = vpop.permute.xlu2 %966 }
 0x1bc   : > { %1977 = vrot.lane.b32.xlu0 %v7705_v0, %s7035_s29  ;;  %1297 = vrot.lane.b32.xlu1 %v7709_v63, %s7035_s29 }
 0x1bd   : > { %1949 = vrot.lane.b32.xlu2 %v7713_v1, %s7035_s29 }
 0x1be   : > { %v7721_v15 = vpop.permute.xlu0 %1384  ;;  %v7723_v6 = vpop.permute.xlu1 %730 }
 0x1bf   : > { %v7725_v62 = vpop.permute.xlu2 %1388 }
 0x1c4   : > { %656 = vrot.lane.b32.xlu0 %v574_v9, %s7032_s20  ;;  %1969 = vrot.lane.b32.xlu1 %v7729_v44, %s7036_s9 }
 0x1c5   : > { %1337 = vrot.lane.b32.xlu2 %v1283_v51, %s7032_s20  ;;  %v572_v51 = vsel %vm319_vm0, 0.0, %v571_v53 }
 0x1c6   : > { %v7737_v35 = vpop.permute.xlu0 %1606  ;;  %v7739_v21 = vpop.permute.xlu1 %1608 }
 0x1c7   : > { %v7741_v23 = vpop.permute.xlu2 %1610 }
 0x1cc   : > { %1989 = vrot.lane.b32.xlu0 %v1935_v38, %s7032_s20  ;;  %684 = vrot.lane.b32.xlu1 %v630_v56, %s7032_s20  ;;  %v1278_v56 = vrot.slane %v7662_v28, 4  ;;  %v1225_v28 = vsel %vm319_vm0, 0.0, %v1224_v19 }
 0x1cd   : > { %1961 = vrot.lane.b32.xlu2 %v1879_v48, %s7032_s20  ;;  %v1280_v48 = vrot.slane %v7689_v40, 4 }
 0x1ce   : > { %v7750_v58 = vpop.permute.xlu0 %2028  ;;  %v7752_v2 = vpop.permute.xlu1 %2030 }
 0x1cf   : > { %12365 = vst [vmem:[#allocation16_spill] sm:$0xff] %v7750_v58  ;;  %v7754_v3 = vpop.permute.xlu2 %2032  ;;  %v1281_v53 = vsel %vm319_vm0, 0.0, %v1280_v48 }
 0x1d0   : > { %12366 = vst [vmem:[#allocation17_spill] sm:$0xff] %v7752_v2  ;;  %v808_v2 = vrot.slane %v7631_v4, 4 }
 0x1d1   : > { %12367 = vst [vmem:[#allocation18_spill] sm:$0xff] %v7754_v3 }
 0x1d4   : > { %1309 = vrot.lane.b32.xlu1 %v1227_v24, %s7032_s20  ;;  %668 = vrot.lane.b32.xlu0 %v626_v41, %s7033_s26 }
 0x1d5   : > { %640 = vrot.lane.b32.xlu2 %v570_v30, %s7033_s26  ;;  %v1279_v30 = vsel %vm319_vm0, 0.0, %v1278_v56 }
 0x1d6   : > { %v7764_v43 = vpop.permute.xlu0 %734  ;;  %v7766_v49 = vpop.permute.xlu1 %736 }
 0x1d7   : > { %v7768_v42 = vpop.permute.xlu2 %738  ;;  %v750_v7 = vrot.slane %v7764_v43, 4 }
 0x1d8   : > { %v762_v31 = vrot.slane %v7768_v42, 4 }
 0x1d9   : > { %v751_v27 = vsel %vm319_vm0, %v750_v7, %v7588_v34 }
 0x1da   : > { %v763_v9 = vsel %vm319_vm0, %v762_v31, %v7723_v6  ;;  %v7800_v24 = vperm.slane %v751_v27, %v7153_v8 }
 0x1db   : > { %v7780_v14 = vperm.slane %v763_v9, %v7153_v8  ;;  %v1874_v9 = vrot.slane %v7681_v37, 4 }
 0x1dc   : > { %648 = vrot.lane.b32.xlu1 %v572_v51, %s7031_s19  ;;  %1293 = vrot.lane.b32.xlu0 %v1223_v47, %s7033_s26  ;;  %v1876_v51 = vrot.slane %v7713_v1, 4  ;;  %v1930_v47 = vrot.slane %v7729_v44, 4  ;;  %v7844_v1 = vperm.slane %v7532_v55, %v7160_v17  ;;  %v752_v55 = vrot.slane %v7588_v34, 4 }
 0x1dd   : > { %676 = vrot.lane.b32.xlu2 %v628_v59, %s7031_s19  ;;  %v774_v61 = vrot.slane %v7780_v14, 4  ;;  %v1875_v56 = vsel %vm319_vm0, 0.0, %v1874_v9  ;;  %v7867_v9 = vperm.slane %v7542_v36, %v7160_v17  ;;  %v1038_v36 = vrot.slane %v7633_v11, 4 }
 0x1de   : > { %v7786_v60 = vpop.permute.xlu0 %1612  ;;  %v7788_v39 = vpop.permute.xlu1 %964  ;;  %v1877_v48 = vsel %vm319_vm0, 0.0, %v1876_v51  ;;  %v1931_v37 = vsel %vm319_vm0, 0.0, %v1930_v47  ;;  %v7884_v34 = vperm.slane %v7550_v13, %v7160_v17 }
 0x1df   : > { %v7792_v38 = vpop.permute.xlu2 %1616  ;;  %v7811_v40 = vsel %vm319_vm0, %v774_v61, %v7800_v24  ;;  %v1682_v63 = vrot.slane %v7786_v60, 4  ;;  %v7834_v61 = vperm.slane %v7536_v29, %v7160_v17  ;;  %12373 = vst [vmem:[#allocation24_spill] sm:$0xff] %v7867_v9 }
 0x1e0   : > { %v1694_v18 = vrot.slane %v7792_v38, 4  ;;  %12368 = vst [vmem:[#allocation19_spill] sm:$0xff] %v7811_v40  ;;  %v994_v40 = vrot.slane %v7656_v45, 4 }
 0x1e1   : > { %v1683_v59 = vsel %vm319_vm0, %v1682_v63, %v7599_v57  ;;  %v7863_v63 = vperm.slane %v7539_v46, %v7160_v17  ;;  %12375 = vst [vmem:[#allocation26_spill] sm:$0xff] %v7884_v34 }
 0x1e2   : > { %v1695_v41 = vsel %vm319_vm0, %v1694_v18, %v7739_v21  ;;  %v7837_v18 = vperm.slane %v1683_v59, %v7153_v8  ;;  %v753_v59 = vsel %vm319_vm0, %v7764_v43, %v752_v55 }
 0x1e3   : > { %v7816_v10 = vperm.slane %v1695_v41, %v7153_v8  ;;  %v1872_v43 = vrot.slane %v7863_v63, 4 }
 0x1e4   : > { %1321 = vrot.lane.b32.xlu1 %v1279_v30, %s7033_s26  ;;  %1329 = vrot.lane.b32.xlu0 %v1281_v53, %s7031_s19  ;;  %v1932_v30 = vrot.slane %v7705_v0, 4  ;;  %v567_v53 = vrot.slane %v7834_v61, 4  ;;  %v7873_v0 = vperm.slane %v7546_v52, %v7160_v17 }
 0x1e5   : > { %1301 = vrot.lane.b32.xlu2 %v1225_v28, %s7031_s19  ;;  %v1706_v27 = vrot.slane %v7816_v10, 4  ;;  %v1276_v28 = vrot.slane %v7844_v1, 4 }
 0x1e6   : > { %v7818_v31 = vpop.permute.xlu0 %2034  ;;  %v7820_v5 = vpop.permute.xlu1 %1386  ;;  %v1933_v51 = vsel %vm319_vm0, 0.0, %v1932_v30  ;;  %v568_v47 = vsel %vm319_vm0, 0.0, %v567_v53  ;;  %12374 = vst [vmem:[#allocation25_spill] sm:$0xff] %v7873_v0  ;;  %v7896_v30 = vperm.slane %v753_v59, %v7153_v8  ;;  %v623_v13 = vrot.slane %v7873_v0, 4 }
 0x1e7   : > { %12369 = vst [vmem:[#allocation20_spill] sm:$0xff] %v7818_v31  ;;  %v7822_v7 = vpop.permute.xlu2 %2038  ;;  %v7853_v29 = vsel %vm319_vm0, %v1706_v27, %v7837_v18  ;;  %v1277_v46 = vsel %vm319_vm0, 0.0, %v1276_v28  ;;  %v764_v28 = vrot.slane %v7723_v6, 4  ;;  %v1873_v31 = vsel %vm319_vm0, 0.0, %v1872_v43 }
 0x1e8   : > { %12370 = vst [vmem:[#allocation21_spill] sm:$0xff] %v7822_v7  ;;  %v788_v20 = vrot.slane %v7896_v30, 4 }
 0x1e9   : > { %12371 = vst [vmem:[#allocation22_spill] sm:$0xff] %v7853_v29  ;;  %v765_v59 = vsel %vm319_vm0, %v7768_v42, %v764_v28 }
 0x1ea   : > { %v7927_v42 = vperm.slane %v765_v59, %v7153_v8 }
 0x1ec   : > { %1945 = vrot.lane.b32.xlu1 %v1875_v56, %s7033_s26  ;;  %1953 = vrot.lane.b32.xlu0 %v1877_v48, %s7031_s19  ;;  %v1928_v56 = vrot.slane %v7867_v9, 4  ;;  %v1050_v48 = vrot.slane %v7697_v50, 4 }
 0x1ed   : > { %1973 = vrot.lane.b32.xlu2 %v1931_v37, %s7033_s26  ;;  %v1039_v37 = vsel %vm319_vm0, %v7701_v32, %v1038_v36 }
 0x1ee   : > { %v7847_v44 = vpop.permute.xlu1 %970  ;;  %v7849_v19 = vpop.permute.xlu0 %740  ;;  %v7908_v36 = vperm.slane %v1039_v37, %v7153_v8  ;;  %v1929_v6 = vsel %vm319_vm0, 0.0, %v1928_v56  ;;  %v820_v56 = vrot.slane %v7635_v16, 4 }
 0x1ef   : > { %v7855_v41 = vpop.permute.xlu2 %652  ;;  %v1051_v55 = vsel %vm319_vm0, %v7847_v44, %v1050_v48  ;;  %v624_v48 = vsel %vm319_vm0, 0.0, %v623_v13  ;;  %v818_v28 = vrot.slane %v7849_v19, 4 }
 0x1f0   : > { %12372 = vst [vmem:[#allocation23_spill] sm:$0xff] %v7855_v41  ;;  %v7922_v7 = vperm.slane %v1051_v55, %v7153_v8  ;;  %v1074_v13 = vrot.slane %v7908_v36, 4 }
 0x1f2   : > { %v1075_v54 = vsel %vm319_vm0, %v7922_v7, %v1074_v13 }
 0x1f4   : > { %1981 = vrot.lane.b32.xlu1 %v1933_v51, %s7031_s19  ;;  %632 = vrot.lane.b32.xlu0 %v568_v47, %s7037_s10  ;;  %v1220_v51 = vrot.slane %v7884_v34, 4  ;;  %v1684_v47 = vrot.slane %v7599_v57, 4 }
 0x1f5   : > { %1313 = vrot.lane.b32.xlu2 %v1277_v46, %s7037_s10  ;;  %v1460_v46 = vrot.slane %v7654_v22, 4 }
 0x1f6   : > { %v7886_v27 = vpop.permute.xlu1 %1392  ;;  %v7888_v52 = vpop.permute.xlu0 %968  ;;  %v1685_v37 = vsel %vm319_vm0, %v7786_v60, %v1684_v47  ;;  %v1221_v43 = vsel %vm319_vm0, 0.0, %v1220_v51  ;;  %v809_v60 = vsel %vm319_vm0, %v7766_v49, %v808_v2  ;;  %v1696_v2 = vrot.slane %v7739_v21, 4 }
 0x1f7   : > { %v7898_v53 = vpop.permute.xlu2 %1985  ;;  %v1461_v57 = vsel %vm319_vm0, %v7725_v62, %v1460_v46  ;;  %v1472_v46 = vrot.slane %v7721_v15, 4  ;;  %v992_v29 = vrot.slane %v7888_v52, 4  ;;  %v7960_v58 = vperm.slane %v809_v60, %v7153_v8 }
 0x1f8   : > { %12376 = vst [vmem:[#allocation27_spill] sm:$0xff] %v7898_v53  ;;  %v7942_v59 = vperm.slane %v1461_v57, %v7153_v8  ;;  %v982_v57 = vrot.slane %v7652_v26, 4  ;;  %v1697_v21 = vsel %vm319_vm0, %v7792_v38, %v1696_v2  ;;  %v1628_v38 = vrot.slane %v7675_v12, 4 }
 0x1fa   : > { %v1496_v2 = vrot.slane %v7942_v59, 4 }
 0x1fc   : > { %1965 = vrot.lane.b32.xlu0 %v1929_v6, %s7037_s10  ;;  %660 = vrot.lane.b32.xlu1 %v624_v48, %s7037_s10  ;;  %v789_v6 = vsel %vm319_vm0, %v7927_v42, %v788_v20  ;;  %v821_v48 = vsel %vm319_vm0, %v7849_v19, %v820_v56  ;;  %v1473_v20 = vsel %vm319_vm0, %v7886_v27, %v1472_v46 }
 0x1fd   : > { %1937 = vrot.lane.b32.xlu2 %v1873_v31, %s7037_s10  ;;  %v7945_v31 = vperm.slane %v1685_v37, %v7153_v8  ;;  %v806_v37 = vrot.slane %v7766_v49, 4  ;;  %v819_v19 = vsel %vm319_vm0, %v818_v28, %v7635_v16  ;;  %v7970_v13 = vperm.slane %v789_v6, %v7160_v17 }
 0x1fe   : > { %v7936_v55 = vpop.permute.xlu1 %1614  ;;  %v7938_v47 = vpop.permute.xlu0 %1390  ;;  %v7975_v60 = vperm.slane %v821_v48, %v7153_v8  ;;  %v7978_v46 = vperm.slane %v1075_v54, %v7160_v17  ;;  %v7983_v16 = vperm.slane %v1473_v20, %v7153_v8  ;;  %v993_v28 = vsel %vm319_vm0, %v992_v29, %v7656_v45 }
 0x1ff   : > { %v7947_v51 = vpop.permute.xlu2 %664  ;;  %v1414_v56 = vrot.slane %v7938_v47, 4  ;;  %v1720_v49 = vrot.slane %v7945_v31, 4  ;;  %v807_v6 = vsel %vm319_vm0, %v806_v37, %v7631_v4  ;;  %v844_v54 = vrot.slane %v7960_v58, 4 }
 0x200   : > { %12377 = vst [vmem:[#allocation28_spill] sm:$0xff] %v7947_v51  ;;  %v7994_v48 = vperm.slane %v1697_v21, %v7153_v8  ;;  %v825_v3 = vperm.slane %v819_v19, %v7153_v8  ;;  %v1640_v45 = vrot.slane %v7737_v35, 4  ;;  %v980_v29 = vrot.slane %v7788_v39, 4 }
 0x201   : > { %v1415_v4 = vsel %vm319_vm0, %v1414_v56, %v7677_v25  ;;  %v1629_v21 = vsel %vm319_vm0, %v7741_v23, %v1628_v38  ;;  %v999_v19 = vperm.slane %v993_v28, %v7153_v8  ;;  %v845_v53 = vsel %vm319_vm0, %v7975_v60, %v844_v54 }
 0x202   : > { %v1402_v56 = vrot.slane %v7820_v5, 4  ;;  %v1497_v38 = vsel %vm319_vm0, %v7983_v16, %v1496_v2  ;;  %v1641_v54 = vsel %vm319_vm0, %v7936_v55, %v1640_v45 }
 0x203   : > { %v8047_v45 = vperm.slane %v1497_v38, %v7160_v17 }
 0x204   : > { %1285 = vrot.lane.b32.xlu1 %v1221_v43, %s7037_s10  ;;  %883 = vrot.lane.b32.xlu0 %v7970_v13, %s7034_s28  ;;  %v983_v43 = vsel %vm319_vm0, %v7788_v39, %v982_v57  ;;  %v1721_v39 = vsel %vm319_vm0, %v7994_v48, %v1720_v49  ;;  %v813_v57 = vperm.slane %v807_v6, %v7153_v8 }
 0x205   : > { %1141 = vrot.lane.b32.xlu2 %v7978_v46, %s7034_s28  ;;  %v8025_v28 = vperm.slane %v983_v43, %v7153_v8  ;;  %v8033_v49 = vperm.slane %v1629_v21, %v7153_v8  ;;  %v981_v6 = vsel %vm319_vm0, %v980_v29, %v7652_v26  ;;  %v1004_v43 = vrot.slane %v999_v19, 4 }
 0x206   : > { %v8005_v37 = vpop.permute.xlu1 %2036  ;;  %v8007_v20 = vpop.permute.xlu0 %680  ;;  %v1403_v21 = vsel %vm319_vm0, %v1402_v56, %v7673_v33  ;;  %v8053_v26 = vperm.slane %v1641_v54, %v7153_v8  ;;  %v987_v29 = vperm.slane %v981_v6, %v7153_v8  ;;  %v1416_v56 = vrot.slane %v7677_v25, 4 }
 0x207   : > { %12378 = vst [vmem:[#allocation29_spill] sm:$0xff] %v8005_v37  ;;  %v8012_v34 = vpop.permute.xlu2 %1289  ;;  %v995_v37 = vsel %vm319_vm0, %v7888_v52, %v994_v40  ;;  %v8038_v40 = vperm.slane %v845_v53, %v7160_v17  ;;  %v8041_v52 = vperm.slane %v1721_v39, %v7160_v17  ;;  %v832_v53 = vrot.slane %v813_v57, 4 }
 0x208   : > { %12379 = vst [vmem:[#allocation30_spill] sm:$0xff] %v8007_v20  ;;  %v8030_v20 = vperm.slane %v1415_v4, %v7153_v8  ;;  %v8044_v2 = vperm.slane %v995_v37, %v7153_v8  ;;  %v1404_v4 = vrot.slane %v7673_v33, 4  ;;  %v1018_v37 = vrot.slane %v8025_v28, 4 }
 0x209   : > { %12380 = vst [vmem:[#allocation31_spill] sm:$0xff] %v8012_v34  ;;  %v830_v34 = vrot.slane %v825_v3, 4  ;;  %v1664_v38 = vrot.slane %v8033_v49, 4  ;;  %v8076_v0 = vperm.slane %v1403_v21, %v7153_v8  ;;  %v8084_v25 = vsel %vm319_vm0, %v1004_v43, %v987_v29 }
 0x20a   : > { %v1426_v39 = vrot.slane %v8030_v20, 4  ;;  %v1405_v54 = vsel %vm319_vm0, %v7820_v5, %v1404_v4  ;;  %12383 = vst [vmem:[#allocation34_spill] sm:$0xff] %v8084_v25  ;;  %v1417_v5 = vsel %vm319_vm0, %v7938_v47, %v1416_v56  ;;  %v1006_v56 = vrot.slane %v987_v29, 4 }
 0x20b   : > { %v8065_v33 = vsel %vm319_vm0, %v830_v34, %v813_v57  ;;  %v1019_v34 = vsel %vm319_vm0, %v8044_v2, %v1018_v37  ;;  %v833_v57 = vsel %vm319_vm0, %v825_v3, %v832_v53  ;;  %v1665_v4 = vsel %vm319_vm0, %v8053_v26, %v1664_v38 }
 0x20c   : > { %911 = vrot.lane.b32.xlu1 %v8038_v40, %s7034_s28  ;;  %1787 = vrot.lane.b32.xlu0 %v8041_v52, %s7034_s28  ;;  %12381 = vst [vmem:[#allocation32_spill] sm:$0xff] %v8065_v33  ;;  %v8091_v33 = vperm.slane %v1405_v54, %v7153_v8  ;;  %v8095_v21 = vsel %vm319_vm0, %v1426_v39, %v8076_v0  ;;  %v776_v53 = vrot.slane %v7800_v24, 4  ;;  %v786_v25 = vrot.slane %v7927_v42, 4 }
 0x20d   : > { %1563 = vrot.lane.b32.xlu2 %v8047_v45, %s7034_s28  ;;  %12384 = vst [vmem:[#allocation35_spill] sm:$0xff] %v8095_v21  ;;  %v8098_v37 = vperm.slane %v1019_v34, %v7160_v17  ;;  %v8101_v3 = vperm.slane %v833_v57, %v7160_v17  ;;  %v8104_v43 = vperm.slane %v1417_v5, %v7153_v8 }
 0x20e   : > { %v8071_v51 = vpop.permute.xlu1 %1333  ;;  %v8073_v6 = vpop.permute.xlu0 %1305  ;;  %v8107_v47 = vperm.slane %v1665_v4, %v7160_v17  ;;  %v1440_v39 = vrot.slane %v8091_v33, 4  ;;  %v1007_v5 = vsel %vm319_vm0, %v999_v19, %v1006_v56  ;;  %v777_v24 = vsel %vm319_vm0, %v7780_v14, %v776_v53 }
 0x20f   : > { %12382 = vst [vmem:[#allocation33_spill] sm:$0xff] %v8073_v6  ;;  %v8078_v9 = vpop.permute.xlu2 %1325  ;;  %v1036_v4 = vrot.slane %v7701_v32, 4  ;;  %v8133_v29 = vperm.slane %v1007_v5, %v7160_v17  ;;  %v1072_v6 = vrot.slane %v7922_v7, 4  ;;  %v8138_v41 = vperm.slane %v777_v24, %v7160_v17 }
 0x210   : > { %v1441_v57 = vsel %vm319_vm0, %v8104_v43, %v1440_v39  ;;  %v1048_v19 = vrot.slane %v7847_v44, 4  ;;  %v842_v39 = vrot.slane %v7975_v60, 4  ;;  %v787_v44 = vsel %vm319_vm0, %v786_v25, %v7896_v30 }
 0x211   : > { %v8130_v21 = vperm.slane %v1441_v57, %v7160_v17  ;;  %v1037_v32 = vsel %vm319_vm0, %v1036_v4, %v7633_v11  ;;  %v1073_v60 = vsel %vm319_vm0, %v1072_v6, %v7908_v36  ;;  %v1458_v57 = vrot.slane %v7725_v62, 4 }
 0x212   : > { %v1049_v53 = vsel %vm319_vm0, %v1048_v19, %v7697_v50  ;;  %v843_v56 = vsel %vm319_vm0, %v842_v39, %v7960_v58  ;;  %v8165_v11 = vperm.slane %v1037_v32, %v7153_v8  ;;  %v8169_v5 = vperm.slane %v787_v44, %v7160_v17 }
 0x213   : > { %v8172_v24 = vperm.slane %v1073_v60, %v7160_v17  ;;  %v8175_v30 = vperm.slane %v1049_v53, %v7153_v8  ;;  %v8178_v36 = vperm.slane %v843_v56, %v7160_v17  ;;  %v1470_v50 = vrot.slane %v7886_v27, 4 }
 0x214   : > { %1113 = vrot.lane.b32.xlu1 %v8098_v37, %s7034_s28  ;;  %895 = vrot.lane.b32.xlu0 %v8101_v3, %s7036_s9  ;;  %v1016_v58 = vrot.slane %v8044_v2, 4  ;;  %v1062_v62 = vrot.slane %v8165_v11, 4  ;;  %v1428_v6 = vrot.slane %v8076_v0, 4  ;;  %v1459_v25 = vsel %vm319_vm0, %v1458_v57, %v7654_v22 }
 0x215   : > { %1759 = vrot.lane.b32.xlu2 %v8107_v47, %s7034_s28  ;;  %v1471_v32 = vsel %vm319_vm0, %v1470_v50, %v7721_v15  ;;  %v8207_v22 = vperm.slane %v1459_v25, %v7153_v8  ;;  %v1626_v44 = vrot.slane %v7741_v23, 4  ;;  %v1438_v57 = vrot.slane %v8104_v43, 4 }
 0x216   : > { %v8117_v38 = vpop.permute.xlu1 %1957  ;;  %v8119_v54 = vpop.permute.xlu0 %644  ;;  %v1063_v19 = vsel %vm319_vm0, %v8175_v30, %v1062_v62  ;;  %v1429_v39 = vsel %vm319_vm0, %v8030_v20, %v1428_v6  ;;  %v1017_v0 = vsel %vm319_vm0, %v1016_v58, %v8025_v28  ;;  %v8217_v56 = vperm.slane %v1471_v32, %v7153_v8 }
 0x217   : > { %v8121_v34 = vpop.permute.xlu2 %1949  ;;  %v8211_v60 = vperm.slane %v1063_v19, %v7160_v17  ;;  %v8214_v53 = vperm.slane %v1429_v39, %v7160_v17  ;;  %v1494_v20 = vrot.slane %v7983_v16, 4  ;;  %v8221_v15 = vperm.slane %v1017_v0, %v7160_v17 }
 0x218   : > { %v1638_v28 = vrot.slane %v7936_v55, 4  ;;  %v1484_v23 = vrot.slane %v8207_v22, 4  ;;  %v1627_v16 = vsel %vm319_vm0, %v1626_v44, %v7675_v12  ;;  %v1439_v25 = vsel %vm319_vm0, %v1438_v57, %v8091_v33 }
 0x219   : > { %v1495_v62 = vsel %vm319_vm0, %v1494_v20, %v7942_v59  ;;  %v8249_v12 = vperm.slane %v1627_v16, %v7153_v8  ;;  %v1662_v59 = vrot.slane %v8053_v26, 4  ;;  %v8262_v0 = vperm.slane %v1439_v25, %v7160_v17 }
 0x21a   : > { %v1485_v43 = vsel %vm319_vm0, %v8217_v56, %v1484_v23  ;;  %v1639_v6 = vsel %vm319_vm0, %v1638_v28, %v7737_v35  ;;  %v8255_v39 = vperm.slane %v1495_v62, %v7160_v17  ;;  %v1708_v35 = vrot.slane %v7837_v18, 4 }
 0x21b   : > { %v8252_v19 = vperm.slane %v1485_v43, %v7160_v17  ;;  %v8258_v32 = vperm.slane %v1639_v6, %v7153_v8  ;;  %v1652_v33 = vrot.slane %v8249_v12, 4  ;;  %v1663_v57 = vsel %vm319_vm0, %v1662_v59, %v8033_v49 }
 0x21c   : > { %1535 = vrot.lane.b32.xlu1 %v8130_v21, %s7034_s28  ;;  %1097 = vrot.lane.b32.xlu0 %v8133_v29, %s7036_s9  ;;  %v1709_v18 = vsel %vm319_vm0, %v7816_v10, %v1708_v35  ;;  %v8288_v16 = vperm.slane %v1663_v57, %v7160_v17  ;;  %v1718_v43 = vrot.slane %v7994_v48, 4  ;;  %v1090_v48 = vrot.slane %v7978_v46, 4 }
 0x21d   : > { %867 = vrot.lane.b32.xlu2 %v8138_v41, %s7036_s9  ;;  %v1653_v28 = vsel %vm319_vm0, %v8258_v32, %v1652_v33  ;;  %v8292_v62 = vperm.slane %v1709_v18, %v7160_v17  ;;  %v860_v59 = vrot.slane %v8038_v40, 4  ;;  %v1512_v40 = vrot.slane %v8047_v45, 4 }
 0x21e   : > { %v8150_v14 = vpop.permute.xlu1 %636  ;;  %v8152_v7 = vpop.permute.xlu0 %1317  ;;  %v8285_v23 = vperm.slane %v1653_v28, %v7160_v17  ;;  %v1719_v25 = vsel %vm319_vm0, %v1718_v43, %v7945_v31  ;;  %v1091_v33 = vsel %vm319_vm0, 0.0, %v1090_v48  ;;  %v804_v18 = vrot.slane %v7970_v13, 4 }
 0x21f   : > { %v8154_v42 = vpop.permute.xlu2 %1337  ;;  %v8311_v35 = vperm.slane %v1719_v25, %v7160_v17  ;;  %v861_v28 = vsel %vm319_vm0, 0.0, %v860_v59  ;;  %v1034_v43 = vrot.slane %v8098_v37, 4  ;;  %v1513_v48 = vsel %vm319_vm0, 0.0, %v1512_v40 }
 0x220   : > { %v805_v25 = vsel %vm319_vm0, 0.0, %v804_v18  ;;  %v1680_v13 = vrot.slane %v8107_v47, 4  ;;  %v1736_v37 = vrot.slane %v8041_v52, 4  ;;  %v1456_v40 = vrot.slane %v8130_v21, 4 }
 0x221   : > { %v1035_v59 = vsel %vm319_vm0, 0.0, %v1034_v43 }
 0x222   : > { %v1737_v43 = vsel %vm319_vm0, 0.0, %v1736_v37 }
 0x224   : > { %875 = vrot.lane.b32.xlu1 %v8169_v5, %s7035_s29  ;;  %1133 = vrot.lane.b32.xlu0 %v8172_v24, %s7035_s29 }
 0x225   : > { %903 = vrot.lane.b32.xlu2 %v8178_v36, %s7035_s29 }
 0x226   : > { %v8192_v4 = vpop.permute.xlu0 %1941  ;;  %v8194_v27 = vpop.permute.xlu1 %672 }
 0x227   : > { %v8196_v2 = vpop.permute.xlu2 %1961 }
 0x22c   : > { %1125 = vrot.lane.b32.xlu1 %v8211_v60, %s7036_s9  ;;  %1519 = vrot.lane.b32.xlu0 %v8214_v53, %s7036_s9 }
 0x22d   : > { %1105 = vrot.lane.b32.xlu2 %v8221_v15, %s7035_s29 }
 0x22e   : > { %v8234_v50 = vpop.permute.xlu0 %1977  ;;  %v8236_v58 = vpop.permute.xlu1 %1297 }
 0x22f   : > { %v8238_v55 = vpop.permute.xlu2 %640 }
 0x234   : > { %1547 = vrot.lane.b32.xlu1 %v8252_v19, %s7036_s9  ;;  %1555 = vrot.lane.b32.xlu0 %v8255_v39, %s7035_s29 }
 0x235   : > { %1527 = vrot.lane.b32.xlu2 %v8262_v0, %s7035_s29 }
 0x236   : > { %v8272_v44 = vpop.permute.xlu0 %656  ;;  %v8274_v20 = vpop.permute.xlu1 %1969 }
 0x237   : > { %v8276_v26 = vpop.permute.xlu2 %676 }
 0x23c   : > { %1743 = vrot.lane.b32.xlu1 %v8285_v23, %s7036_s9  ;;  %1751 = vrot.lane.b32.xlu0 %v8288_v16, %s7035_s29 }
 0x23d   : > { %1771 = vrot.lane.b32.xlu2 %v8292_v62, %s7036_s9 }
 0x23e   : > { %v8300_v10 = vpop.permute.xlu0 %1989  ;;  %v8302_v49 = vpop.permute.xlu1 %684 }
 0x23f   : > { %v8304_v6 = vpop.permute.xlu2 %1301 }
 0x244   : > { %1145 = vrot.lane.b32.xlu0 %v1091_v33, %s7032_s20  ;;  %1779 = vrot.lane.b32.xlu1 %v8311_v35, %s7035_s29 }
 0x245   : > { %915 = vrot.lane.b32.xlu2 %v861_v28, %s7032_s20 }
 0x246   : > { %v8319_v46 = vpop.permute.xlu1 %1309  ;;  %v8321_v57 = vpop.permute.xlu0 %668 }
 0x247   : > { %v8323_v31 = vpop.permute.xlu2 %1973 }
 0x24c   : > { %1567 = vrot.lane.b32.xlu0 %v1513_v48, %s7032_s20  ;;  %887 = vrot.lane.b32.xlu1 %v805_v25, %s7032_s20  ;;  %v1681_v48 = vsel %vm319_vm0, 0.0, %v1680_v13  ;;  %v1457_v25 = vsel %vm319_vm0, 0.0, %v1456_v40  ;;  %v856_v13 = vrot.slane %v8101_v3, 4  ;;  %v802_v40 = vrot.slane %v8169_v5, 4 }
 0x24d   : > { %1117 = vrot.lane.b32.xlu2 %v1035_v59, %s7032_s20 }
 0x24e   : > { %v8334_v33 = vpop.permute.xlu1 %648  ;;  %v8336_v28 = vpop.permute.xlu0 %1293  ;;  %v857_v3 = vsel %vm319_vm0, 0.0, %v856_v13 }
 0x24f   : > { %v1314_v45 = vpop.permute.xlu2 %1313 }
 0x250   : > { %v1347_v18 = vsel %vm687_vm4, %v7844_v1, %v1314_v45  ;;  %v800_v45 = vrot.slane %v8138_v41, 4 }
 0x251   : > { %v1348_v21 = vsel %vm689_vm5, %v1347_v18, %v8152_v7 }
 0x252   : > { %v801_v41 = vsel %vm319_vm0, 0.0, %v800_v45 }
 0x254   : > { %1763 = vrot.lane.b32.xlu0 %v1681_v48, %s7032_s20  ;;  %1791 = vrot.lane.b32.xlu1 %v1737_v43, %s7032_s20 }
 0x255   : > { %1539 = vrot.lane.b32.xlu2 %v1457_v25, %s7032_s20 }
 0x256   : > { %v1322_v52 = vpop.permute.xlu1 %1321  ;;  %v1330_v1 = vpop.permute.xlu0 %1329 }
 0x257   : > { %v1349_v47 = vsel %vm691_vm6, %v1348_v21, %v1322_v52  ;;  %v1938_v59 = vpop.permute.xlu2 %1937  ;;  %v858_v21 = vrot.slane %v8178_v36, 4 }
 0x258   : > { %v1350_v37 = vsel %vm693_vm7, %v1349_v47, %v8078_v9  ;;  %v1992_v43 = vsel %vm687_vm4, %v7863_v63, %v1938_v59  ;;  %v803_v9 = vsel %vm319_vm0, 0.0, %v802_v40  ;;  %v1086_v59 = vrot.slane %v8211_v60, 4 }
 0x259   : > { %v1351_v48 = vsel %vm695_vm8, %v1350_v37, %v1330_v1  ;;  %v1030_v1 = vrot.slane %v8133_v29, 4  ;;  %v859_v37 = vsel %vm319_vm0, 0.0, %v858_v21  ;;  %v1452_v21 = vrot.slane %v8214_v53, 4 }
 0x25a   : > { %v1352_v7 = vsel %vm697_vm9, %v1351_v48, %v8071_v51  ;;  %v1088_v48 = vrot.slane %v8172_v24, 4 }
 0x25b   : > { %v1353_v18 = vsel %vm699_vm10, %v1352_v7, %v8154_v42  ;;  %v1993_v42 = vsel %vm689_vm5, %v1992_v43, %v8192_v4  ;;  %v1031_v40 = vsel %vm319_vm0, 0.0, %v1030_v1  ;;  %v12388_v1 = vld [vmem:[#allocation28_spill] sm:$0xff] }
 0x25c   : > { %v1357_v25 = vrot.slane %v1353_v18, 4  ;;  %871 = vrot.lane.b32.xlu0 %v801_v41, %s7033_s26  ;;  %899 = vrot.lane.b32.xlu1 %v857_v3, %s7033_s26  ;;  %v1508_v18 = vrot.slane %v8252_v19, 4 }
 0x25d   : > { %879 = vrot.lane.b32.xlu2 %v803_v9, %s7031_s19 }
 0x25e   : > { %1361 = vst [vmem:[#allocation3 + $0x10] sm:$0xf0] %v1357_v25  ;;  %v1946_v51 = vpop.permute.xlu1 %1945  ;;  %v1954_v5 = vpop.permute.xlu0 %1953  ;;  %v12385_v25 = vld [vmem:[#allocation23_spill] sm:$0xff] }
 0x25f   : > { %v1994_v63 = vsel %vm691_vm6, %v1993_v42, %v1946_v51  ;;  %v8373_v52 = vpop.permute.xlu2 %1141  ;;  %v12387_v51 = vld [vmem:[#allocation25_spill] sm:$0xff] }
 0x260   : > { %v1995_v47 = vsel %vm693_vm7, %v1994_v63, %v8121_v34  ;;  %v1087_v34 = vsel %vm319_vm0, 0.0, %v1086_v59  ;;  %v1454_v63 = vrot.slane %v8262_v0, 4  ;;  %v1676_v59 = vrot.slane %v8285_v23, 4 }
 0x261   : > { %v1996_v45 = vsel %vm695_vm8, %v1995_v47, %v1954_v5  ;;  %v1453_v23 = vsel %vm319_vm0, 0.0, %v1452_v21  ;;  %v12396_v21 = vld [vmem:[#allocation18_spill] sm:$0xff] }
 0x262   : > { %v1997_v13 = vsel %vm697_vm9, %v1996_v45, %v8117_v38 }
 0x263   : > { %v1998_v4 = vsel %vm699_vm10, %v1997_v13, %v8196_v2  ;;  %v1032_v2 = vrot.slane %v8221_v15, 4  ;;  %v1089_v15 = vsel %vm319_vm0, 0.0, %v1088_v48 }
 0x264   : > { %2006 = vst [vmem:[#allocation3 + $0x8] sm:$0xf] %v1998_v4  ;;  %907 = vrot.lane.b32.xlu0 %v859_v37, %s7031_s19  ;;  %1101 = vrot.lane.b32.xlu1 %v1031_v40, %s7033_s26  ;;  %v1455_v37 = vsel %vm319_vm0, 0.0, %v1454_v63  ;;  %v12389_v40 = vld [vmem:[#allocation27_spill] sm:$0xff] }
 0x265   : > { %1129 = vrot.lane.b32.xlu2 %v1087_v34, %s7033_s26  ;;  %v1033_v3 = vsel %vm319_vm0, 0.0, %v1032_v2  ;;  %v12390_v34 = vld [vmem:[#allocation30_spill] sm:$0xff] }
 0x266   : > { %v1982_v29 = vpop.permute.xlu1 %1981  ;;  %v633_v36 = vpop.permute.xlu0 %632 }
 0x267   : > { %v688_v38 = vsel %vm687_vm4, %v7834_v61, %v633_v36  ;;  %v8393_v60 = vpop.permute.xlu2 %1563 }
 0x268   : > { %v690_v7 = vsel %vm689_vm5, %v688_v38, %v8150_v14  ;;  %v1509_v14 = vsel %vm319_vm0, 0.0, %v1508_v18  ;;  %v12391_v38 = vld [vmem:[#allocation26_spill] sm:$0xff]  ;;  %v1732_v18 = vrot.slane %v8292_v62, 4 }
 0x269   : > { %v692_v43 = vsel %vm691_vm6, %v690_v7, %v8238_v55  ;;  %v1510_v7 = vrot.slane %v8255_v39, 4 }
 0x26a   : > { %v694_v41 = vsel %vm693_vm7, %v692_v43, %v8119_v54  ;;  %v1733_v62 = vsel %vm319_vm0, 0.0, %v1732_v18  ;;  %v12401_v18 = vld [vmem:[#allocation22_spill] sm:$0xff] }
 0x26b   : > { %v696_v61 = vsel %vm695_vm8, %v694_v41, %v8334_v33  ;;  %v12386_v33 = vld [vmem:[#allocation24_spill] sm:$0xff]  ;;  %v1511_v39 = vsel %vm319_vm0, 0.0, %v1510_v7 }
 0x26c   : > { %v698_v24 = vsel %vm697_vm9, %v696_v61, %v12385_v25  ;;  %1109 = vrot.lane.b32.xlu0 %v1033_v3, %s7031_s19  ;;  %1137 = vrot.lane.b32.xlu1 %v1089_v15, %s7031_s19 }
 0x26d   : > { %v700_v55 = vsel %vm699_vm10, %v698_v24, %v8272_v44  ;;  %1551 = vrot.lane.b32.xlu2 %v1509_v14, %s7033_s26  ;;  %v12393_v24 = vld [vmem:[#allocation33_spill] sm:$0xff] }
 0x26e   : > { %708 = vst [vmem:[#allocation3 + $0x30] sm:$0xf] %v700_v55  ;;  %v1966_v54 = vpop.permute.xlu0 %1965  ;;  %v661_v19 = vpop.permute.xlu1 %660 }
 0x26f   : > { %v1999_v9 = vsel %vm687_vm4, %v12386_v33, %v1966_v54  ;;  %v701_v42 = vsel %vm687_vm4, %v12387_v51, %v661_v19  ;;  %v8420_v5 = vpop.permute.xlu2 %1759  ;;  %v1678_v33 = vrot.slane %v8288_v16, 4 }
 0x270   : > { %v2000_v44 = vsel %vm689_vm5, %v1999_v9, %v8274_v20  ;;  %v702_v47 = vsel %vm689_vm5, %v701_v42, %v12388_v1 }
 0x271   : > { %v2001_v45 = vsel %vm691_vm6, %v2000_v44, %v8323_v31  ;;  %v703_v13 = vsel %vm691_vm6, %v702_v47, %v8321_v57  ;;  %v1060_v31 = vrot.slane %v8175_v30, 4  ;;  %v2048_v44 = vrot.slane %v12396_v21, 4 }
 0x272   : > { %v2002_v4 = vsel %vm693_vm7, %v2001_v45, %v8234_v50  ;;  %v704_v53 = vsel %vm693_vm7, %v703_v13, %v8194_v27  ;;  %v1677_v27 = vsel %vm319_vm0, 0.0, %v1676_v59  ;;  %v1679_v1 = vsel %vm319_vm0, 0.0, %v1678_v33  ;;  %v12397_v59 = vld [vmem:[#allocation19_spill] sm:$0xff] }
 0x273   : > { %v2003_v0 = vsel %vm695_vm8, %v2002_v4, %v1982_v29  ;;  %v705_v20 = vsel %vm695_vm8, %v704_v53, %v8276_v26  ;;  %v1061_v41 = vsel %vm319_vm0, %v1060_v31, %v8165_v11  ;;  %v8509_v45 = vperm.slane %v12397_v59, %v7160_v17  ;;  %v12398_v4 = vld [vmem:[#allocation34_spill] sm:$0xff]  ;;  %v12404_v59 = vld [vmem:[#allocation17_spill] sm:$0xff] }
 0x274   : > { %v2004_v57 = vsel %vm697_vm9, %v2003_v0, %v12389_v40  ;;  %v706_v50 = vsel %vm697_vm9, %v705_v20, %v12390_v34  ;;  %1531 = vrot.lane.b32.xlu0 %v1455_v37, %s7031_s19  ;;  %1523 = vrot.lane.b32.xlu1 %v1453_v23, %s7033_s26  ;;  %v8477_v25 = vperm.slane %v1061_v41, %v7160_v17  ;;  %v1650_v13 = vrot.slane %v8258_v32, 4  ;;  %v12399_v0 = vld [vmem:[#allocation16_spill] sm:$0xff]  ;;  %v12400_v32 = vld [vmem:[#allocation15_spill] sm:$0xff] }
 0x275   : > { %v2005_v26 = vsel %vm699_vm10, %v2004_v57, %v8300_v10  ;;  %v707_v29 = vsel %vm699_vm10, %v706_v50, %v8302_v49  ;;  %1747 = vrot.lane.b32.xlu2 %v1677_v27, %s7033_s26  ;;  %v12392_v10 = vld [vmem:[#allocation31_spill] sm:$0xff]  ;;  %v1734_v49 = vrot.slane %v8311_v35, 4  ;;  %v1482_v35 = vrot.slane %v8217_v56, 4 }
 0x276   : > { %2007 = vst [vmem:[#allocation3 + $0x20] sm:$0xf] %v2005_v26  ;;  %v1286_v30 = vpop.permute.xlu1 %1285  ;;  %v8455_v36 = vpop.permute.xlu0 %883  ;;  %v1084_v9 = vrot.slane %v8477_v25, 4  ;;  %v8520_v53 = vperm.slane %v12398_v4, %v7160_v17  ;;  %v2049_v31 = vsel %vm319_vm0, %v2048_v44, %v12400_v32  ;;  %v798_v57 = vrot.slane %v8509_v45, 4 }
 0x277   : > { %709 = vst [vmem:[#allocation3] sm:$0xf] %v707_v29  ;;  %v1340_v2 = vsel %vm687_vm4, %v12391_v38, %v1286_v30  ;;  %v8459_v48 = vpop.permute.xlu2 %867  ;;  %v1483_v42 = vsel %vm319_vm0, %v1482_v35, %v8207_v22  ;;  %v1651_v26 = vsel %vm319_vm0, %v1650_v13, %v8249_v12  ;;  %v2062_v29 = vrot.slane %v12399_v0, 4 }
 0x278   : > { %v1341_v43 = vsel %vm689_vm5, %v1340_v2, %v12392_v10  ;;  %v1085_v47 = vsel %vm319_vm0, 0.0, %v1084_v9  ;;  %v8512_v16 = vperm.slane %v1483_v42, %v7160_v17  ;;  %v1028_v27 = vrot.slane %v8520_v53, 4 }
 0x279   : > { %v1342_v61 = vsel %vm691_vm6, %v1341_v43, %v8336_v28  ;;  %v1735_v28 = vsel %vm319_vm0, 0.0, %v1734_v49  ;;  %v2055_v30 = vperm.slane %v2049_v31, %v7153_v8  ;;  %v799_v38 = vsel %vm319_vm0, 0.0, %v798_v57  ;;  %v12402_v49 = vld [vmem:[#allocation35_spill] sm:$0xff] }
 0x27a   : > { %v1343_v3 = vsel %vm693_vm7, %v1342_v61, %v8236_v58  ;;  %v12394_v58 = vld [vmem:[#allocation32_spill] sm:$0xff]  ;;  %v1506_v34 = vrot.slane %v8512_v16, 4  ;;  %v8544_v7 = vperm.slane %v1651_v26, %v7160_v17  ;;  %v8548_v10 = vperm.slane %v12401_v18, %v7160_v17 }
 0x27b   : > { %v1344_v15 = vsel %vm695_vm8, %v1343_v3, %v8304_v6  ;;  %v8487_v6 = vperm.slane %v12394_v58, %v7160_v17  ;;  %v1029_v12 = vsel %vm319_vm0, 0.0, %v1028_v27  ;;  %v8555_v41 = vperm.slane %v12402_v49, %v7160_v17  ;;  %v12406_v27 = vld [vmem:[#allocation14_spill] sm:$0xff] }
 0x27c   : > { %v1345_v11 = vsel %vm697_vm9, %v1344_v15, %v12393_v24  ;;  %1559 = vrot.lane.b32.xlu1 %v1511_v39, %s7031_s19  ;;  %1775 = vrot.lane.b32.xlu0 %v1733_v62, %s7033_s26  ;;  %v1507_v2 = vsel %vm319_vm0, 0.0, %v1506_v34  ;;  %v2074_v39 = vrot.slane %v2055_v30, 4  ;;  %v1674_v35 = vrot.slane %v8544_v7, 4 }
 0x27d   : > { %v1346_v14 = vsel %vm699_vm10, %v1345_v11, %v8319_v46  ;;  %1783 = vrot.lane.b32.xlu2 %v1735_v28, %s7031_s19  ;;  %v854_v51 = vrot.slane %v8487_v6, 4  ;;  %v12395_v46 = vld [vmem:[#allocation29_spill] sm:$0xff]  ;;  %v1730_v24 = vrot.slane %v8548_v10, 4  ;;  %v1450_v28 = vrot.slane %v8555_v41, 4 }
 0x27e   : > { %v1356_v55 = vrot.slane %v1346_v14, 4  ;;  %v8492_v56 = vpop.permute.xlu1 %911  ;;  %v8494_v54 = vpop.permute.xlu0 %1787  ;;  %v2060_v63 = vrot.slane %v12395_v46, 4  ;;  %v2063_v61 = vsel %vm319_vm0, %v12395_v46, %v2062_v29  ;;  %v2050_v14 = vrot.slane %v12400_v32, 4 }
 0x27f   : > { %v8496_v19 = vpop.permute.xlu2 %903  ;;  %v855_v22 = vsel %vm319_vm0, 0.0, %v854_v51  ;;  %v2071_v11 = vperm.slane %v2063_v61, %v7153_v8  ;;  %v1675_v42 = vsel %vm319_vm0, 0.0, %v1674_v35  ;;  %v1731_v46 = vsel %vm319_vm0, 0.0, %v1730_v24 }
 0x280   : > { %1360 = vst [vmem:[#allocation3 + $0x18] sm:$0xf0] %v1356_v55  ;;  %v2061_v20 = vsel %vm319_vm0, %v2060_v63, %v12399_v0  ;;  %v12403_v55 = vld [vmem:[#allocation21_spill] sm:$0xff]  ;;  %v2051_v51 = vsel %vm319_vm0, %v12396_v21, %v2050_v14  ;;  %v12405_v0 = vld [vmem:[#allocation20_spill] sm:$0xff] }
 0x281   : > { %v2067_v50 = vperm.slane %v2061_v20, %v7153_v8  ;;  %v2116_v33 = vrot.slane %v12403_v55, 4  ;;  %v2084_v44 = vrot.slane %v2071_v11, 4  ;;  %v2059_v21 = vperm.slane %v2051_v51, %v7153_v8 }
 0x282   : > { %v2104_v20 = vrot.slane %v12405_v0, 4 }
 0x283   : > { %v2072_v43 = vrot.slane %v2067_v50, 4  ;;  %v2075_v9 = vsel %vm319_vm0, %v2067_v50, %v2074_v39  ;;  %v2117_v13 = vsel %vm319_vm0, %v2116_v33, %v12404_v59  ;;  %v2085_v50 = vsel %vm319_vm0, %v2084_v44, %v2059_v21 }
 0x284   : > { %1755 = vrot.lane.b32.xlu1 %v1679_v1, %s7031_s19  ;;  %1121 = vrot.lane.b32.xlu0 %v1085_v47, %s7037_s10  ;;  %v1451_v1 = vsel %vm319_vm0, 0.0, %v1450_v28  ;;  %v2083_v47 = vperm.slane %v2075_v9, %v7160_v17  ;;  %v2123_v57 = vperm.slane %v2117_v13, %v7153_v8  ;;  %v2105_v26 = vsel %vm319_vm0, %v2104_v20, %v12406_v27 }
 0x285   : > { %891 = vrot.lane.b32.xlu2 %v855_v22, %s7037_s10  ;;  %v2073_v58 = vsel %vm319_vm0, %v2072_v43, %v2055_v30  ;;  %v2091_v30 = vperm.slane %v2085_v50, %v7160_v17  ;;  %v2086_v43 = vrot.slane %v2059_v21, 4  ;;  %v2106_v33 = vrot.slane %v12406_v27, 4 }
 0x286   : > { %v8525_v37 = vpop.permute.xlu1 %1113  ;;  %v8527_v23 = vpop.permute.xlu0 %895  ;;  %v8579_v63 = vperm.slane %v2073_v58, %v7160_v17  ;;  %v2098_v34 = vrot.slane %v2083_v47, 4 }
 0x287   : > { %v8531_v40 = vpop.permute.xlu2 %1105  ;;  %v2100_v24 = vrot.slane %v2091_v30, 4  ;;  %v2087_v28 = vsel %vm319_vm0, %v2071_v11, %v2086_v43 }
 0x288   : > { %v2096_v31 = vrot.slane %v8579_v63, 4  ;;  %v2099_v18 = vsel %vm319_vm0, 0.0, %v2098_v34  ;;  %v2095_v9 = vperm.slane %v2087_v28, %v7160_v17 }
 0x289   : > { %v2101_v51 = vsel %vm319_vm0, 0.0, %v2100_v24 }
 0x28a   : > { %v2097_v29 = vsel %vm319_vm0, 0.0, %v2096_v31  ;;  %v2102_v13 = vrot.slane %v2095_v9, 4 }
 0x28c   : > { %863 = vrot.lane.b32.xlu1 %v799_v38, %s7037_s10  ;;  %1543 = vrot.lane.b32.xlu0 %v1507_v2, %s7037_s10  ;;  %v2118_v38 = vrot.slane %v12404_v59, 4  ;;  %v2128_v2 = vrot.slane %v2123_v57, 4  ;;  %v2103_v31 = vsel %vm319_vm0, 0.0, %v2102_v13  ;;  %v2241_v13 = vld [vmem:[#allocation2 + $0x22] sm:$0xff] }
 0x28d   : > { %1093 = vrot.lane.b32.xlu2 %v1029_v12, %s7037_s10  ;;  %v2111_v12 = vperm.slane %v2105_v26, %v7153_v8 }
 0x28e   : > { %v8560_v3 = vpop.permute.xlu1 %1535  ;;  %v8562_v15 = vpop.permute.xlu0 %1097  ;;  %v2119_v49 = vsel %vm319_vm0, %v12403_v55, %v2118_v38 }
 0x28f   : > { %v8564_v62 = vpop.permute.xlu2 %1527  ;;  %v2129_v58 = vsel %vm319_vm0, %v2128_v2, %v2111_v12  ;;  %v2127_v14 = vperm.slane %v2119_v49, %v7153_v8 }
 0x290   : > { %v8624_v55 = vperm.slane %v2129_v58, %v7160_v17 }
 0x291   : > { %v2140_v11 = vrot.slane %v2127_v14, 4 }
 0x292   : > { %v2152_v21 = vrot.slane %v8624_v55, 4 }
 0x294   : > { %1739 = vrot.lane.b32.xlu0 %v1675_v42, %s7037_s10  ;;  %1767 = vrot.lane.b32.xlu1 %v1731_v46, %s7037_s10  ;;  %v2107_v42 = vsel %vm319_vm0, %v12405_v0, %v2106_v33  ;;  %v2130_v46 = vrot.slane %v2111_v12, 4  ;;  %v2153_v50 = vsel %vm319_vm0, 0.0, %v2152_v21 }
 0x295   : > { %1515 = vrot.lane.b32.xlu2 %v1451_v1, %s7037_s10 }
 0x296   : > { %v8589_v22 = vpop.permute.xlu1 %875  ;;  %v8591_v4 = vpop.permute.xlu0 %1133  ;;  %v2131_v0 = vsel %vm319_vm0, %v2123_v57, %v2130_v46 }
 0x297   : > { %v8594_v32 = vpop.permute.xlu2 %1771  ;;  %v2139_v34 = vperm.slane %v2131_v0, %v7160_v17 }
 0x299   : > { %v2154_v38 = vrot.slane %v2139_v34, 4 }
 0x29b   : > { %v2155_v43 = vsel %vm319_vm0, 0.0, %v2154_v38 }
 0x29c   : > { %2161 = vrot.lane.b32.xlu0 %v2097_v29, %s7037_s10  ;;  %2165 = vrot.lane.b32.xlu1 %v2083_v47, %s7036_s9  ;;  %v2115_v47 = vperm.slane %v2107_v42, %v7153_v8 }
 0x29d   : > { %2169 = vrot.lane.b32.xlu2 %v2099_v18, %s7033_s26 }
 0x29e   : > { %v8611_v61 = vpop.permute.xlu1 %1125  ;;  %v8613_v39 = vpop.permute.xlu0 %1519  ;;  %v2141_v20 = vsel %vm319_vm0, %v2140_v11, %v2115_v47  ;;  %v2142_v27 = vrot.slane %v2115_v47, 4  ;;  %v2239_v11 = vld [vmem:[#allocation2 + $0xa] sm:$0xff]  ;;  %v2240_v47 = vld [vmem:[#allocation2 + $0x1a] sm:$0xff] }
 0x29f   : > { %v8615_v35 = vpop.permute.xlu2 %915  ;;  %v2147_v26 = vperm.slane %v2141_v20, %v7160_v17 }
 0x2a0   : > { %v2143_v18 = vsel %vm319_vm0, %v2127_v14, %v2142_v27 }
 0x2a1   : > { %v2156_v2 = vrot.slane %v2147_v26, 4  ;;  %v2151_v12 = vperm.slane %v2143_v18, %v7160_v17 }
 0x2a3   : > { %v2157_v49 = vsel %vm319_vm0, 0.0, %v2156_v2  ;;  %v2158_v33 = vrot.slane %v2151_v12, 4  ;;  %v2245_v2 = vld [vmem:[#allocation2 + $0x52] sm:$0xff] }
 0x2a4   : > { %2173 = vrot.lane.b32.xlu0 %v2091_v30, %s7035_s29  ;;  %2177 = vrot.lane.b32.xlu1 %v2101_v51, %s7031_s19 }
 0x2a5   : > { %2181 = vrot.lane.b32.xlu2 %v2095_v9, %s7034_s28  ;;  %v2159_v14 = vsel %vm319_vm0, 0.0, %v2158_v33  ;;  %v2238_v9 = vld [vmem:[#allocation2 + $0x2] sm:$0xff] }
 0x2a6   : > { %v8631_v44 = vpop.permute.xlu1 %1547  ;;  %v8633_v1 = vpop.permute.xlu0 %1555 }
 0x2a7   : > { %v8636_v59 = vpop.permute.xlu2 %1117 }
 0x2ac   : > { %2185 = vrot.lane.b32.xlu0 %v2103_v31, %s7032_s20  ;;  %2189 = vrot.lane.b32.xlu1 %v2153_v50, %s7037_s10  ;;  %v2242_v31 = vld [vmem:[#allocation2 + $0x32] sm:$0xff]  ;;  %v2244_v50 = vld [vmem:[#allocation2 + $0x4a] sm:$0xff] }
 0x2ad   : > { %2193 = vrot.lane.b32.xlu2 %v2139_v34, %s7036_s9  ;;  %v2243_v34 = vld [vmem:[#allocation2 + $0x3a] sm:$0xff] }
 0x2ae   : > { %v8648_v29 = vpop.permute.xlu1 %1743  ;;  %v8650_v57 = vpop.permute.xlu0 %1751 }
 0x2af   : > { %v8652_v30 = vpop.permute.xlu2 %1539 }
 0x2b4   : > { %2197 = vrot.lane.b32.xlu0 %v2155_v43, %s7033_s26  ;;  %2201 = vrot.lane.b32.xlu1 %v2147_v26, %s7035_s29 }
 0x2b5   : > { %2205 = vrot.lane.b32.xlu2 %v2157_v49, %s7031_s19 }
 0x2b6   : > { %v8661_v24 = vpop.permute.xlu0 %1145  ;;  %v8663_v28 = vpop.permute.xlu1 %1779 }
 0x2b7   : > { %v8665_v58 = vpop.permute.xlu2 %879 }
 0x2bc   : > { %2209 = vrot.lane.b32.xlu0 %v2151_v12, %s7034_s28  ;;  %2213 = vrot.lane.b32.xlu1 %v2159_v14, %s7032_s20 }
 0x2bd   : > { %2254 = vrot.lane.b32.xlu2 %v2238_v9, %s7043_s13 }
 0x2be   : > { %v8671_v51 = vpop.permute.xlu0 %1567  ;;  %v8673_v42 = vpop.permute.xlu1 %887 }
 0x2bf   : > { %v8675_v46 = vpop.permute.xlu2 %1129 }
 0x2c4   : > { %2256 = vrot.lane.b32.xlu0 %v2239_v11, %s7043_s13  ;;  %2258 = vrot.lane.b32.xlu1 %v2240_v47, %s7043_s13 }
 0x2c5   : > { %2260 = vrot.lane.b32.xlu2 %v2241_v13, %s7043_s13 }
 0x2c6   : > { %v8680_v21 = vpop.permute.xlu0 %1763  ;;  %v8682_v0 = vpop.permute.xlu1 %1791 }
 0x2c7   : > { %v8684_v20 = vpop.permute.xlu2 %1551 }
 0x2cc   : > { %2262 = vrot.lane.b32.xlu0 %v2242_v31, %s7043_s13  ;;  %2264 = vrot.lane.b32.xlu1 %v2243_v34, %s7043_s13 }
 0x2cd   : > { %2266 = vrot.lane.b32.xlu2 %v2244_v50, %s7043_s13 }
 0x2ce   : > { %v872_v27 = vpop.permute.xlu0 %871  ;;  %v900_v26 = vpop.permute.xlu1 %899 }
 0x2cf   : > { %v8689_v38 = vpop.permute.xlu2 %1747 }
 0x2d4   : > { %2268 = vrot.lane.b32.xlu0 %v2245_v2, %s7043_s13 }
 0x2d6   : > { %v908_v18 = vpop.permute.xlu0 %907  ;;  %v1102_v43 = vpop.permute.xlu1 %1101 }
 0x2d7   : > { %v8692_v12 = vpop.permute.xlu2 %1783 }
 0x2de   : > { %v1110_v49 = vpop.permute.xlu0 %1109  ;;  %v1138_v33 = vpop.permute.xlu1 %1137 }
 0x2df   : > { %v892_v14 = vpop.permute.xlu2 %891 }
 0x2e0   : > { %v925_v9 = vsel %vm687_vm4, %v8487_v6, %v892_v14 }
 0x2e1   : > { %v926_v11 = vsel %vm689_vm5, %v925_v9, %v8527_v23 }
 0x2e2   : > { %v927_v47 = vsel %vm691_vm6, %v926_v11, %v900_v26 }
 0x2e3   : > { %v928_v13 = vsel %vm693_vm7, %v927_v47, %v8496_v19 }
 0x2e4   : > { %v929_v31 = vsel %vm695_vm8, %v928_v13, %v908_v18 }
 0x2e5   : > { %v930_v34 = vsel %vm697_vm9, %v929_v31, %v8492_v56 }
 0x2e6   : > { %v931_v50 = vsel %vm699_vm10, %v930_v34, %v8615_v35  ;;  %v1532_v2 = vpop.permute.xlu0 %1531  ;;  %v1524_v17 = vpop.permute.xlu1 %1523 }
 0x2e7   : > { %v935_v8 = vrot.slane %v931_v50, 4  ;;  %v1094_v6 = vpop.permute.xlu2 %1093 }
 0x2e8   : > { %v1148_v23 = vsel %vm687_vm4, %v8520_v53, %v1094_v6 }
 0x2e9   : > { %939 = vst [vmem:[#allocation3] sm:$0xf0] %v935_v8  ;;  %v1149_v26 = vsel %vm689_vm5, %v1148_v23, %v8562_v15 }
 0x2ea   : > { %v1150_v19 = vsel %vm691_vm6, %v1149_v26, %v1102_v43 }
 0x2eb   : > { %v1151_v18 = vsel %vm693_vm7, %v1150_v19, %v8531_v40 }
 0x2ec   : > { %v1152_v56 = vsel %vm695_vm8, %v1151_v18, %v1110_v49 }
 0x2ed   : > { %v1153_v35 = vsel %vm697_vm9, %v1152_v56, %v8525_v37 }
 0x2ee   : > { %v1154_v14 = vsel %vm699_vm10, %v1153_v35, %v8636_v59  ;;  %v1560_v9 = vpop.permute.xlu1 %1559  ;;  %v1776_v11 = vpop.permute.xlu0 %1775 }
 0x2ef   : > { %1162 = vst [vmem:[#allocation3 + $0x18] sm:$0xf] %v1154_v14  ;;  %v1516_v8 = vpop.permute.xlu2 %1515 }
 0x2f0   : > { %v1570_v53 = vsel %vm687_vm4, %v8555_v41, %v1516_v8 }
 0x2f1   : > { %v1571_v15 = vsel %vm689_vm5, %v1570_v53, %v8613_v39 }
 0x2f2   : > { %v1572_v40 = vsel %vm691_vm6, %v1571_v15, %v1524_v17 }
 0x2f3   : > { %v1573_v43 = vsel %vm693_vm7, %v1572_v40, %v8564_v62 }
 0x2f4   : > { %v1574_v37 = vsel %vm695_vm8, %v1573_v43, %v1532_v2 }
 0x2f5   : > { %v1575_v59 = vsel %vm697_vm9, %v1574_v37, %v8560_v3 }
 0x2f6   : > { %v1576_v49 = vsel %vm699_vm10, %v1575_v59, %v8652_v30  ;;  %v1756_v47 = vpop.permute.xlu1 %1755  ;;  %v1122_v13 = vpop.permute.xlu0 %1121 }
 0x2f7   : > { %1584 = vst [vmem:[#allocation3 + $0x48] sm:$0xf] %v1576_v49  ;;  %v1155_v41 = vsel %vm687_vm4, %v8477_v25, %v1122_v13  ;;  %v2170_v39 = vpop.permute.xlu2 %2169 }
 0x2f8   : > { %v1156_v17 = vsel %vm689_vm5, %v1155_v41, %v8611_v61 }
 0x2f9   : > { %v1157_v62 = vsel %vm691_vm6, %v1156_v17, %v8675_v46 }
 0x2fa   : > { %v1158_v31 = vsel %vm693_vm7, %v1157_v62, %v8591_v4 }
 0x2fb   : > { %v1159_v3 = vsel %vm695_vm8, %v1158_v31, %v1138_v33 }
 0x2fc   : > { %v1160_v30 = vsel %vm697_vm9, %v1159_v3, %v8373_v52 }
 0x2fd   : > { %v1161_v34 = vsel %vm699_vm10, %v1160_v30, %v8661_v24 }
 0x2fe   : > { %1163 = vst [vmem:[#allocation3 + $0x10] sm:$0xf] %v1161_v34  ;;  %v864_v25 = vpop.permute.xlu1 %863  ;;  %v1544_v50 = vpop.permute.xlu0 %1543 }
 0x2ff   : > { %v918_v61 = vsel %vm687_vm4, %v8509_v45, %v864_v25  ;;  %v1577_v46 = vsel %vm687_vm4, %v8512_v16, %v1544_v50 }
 0x300   : > { %v919_v4 = vsel %vm689_vm5, %v918_v61, %v8459_v48  ;;  %v1578_v33 = vsel %vm689_vm5, %v1577_v46, %v8631_v44  ;;  %v2182_v48 = vpop.permute.xlu2 %2181 }
 0x301   : > { %v920_v52 = vsel %vm691_vm6, %v919_v4, %v872_v27  ;;  %v1579_v24 = vsel %vm691_vm6, %v1578_v33, %v8684_v20 }
 0x302   : > { %v921_v2 = vsel %vm693_vm7, %v920_v52, %v8589_v22  ;;  %v1580_v45 = vsel %vm693_vm7, %v1579_v24, %v8633_v1 }
 0x303   : > { %v922_v16 = vsel %vm695_vm8, %v921_v2, %v8665_v58  ;;  %v1581_v6 = vsel %vm695_vm8, %v1580_v45, %v1560_v9 }
 0x304   : > { %v923_v44 = vsel %vm697_vm9, %v922_v16, %v8455_v36  ;;  %v1582_v27 = vsel %vm697_vm9, %v1581_v6, %v8393_v60  ;;  %v12407_v16 = vld [vmem:[#allocation12_spill] sm:$0xff] }
 0x305   : > { %v924_v20 = vsel %vm699_vm10, %v923_v44, %v8673_v42  ;;  %v1583_v22 = vsel %vm699_vm10, %v1582_v27, %v8671_v51 }
 0x306   : > { %v934_v23 = vrot.slane %v924_v20, 4  ;;  %1585 = vst [vmem:[#allocation3 + $0x28] sm:$0xf] %v1583_v22  ;;  %v1740_v1 = vpop.permute.xlu0 %1739  ;;  %v1768_v26 = vpop.permute.xlu1 %1767 }
 0x307   : > { %v1794_v58 = vsel %vm687_vm4, %v8544_v7, %v1740_v1  ;;  %v1801_v19 = vsel %vm687_vm4, %v8548_v10, %v1768_v26 }
 0x308   : > { %938 = vst [vmem:[#allocation3 + $0x30] sm:$0xf0] %v934_v23  ;;  %v1795_v60 = vsel %vm689_vm5, %v1794_v58, %v8648_v29  ;;  %v1802_v36 = vsel %vm689_vm5, %v1801_v19, %v8594_v32  ;;  %v2194_v35 = vpop.permute.xlu2 %2193 }
 0x309   : > { %v1796_v51 = vsel %vm691_vm6, %v1795_v60, %v8689_v38  ;;  %v1803_v42 = vsel %vm691_vm6, %v1802_v36, %v1776_v11 }
 0x30a   : > { %v1797_v18 = vsel %vm693_vm7, %v1796_v51, %v8650_v57  ;;  %v1804_v7 = vsel %vm693_vm7, %v1803_v42, %v8663_v28  ;;  %v12408_v42 = vld [vmem:[#allocation13_spill] sm:$0xff] }
 0x30b   : > { %v1798_v10 = vsel %vm695_vm8, %v1797_v18, %v1756_v47  ;;  %v1805_v56 = vsel %vm695_vm8, %v1804_v7, %v8692_v12 }
 0x30c   : > { %v1799_v29 = vsel %vm697_vm9, %v1798_v10, %v8420_v5  ;;  %v1806_v32 = vsel %vm697_vm9, %v1805_v56, %v8494_v54 }
 0x30d   : > { %v1800_v38 = vsel %vm699_vm10, %v1799_v29, %v8680_v21  ;;  %v1807_v57 = vsel %vm699_vm10, %v1806_v32, %v8682_v0 }
 0x30e   : > { %v1810_v14 = vrot.slane %v1800_v38, 4  ;;  %v1811_v28 = vrot.slane %v1807_v57, 4  ;;  %v2162_v9 = vpop.permute.xlu0 %2161  ;;  %v2166_v11 = vpop.permute.xlu1 %2165 }
 0x30f   : > { %v2216_v12 = vsel %vm687_vm4, %v8579_v63, %v2162_v9 }
 0x310   : > { %1814 = vst [vmem:[#allocation3 + $0x48] sm:$0xf0] %v1810_v14  ;;  %v2217_v5 = vsel %vm689_vm5, %v2216_v12, %v2166_v11  ;;  %v2206_v53 = vpop.permute.xlu2 %2205 }
 0x311   : > { %1815 = vst [vmem:[#allocation3 + $0x28] sm:$0xf0] %v1811_v28  ;;  %v2218_v21 = vsel %vm691_vm6, %v2217_v5, %v2170_v39 }
 0x316   : > { %v2174_v8 = vpop.permute.xlu0 %2173  ;;  %v2178_v54 = vpop.permute.xlu1 %2177 }
 0x317   : > { %v2219_v15 = vsel %vm693_vm7, %v2218_v21, %v2174_v8 }
 0x318   : > { %v2220_v0 = vsel %vm695_vm8, %v2219_v15, %v2178_v54  ;;  %v2255_v47 = vpop.permute.xlu2 %2254 }
 0x319   : > { %v2221_v43 = vsel %vm697_vm9, %v2220_v0, %v2182_v48  ;;  %v2280_v45 = vrot.slane %v2255_v47, 4 }
 0x31e   : > { %v2186_v40 = vpop.permute.xlu0 %2185  ;;  %v2190_v37 = vpop.permute.xlu1 %2189 }
 0x31f   : > { %v2222_v59 = vsel %vm699_vm10, %v2221_v43, %v2186_v40  ;;  %v2223_v63 = vsel %vm687_vm4, %v8624_v55, %v2190_v37 }
 0x320   : > { %v2232_v49 = vrot.slane %v2222_v59, 4  ;;  %v2224_v17 = vsel %vm689_vm5, %v2223_v63, %v2194_v35  ;;  %v2261_v39 = vpop.permute.xlu2 %2260 }
 0x321   : > { %v2348_v5 = vrot.slane %v2261_v39, 4 }
 0x322   : > { %2236 = vst [vmem:[#allocation3 + $0x8] sm:$0xf0] %v2232_v49 }
 0x326   : > { %v2198_v13 = vpop.permute.xlu0 %2197  ;;  %v2202_v41 = vpop.permute.xlu1 %2201 }
 0x327   : > { %v2225_v62 = vsel %vm691_vm6, %v2224_v17, %v2198_v13 }
 0x328   : > { %v2226_v31 = vsel %vm693_vm7, %v2225_v62, %v2202_v41  ;;  %v2267_v55 = vpop.permute.xlu2 %2266 }
 0x329   : > { %v2227_v30 = vsel %vm695_vm8, %v2226_v31, %v2206_v53  ;;  %v2290_v52 = vrot.slane %v2267_v55, 4 }
 0x32e   : > { %v2210_v3 = vpop.permute.xlu0 %2209  ;;  %v2214_v34 = vpop.permute.xlu1 %2213 }
 0x32f   : > { %v2228_v25 = vsel %vm697_vm9, %v2227_v30, %v2210_v3 }
 0x330   : > { %v2229_v50 = vsel %vm699_vm10, %v2228_v25, %v2214_v34 }
 0x331   : > { %v2233_v61 = vrot.slane %v2229_v50, 4 }
 0x333   : > { %2237 = vst [vmem:[#allocation3 + $0x20] sm:$0xf0] %v2233_v61 }
 0x336   : > { %v2257_v46 = vpop.permute.xlu0 %2256  ;;  %v2259_v4 = vpop.permute.xlu1 %2258 }
 0x337   : > { %v2292_v33 = vrot.slane %v2259_v4, 4  ;;  %v2291_v24 = vsel %vm319_vm0, %v2290_v52, %v2259_v4  ;;  %v2336_v49 = vrot.slane %v2257_v46, 4 }
 0x338   : > { %v2297_v6 = vperm.slane %v2291_v24, %v12407_v16 }
 0x339   : > { %v2293_v2 = vsel %vm319_vm0, %v2267_v55, %v2292_v33 }
 0x33a   : > { %v2301_v44 = vperm.slane %v2293_v2, %v12407_v16  ;;  %v2302_v1 = vrot.slane %v2297_v6, 4 }
 0x33c   : > { %v2314_v19 = vrot.slane %v2301_v44, 4 }
 0x33e   : > { %v2263_v48 = vpop.permute.xlu0 %2262  ;;  %v2265_v58 = vpop.permute.xlu1 %2264 }
 0x33f   : > { %v2278_v27 = vrot.slane %v2263_v48, 4  ;;  %v2281_v20 = vsel %vm319_vm0, %v2263_v48, %v2280_v45  ;;  %v2334_v51 = vrot.slane %v2265_v58, 4  ;;  %v2337_v63 = vsel %vm319_vm0, %v2265_v58, %v2336_v49  ;;  %v2468_v49 = vld [vmem:[#allocation3 + $0x28] sm:$0xff] }
 0x340   : > { %v2289_v23 = vperm.slane %v2281_v20, %v12407_v16 }
 0x341   : > { %v2279_v22 = vsel %vm319_vm0, %v2278_v27, %v2255_v47  ;;  %v2335_v35 = vsel %vm319_vm0, %v2334_v51, %v2257_v46  ;;  %v2473_v51 = vld [vmem:[%s12223_s2] sm:$0xff] }
 0x342   : > { %v2285_v26 = vperm.slane %v2279_v22, %v12407_v16  ;;  %v2315_v7 = vsel %vm319_vm0, %v2314_v19, %v2289_v23  ;;  %v2316_v11 = vrot.slane %v2289_v23, 4  ;;  %v2341_v54 = vperm.slane %v2335_v35, %v12407_v16 }
 0x343   : > { %v2321_v57 = vperm.slane %v2315_v7, %v12408_v42  ;;  %v7044_v19 = vmov 0  }
 0x344   : > { %v2304_v60 = vrot.slane %v2285_v26, 4  ;;  %v2303_v36 = vsel %vm319_vm0, %v2302_v1, %v2285_v26  ;;  %v2317_v0 = vsel %vm319_vm0, %v2301_v44, %v2316_v11  ;;  %v2360_v13 = vrot.slane %v2341_v54, 4  ;;  %6405 = vset.pattern.permute.xlu0 %v7044_v19  ;;  %6931 = vset.pattern.permute.xlu2 %v7044_v19 }
 0x345   : > { %v8821_v18 = vperm.slane %v2303_v36, %v12408_v42  ;;  %v2330_v21 = vrot.slane %v2321_v57, 4  ;;  %v2325_v47 = vperm.slane %v2317_v0, %v12408_v42  ;;  %v2463_v0 = vld [vmem:[#allocation3 + $0x30] sm:$0xff] }
 0x346   : > { %v2269_v10 = vpop.permute.xlu0 %2268  ;;  %v2305_v56 = vsel %vm319_vm0, %v2297_v6, %v2304_v60 }
 0x347   : > { %v2346_v29 = vrot.slane %v2269_v10, 4  ;;  %v2313_v32 = vperm.slane %v2305_v56, %v12408_v42  ;;  %v2326_v38 = vrot.slane %v8821_v18, 4  ;;  %v2349_v15 = vsel %vm319_vm0, %v2269_v10, %v2348_v5  ;;  %v2465_v5 = vld [vmem:[#allocation3 + $0x18] sm:$0xff] }
 0x348   : > { %v2357_v43 = vperm.slane %v2349_v15, %v12407_v16  ;;  %v2331_v37 = vsel %vm319_vm0, 0.0, %v2330_v21  ;;  %v2332_v62 = vrot.slane %v2325_v47, 4 }
 0x349   : > { %v2347_v14 = vsel %vm319_vm0, %v2346_v29, %v2261_v39  ;;  %2395 = vrot.lane.b32.xlu2 %v2313_v32, %s7036_s9  ;;  %v2327_v28 = vsel %vm319_vm0, 0.0, %v2326_v38  ;;  %v2328_v9 = vrot.slane %v2313_v32, 4  ;;  %v2345_v39 = vperm.slane %v2337_v63, %v12407_v16  ;;  %v2464_v63 = vld [vmem:[#allocation3] sm:$0xff] }
 0x34a   : > { %v2353_v12 = vperm.slane %v2347_v14, %v12407_v16  ;;  %2391 = vrot.lane.b32.xlu1 %v2327_v28, %s7037_s10  ;;  %v2370_v41 = vrot.slane %v2357_v43, 4  ;;  %v2333_v34 = vsel %vm319_vm0, 0.0, %v2332_v62  ;;  %v2469_v28 = vld [vmem:[#allocation3 + $0x8] sm:$0xff] }
 0x34b   : > { %v2329_v8 = vsel %vm319_vm0, 0.0, %v2328_v9  ;;  %v2372_v50 = vrot.slane %v2345_v39, 4 }
 0x34c   : > { %v2358_v53 = vrot.slane %v2353_v12, 4  ;;  %2399 = vrot.lane.b32.xlu0 %v2329_v8, %s7033_s26  ;;  %v2361_v31 = vsel %vm319_vm0, %v2353_v12, %v2360_v13  ;;  %v2371_v30 = vsel %vm319_vm0, %v2370_v41, %v2345_v39  ;;  %v2467_v12 = vld [vmem:[#allocation3 + $0x48] sm:$0xff]  ;;  %v6168_v13 = vld.sshfl [vmem:[#allocation1 + $0x8] sm:$0xff pattern:$0x75316420] }
 0x34d   : > { %v2369_v25 = vperm.slane %v2361_v31, %v12408_v42  ;;  %v2377_v61 = vperm.slane %v2371_v30, %v12408_v42  ;;  %v2373_v46 = vsel %vm319_vm0, %v2357_v43, %v2372_v50  ;;  %v6167_v43 = vld.sshfl [vmem:[#allocation1] sm:$0xff pattern:$0x75316420] }
 0x34e   : > { %v2359_v40 = vsel %vm319_vm0, %v2358_v53, %v2341_v54  ;;  %v2381_v33 = vperm.slane %v2373_v46, %v12408_v42  ;;  %v2462_v53 = vld [vmem:[%s12222_s1] sm:$0xff] }
 0x34f   : > { %v2365_v59 = vperm.slane %v2359_v40, %v12408_v42  ;;  %v2384_v55 = vrot.slane %v2369_v25, 4  ;;  %v2386_v4 = vrot.slane %v2377_v61, 4 }
 0x350   : > { %v2388_v2 = vrot.slane %v2381_v33, 4 }
 0x351   : > { %2407 = vrot.lane.b32.xlu2 %v2331_v37, %s7031_s19  ;;  %v2382_v17 = vrot.slane %v2365_v59, 4  ;;  %v2385_v52 = vsel %vm319_vm0, 0.0, %v2384_v55  ;;  %v2387_v24 = vsel %vm319_vm0, 0.0, %v2386_v4 }
 0x352   : > { %2403 = vrot.lane.b32.xlu1 %v2321_v57, %s7035_s29  ;;  %v2389_v45 = vsel %vm319_vm0, 0.0, %v2388_v2 }
 0x353   : > { %v2383_v3 = vsel %vm319_vm0, 0.0, %v2382_v17 }
 0x354   : > { %2411 = vrot.lane.b32.xlu0 %v2325_v47, %s7034_s28  ;;  %v2466_v47 = vld [vmem:[#allocation3 + $0x10] sm:$0xff] }
 0x359   : > { %2419 = vrot.lane.b32.xlu2 %v2383_v3, %s7037_s10 }
 0x35a   : > { %2415 = vrot.lane.b32.xlu1 %v2333_v34, %s7032_s20 }
 0x35c   : > { %2423 = vrot.lane.b32.xlu0 %v2369_v25, %s7036_s9 }
 0x361   : > { %2431 = vrot.lane.b32.xlu2 %v2377_v61, %s7035_s29 }
 0x362   : > { %2427 = vrot.lane.b32.xlu1 %v2385_v52, %s7033_s26 }
 0x364   : > { %2435 = vrot.lane.b32.xlu0 %v2387_v24, %s7031_s19 }
 0x369   : > { %2443 = vrot.lane.b32.xlu2 %v2389_v45, %s7032_s20 }
 0x36a   : > { %2439 = vrot.lane.b32.xlu1 %v2381_v33, %s7034_s28 }
 0x36c   : > { %2476 = vperm.xlu0 %6405, %v2473_v51  }
 0x3a3   : > { %v2396_v6 = vpop.permute.xlu2 %2395 }
 0x3ab   : > { %v2408_v27 = vpop.permute.xlu2 %2407 }
 0x3b3   : > { %v2420_v60 = vpop.permute.xlu2 %2419 }
 0x3b4   : > { %v2453_v32 = vsel %vm687_vm4, %v2365_v59, %v2420_v60  ;;  %v2470_v59 = vld [vmem:[#allocation3 + $0x20] sm:$0xff] }
 0x3bb   : > { %v2432_v29 = vpop.permute.xlu2 %2431 }
 0x3bc   : > { %v2392_v48 = vpop.permute.xlu1 %2391 }
 0x3bd   : > { %v2446_v20 = vsel %vm687_vm4, %v8821_v18, %v2392_v48 }
 0x3be   : > { %v2400_v44 = vpop.permute.xlu0 %2399  ;;  %v2447_v22 = vsel %vm689_vm5, %v2446_v20, %v2396_v6 }
 0x3bf   : > { %v2448_v1 = vsel %vm691_vm6, %v2447_v22, %v2400_v44 }
 0x3c3   : > { %v2444_v21 = vpop.permute.xlu2 %2443 }
 0x3c4   : > { %v2404_v23 = vpop.permute.xlu1 %2403 }
 0x3c5   : > { %v2449_v26 = vsel %vm693_vm7, %v2448_v1, %v2404_v23 }
 0x3c6   : > { %v2412_v58 = vpop.permute.xlu0 %2411  ;;  %v2450_v36 = vsel %vm695_vm8, %v2449_v26, %v2408_v27 }
 0x3c7   : > { %v2451_v18 = vsel %vm697_vm9, %v2450_v36, %v2412_v58 }
 0x3cc   : > { %v2416_v7 = vpop.permute.xlu1 %2415 }
 0x3cd   : > { %v2452_v10 = vsel %vm699_vm10, %v2451_v18, %v2416_v7 }
 0x3ce   : > { %2460 = vst [vmem:[#allocation3 + $0x40] sm:$0xf] %v2452_v10  ;;  %v2424_v56 = vpop.permute.xlu0 %2423 }
 0x3cf   : > { %v2454_v57 = vsel %vm689_vm5, %v2453_v32, %v2424_v56 }
 0x3d4   : > { %v2428_v38 = vpop.permute.xlu1 %2427 }
 0x3d5   : > { %v2471_v35 = vld [vmem:[#allocation3 + $0x40] sm:$0xf]  ;;  %v2455_v14 = vsel %vm691_vm6, %v2454_v57, %v2428_v38 }
 0x3d6   : > { %6324 = vmatpush.msk.msra.mxu0 %vm2483_vm11, %v2471_v35  ;;  %v2436_v9 = vpop.permute.xlu0 %2435  ;;  %v2456_v11 = vsel %vm693_vm7, %v2455_v14, %v2432_v29 }
 0x3d7   : > { %v2457_v8 = vsel %vm695_vm8, %v2456_v11, %v2436_v9 }
 0x3d8   : > { %2502 = vmatpush.msra.mxu0 %v2469_v28 }
 0x3da   : > { %2503 = vmatpush.msra.mxu0 %v2467_v12 }
 0x3dc   : > { %2504 = vmatpush.msra.mxu0 %v2465_v5  ;;  %v2440_v54 = vpop.permute.xlu1 %2439 }
 0x3dd   : > { %v2458_v15 = vsel %vm697_vm9, %v2457_v8, %v2440_v54 }
 0x3de   : > { %v2459_v40 = vsel %vm699_vm10, %v2458_v15, %v2444_v21  ;;  %2505 = vmatpush.msra.mxu0 %v2463_v0  ;;  %v2477_v41 = vpop.permute.xlu0 %2476 }
 0x3df   : > { %2461 = vst [vmem:[#allocation3 + $0x38] sm:$0xf] %v2459_v40  ;;  %6325 = vmatmul.msk.f32.vlgmr.msra.gmra.mxu0 %vm2479_vm12, %v2462_v53 }
 0x3e0   : > { %6330 = vmatpush.msk.msrb.mxu0 %vm2483_vm11, %v6167_v43 }
 0x3e6   : > { %v2472_v37 = vld [vmem:[#allocation3 + $0x38] sm:$0xf] }
 0x3e7   : > { %6326 = vmatpush.msk.msra.mxu1 %vm2483_vm11, %v2472_v37 }
 0x3e9   : > { %2522 = vmatpush.msra.mxu1 %v2470_v59 }
 0x3eb   : > { %2523 = vmatpush.msra.mxu1 %v2468_v49 }
 0x3ed   : > { %2524 = vmatpush.msra.mxu1 %v2466_v47 }
 0x3ef   : > { %2525 = vmatpush.msra.mxu1 %v2464_v63 }
 0x3f0   : > { %6327 = vmatmul.msk.f32.vlgmr.msra.gmra.mxu1 %vm2479_vm12, %v2462_v53 }
 0x3f1   : > { %6332 = vmatpush.msk.msrb.mxu1 %vm2483_vm11, %v6168_v13 }
 0x45c   : > { %v2507_v17 = vpop.f32.mrf.mxu0 }
 0x45d   : > { %v2508_v62 = vadd.f32 %v2507_v17, %v2477_v41 }
 0x45f   : > { %v2530_v39 = vmax.f32 %v2508_v62, 0.0 }
 0x461   : > { %2569 = vrot.lane.b32.xlu0 %v2530_v39, %s7033_s26  ;;  %2560 = vrot.lane.b32.xlu2 %v2530_v39, %s7034_s28  ;;  %v2602_v55 = vrot.slane %v2530_v39, 4 }
 0x462   : > { %2557 = vrot.lane.b32.xlu1 %v2530_v39, %s7032_s20 }
 0x469   : > { %2566 = vrot.lane.b32.xlu2 %v2530_v39, %s7035_s29 }
 0x46a   : > { %2563 = vrot.lane.b32.xlu1 %v2530_v39, %s7031_s19 }
 0x46d   : > { %v2527_v31 = vpop.f32.mrf.mxu1 }
 0x46e   : > { %v2528_v3 = vadd.f32 %v2527_v31, %v2477_v41 }
 0x470   : > { %v8900_v30 = vmax.f32 %v2528_v3, 0.0 }
 0x471   : > { %2575 = vrot.lane.b32.xlu2 %v2530_v39, %s7037_s10 }
 0x472   : > { %2572 = vrot.lane.b32.xlu1 %v2530_v39, %s7036_s9  ;;  %2579 = vrot.lane.b32.xlu0 %v8900_v30, %s7032_s20  ;;  %v2714_v28 = vrot.slane %v8900_v30, 4 }
 0x479   : > { %2585 = vrot.lane.b32.xlu2 %v8900_v30, %s7031_s19 }
 0x47a   : > { %2582 = vrot.lane.b32.xlu1 %v8900_v30, %s7034_s28  ;;  %2588 = vrot.lane.b32.xlu0 %v8900_v30, %s7035_s29 }
 0x481   : > { %2594 = vrot.lane.b32.xlu2 %v8900_v30, %s7036_s9 }
 0x482   : > { %2591 = vrot.lane.b32.xlu1 %v8900_v30, %s7033_s26  ;;  %2597 = vrot.lane.b32.xlu0 %v8900_v30, %s7037_s10 }
 0x4bb   : > { %v2561_v34 = vpop.permute.xlu2 %2560 }
 0x4bc   : > { %v2603_v46 = vsel %vm319_vm0, %v2561_v34, %v2602_v55  ;;  %v2600_v22 = vrot.slane %v2561_v34, 4 }
 0x4bd   : > { %v8921_v45 = vperm.slane %v2603_v46, %v12407_v16 }
 0x4be   : > { %v2601_v56 = vsel %vm319_vm0, %v2600_v22, %v2530_v39 }
 0x4bf   : > { %v2662_v23 = vrot.slane %v8921_v45, 4  ;;  %v8956_v11 = vperm.slane %v2601_v56, %v12407_v16 }
 0x4c3   : > { %v2567_v25 = vpop.permute.xlu2 %2566 }
 0x4c4   : > { %v2626_v1 = vrot.slane %v2567_v25, 4 }
 0x4cb   : > { %v2576_v61 = vpop.permute.xlu2 %2575 }
 0x4cc   : > { %v2636_v27 = vrot.slane %v2576_v61, 4 }
 0x4d3   : > { %v2570_v4 = vpop.permute.xlu0 %2569  ;;  %v2586_v48 = vpop.permute.xlu2 %2585 }
 0x4d4   : > { %v2558_v50 = vpop.permute.xlu1 %2557  ;;  %v2638_v6 = vrot.slane %v2570_v4, 4  ;;  %v2637_v26 = vsel %vm319_vm0, %v2636_v27, %v2570_v4  ;;  %v2724_v62 = vrot.slane %v2586_v48, 4 }
 0x4d5   : > { %v2614_v33 = vrot.slane %v2558_v50, 4  ;;  %v8941_v29 = vperm.slane %v2637_v26, %v12407_v16 }
 0x4d6   : > { %v2639_v58 = vsel %vm319_vm0, %v2576_v61, %v2638_v6 }
 0x4d7   : > { %v8944_v32 = vperm.slane %v2639_v58, %v12407_v16  ;;  %v2672_v53 = vrot.slane %v8941_v29, 4 }
 0x4db   : > { %v2595_v12 = vpop.permute.xlu2 %2594 }
 0x4dc   : > { %v2564_v52 = vpop.permute.xlu1 %2563  ;;  %v2736_v63 = vrot.slane %v2595_v12, 4 }
 0x4dd   : > { %v2612_v24 = vrot.slane %v2564_v52, 4  ;;  %v2615_v2 = vsel %vm319_vm0, %v2564_v52, %v2614_v33 }
 0x4de   : > { %v8924_v44 = vperm.slane %v2615_v2, %v12407_v16 }
 0x4df   : > { %v2613_v20 = vsel %vm319_vm0, %v2612_v24, %v2558_v50 }
 0x4e0   : > { %v8931_v36 = vperm.slane %v2613_v20, %v12407_v16  ;;  %v2663_v51 = vsel %vm319_vm0, %v8924_v44, %v2662_v23 }
 0x4e1   : > { %v8947_v38 = vperm.slane %v2663_v51, %v12408_v42  ;;  %v2684_v51 = vrot.slane %v8944_v32, 4 }
 0x4e2   : > { %v2648_v14 = vrot.slane %v8931_v36, 4 }
 0x4e3   : > { %v2710_v0 = vrot.slane %v8947_v38, 4 }
 0x4e4   : > { %v2573_v19 = vpop.permute.xlu1 %2572  ;;  %v2580_v60 = vpop.permute.xlu0 %2579  ;;  %v2649_v59 = vsel %vm319_vm0, %v2648_v14, %v8956_v11 }
 0x4e5   : > { %v2624_v18 = vrot.slane %v2573_v19, 4  ;;  %v2627_v7 = vsel %vm319_vm0, %v2573_v19, %v2626_v1  ;;  %v2726_v8 = vrot.slane %v2580_v60, 4  ;;  %v2655_v31 = vperm.slane %v2649_v59, %v12408_v42 }
 0x4e6   : > { %v8937_v10 = vperm.slane %v2627_v7, %v12407_v16 }
 0x4e7   : > { %v2625_v57 = vsel %vm319_vm0, %v2624_v18, %v2567_v25  ;;  %v2727_v13 = vsel %vm319_vm0, %v2586_v48, %v2726_v8  ;;  %v2725_v25 = vsel %vm319_vm0, %v2724_v62, %v2580_v60  ;;  %v2698_v24 = vrot.slane %v2655_v31, 4 }
 0x4e8   : > { %v2686_v35 = vrot.slane %v8937_v10, 4  ;;  %v8959_v5 = vperm.slane %v2625_v57, %v12407_v16  ;;  %v2735_v50 = vperm.slane %v2727_v13, %v12407_v16  ;;  %v2731_v2 = vperm.slane %v2725_v25, %v12407_v16 }
 0x4e9   : > { %v2685_v8 = vsel %vm319_vm0, %v2684_v51, %v8937_v10 }
 0x4ea   : > { %v2687_v9 = vsel %vm319_vm0, %v8944_v32, %v2686_v35  ;;  %v2673_v17 = vsel %vm319_vm0, %v2672_v53, %v8959_v5  ;;  %v2674_v18 = vrot.slane %v8959_v5, 4  ;;  %v2760_v7 = vrot.slane %v2731_v2, 4 }
 0x4eb   : > { %v8962_v54 = vperm.slane %v2687_v9, %v12408_v42  ;;  %v2679_v61 = vperm.slane %v2673_v17, %v12408_v42  ;;  %v2691_v10 = vperm.slane %v2685_v8, %v12408_v42  ;;  %v2772_v62 = vrot.slane %v2735_v50, 4 }
 0x4ec   : > { %v2583_v21 = vpop.permute.xlu1 %2582  ;;  %v2589_v15 = vpop.permute.xlu0 %2588 }
 0x4ed   : > { %v2712_v40 = vrot.slane %v2583_v21, 4  ;;  %v2715_v43 = vsel %vm319_vm0, %v2583_v21, %v2714_v28  ;;  %v2738_v37 = vrot.slane %v2589_v15, 4  ;;  %v2711_v47 = vsel %vm319_vm0, %v8962_v54, %v2710_v0 }
 0x4ee   : > { %v8970_v49 = vperm.slane %v2715_v43, %v12407_v16  ;;  %2868 = vrot.lane.b32.xlu0 %v2711_v47, %s7041_s11  ;;  %v2737_v3 = vsel %vm319_vm0, %v2736_v63, %v2589_v15  ;;  %v2699_v20 = vsel %vm319_vm0, %v2679_v61, %v2698_v24  ;;  %v2675_v43 = vsel %vm319_vm0, %v8941_v29, %v2674_v18 }
 0x4ef   : > { %v2713_v41 = vsel %vm319_vm0, %v2712_v40, %v8900_v30  ;;  %v2739_v34 = vsel %vm319_vm0, %v2595_v12, %v2738_v37  ;;  %v2743_v46 = vperm.slane %v2737_v3, %v12407_v16  ;;  %v2660_v40 = vrot.slane %v8924_v44, 4 }
 0x4f0   : > { %v2774_v39 = vrot.slane %v8970_v49, 4  ;;  %v2719_v30 = vperm.slane %v2713_v41, %v12407_v16  ;;  %v2747_v4 = vperm.slane %v2739_v34, %v12407_v16  ;;  %v2696_v13 = vrot.slane %v2679_v61, 4 }
 0x4f1   : > { %v2786_v26 = vrot.slane %v2743_v46, 4  ;;  %v2683_v41 = vperm.slane %v2675_v43, %v12408_v42  ;;  %v2650_v44 = vrot.slane %v8956_v11, 4  ;;  %v2661_v29 = vsel %vm319_vm0, %v2660_v40, %v8921_v45 }
 0x4f2   : > { %v2775_v55 = vsel %vm319_vm0, %v2735_v50, %v2774_v39  ;;  %v2762_v27 = vrot.slane %v2719_v30, 4  ;;  %v2798_v58 = vrot.slane %v2747_v4, 4  ;;  %v2761_v32 = vsel %vm319_vm0, %v2760_v7, %v2719_v30 }
 0x4f3   : > { %v8997_v1 = vperm.slane %v2775_v55, %v12408_v42  ;;  %v2767_v59 = vperm.slane %v2761_v32, %v12408_v42  ;;  %v2704_v17 = vrot.slane %v2691_v10, 4  ;;  %v2651_v3 = vsel %vm319_vm0, %v8931_v36, %v2650_v44 }
 0x4f4   : > { %v2592_v33 = vpop.permute.xlu1 %2591  ;;  %v2598_v52 = vpop.permute.xlu0 %2597  ;;  %v2763_v35 = vsel %vm319_vm0, %v2731_v2, %v2762_v27  ;;  %v2697_v34 = vsel %vm319_vm0, %v2696_v13, %v2655_v31  ;;  %v2667_v25 = vperm.slane %v2661_v29, %v12408_v42  ;;  %v2700_v30 = vrot.slane %v2683_v41, 4 }
 0x4f5   : > { %v2750_v6 = vrot.slane %v2592_v33, 4  ;;  %v2748_v48 = vrot.slane %v2598_v52, 4  ;;  %v2822_v9 = vrot.slane %v8997_v1, 4  ;;  %v2771_v21 = vperm.slane %v2763_v35, %v12408_v42 }
 0x4f6   : > { %2844 = vrot.lane.b32.xlu0 %v2699_v20, %s7041_s11  ;;  %v2773_v61 = vsel %vm319_vm0, %v2772_v62, %v8970_v49  ;;  %v2705_v11 = vsel %vm319_vm0, %v2704_v17, %v2667_v25  ;;  %v2659_v45 = vperm.slane %v2651_v3, %v12408_v42  ;;  %v2810_v55 = vrot.slane %v2767_v59, 4 }
 0x4f7   : > { %v2749_v22 = vsel %vm319_vm0, %v2748_v48, %v2592_v33  ;;  %v2751_v23 = vsel %vm319_vm0, %v2598_v52, %v2750_v6  ;;  %v2779_v36 = vperm.slane %v2773_v61, %v12408_v42  ;;  %v2814_v24 = vrot.slane %v2771_v21, 4 }
 0x4f8   : > { %v2755_v19 = vperm.slane %v2749_v22, %v12407_v16  ;;  %v2759_v60 = vperm.slane %v2751_v23, %v12407_v16  ;;  %v2701_v31 = vsel %vm319_vm0, %v2700_v30, %v2659_v45  ;;  %v2702_v2 = vrot.slane %v2659_v45, 4 }
 0x4f9   : > { %v2818_v33 = vrot.slane %v2779_v36, 4  ;;  %v2706_v48 = vrot.slane %v2667_v25, 4 }
 0x4fa   : > { %v2784_v56 = vrot.slane %v2755_v19, 4  ;;  %v2799_v57 = vsel %vm319_vm0, %v2759_v60, %v2798_v58  ;;  %v2787_v14 = vsel %vm319_vm0, %v2755_v19, %v2786_v26  ;;  %v2796_v39 = vrot.slane %v2759_v60, 4 }
 0x4fb   : > { %v2807_v28 = vperm.slane %v2799_v57, %v12408_v42  ;;  %v2795_v12 = vperm.slane %v2787_v14, %v12408_v42  ;;  %v2703_v6 = vsel %vm319_vm0, %v2683_v41, %v2702_v2  ;;  %v2707_v27 = vsel %vm319_vm0, %v2691_v10, %v2706_v48 }
 0x4fc   : > { %v2785_v5 = vsel %vm319_vm0, %v2784_v56, %v2743_v46  ;;  %v2797_v50 = vsel %vm319_vm0, %v2796_v39, %v2747_v4  ;;  %v2708_v58 = vrot.slane %v8962_v54, 4 }
 0x4fd   : > { %v2823_v53 = vsel %vm319_vm0, %v2807_v28, %v2822_v9  ;;  %v2812_v15 = vrot.slane %v2795_v12, 4  ;;  %v2791_v0 = vperm.slane %v2785_v5, %v12408_v42  ;;  %v2803_v46 = vperm.slane %v2797_v50, %v12408_v42 }
 0x4fe   : > { %2870 = vrot.lane.b32.xlu1 %v2823_v53, %s7041_s11  ;;  %v2815_v4 = vsel %vm319_vm0, %v2795_v12, %v2814_v24  ;;  %v2820_v23 = vrot.slane %v2807_v28, 4  ;;  %v2709_v19 = vsel %vm319_vm0, %v2708_v58, %v8947_v38 }
 0x4ff   : > { %v2813_v37 = vsel %vm319_vm0, %v2812_v15, %v2771_v21  ;;  %v2808_v47 = vrot.slane %v2791_v0, 4  ;;  %v2811_v49 = vsel %vm319_vm0, %v2791_v0, %v2810_v55  ;;  %v2819_v52 = vsel %vm319_vm0, %v2803_v46, %v2818_v33 }
 0x500   : > { %2850 = vrot.lane.b32.xlu0 %v2813_v37, %s7041_s11  ;;  %v2816_v20 = vrot.slane %v2803_v46, 4  ;;  %v2821_v26 = vsel %vm319_vm0, %v2820_v23, %v8997_v1 }
 0x501   : > { %v2809_v63 = vsel %vm319_vm0, %v2808_v47, %v2767_v59 }
 0x502   : > { %2842 = vrot.lane.b32.xlu2 %v2809_v63, %s7041_s11  ;;  %v2817_v22 = vsel %vm319_vm0, %v2816_v20, %v2779_v36 }
 0x506   : > { %2840 = vrot.lane.b32.xlu1 %v2697_v34, %s7041_s11 }
 0x508   : > { %2856 = vrot.lane.b32.xlu0 %v2705_v11, %s7041_s11 }
 0x50a   : > { %2848 = vrot.lane.b32.xlu2 %v2701_v31, %s7041_s11 }
 0x50e   : > { %2846 = vrot.lane.b32.xlu1 %v2811_v49, %s7041_s11 }
 0x510   : > { %2862 = vrot.lane.b32.xlu0 %v2819_v52, %s7041_s11 }
 0x512   : > { %2854 = vrot.lane.b32.xlu2 %v2815_v4, %s7041_s11 }
 0x516   : > { %2852 = vrot.lane.b32.xlu1 %v2703_v6, %s7041_s11 }
 0x51a   : > { %2860 = vrot.lane.b32.xlu2 %v2707_v27, %s7041_s11 }
 0x51e   : > { %2858 = vrot.lane.b32.xlu1 %v2817_v22, %s7041_s11 }
 0x522   : > { %2866 = vrot.lane.b32.xlu2 %v2821_v26, %s7041_s11 }
 0x526   : > { %2864 = vrot.lane.b32.xlu1 %v2709_v19, %s7041_s11 }
 0x55c   : > { %v2843_v60 = vpop.permute.xlu2 %2842 }
 0x55d   : > { %2889 = vst.msk [vmem:[#allocation4 + $0x9] sm:$0xff] %vm502_vm3, %v2843_v60 }
 0x560   : > { %v2869_v51 = vpop.permute.xlu0 %2868 }
 0x561   : > { %2902 = vst.msk [vmem:[#allocation4 + $0xa9] sm:$0xff] %vm502_vm3, %v2869_v51 }
 0x564   : > { %v2849_v18 = vpop.permute.xlu2 %2848  ;;  %v9094_v43 = vld [vmem:[#allocation4 + $0x9] sm:$0xff] }
 0x565   : > { %2892 = vst.msk [vmem:[#allocation4 + $0x31] sm:$0xff] %vm502_vm3, %v2849_v18  ;;  %v4098_v13 = vrot.slane %v9094_v43, 4 }
 0x568   : > { %v2845_v7 = vpop.permute.xlu0 %2844  ;;  %v3230_v57 = vld [vmem:[#allocation4 + $0xa8] sm:$0xff] }
 0x569   : > { %2890 = vst.msk [vmem:[#allocation4 + $0x19] sm:$0xff] %vm502_vm3, %v2845_v7  ;;  %v9074_v28 = vld [vmem:[#allocation4 + $0xa9] sm:$0xff]  ;;  %v2956_v62 = vrot.slane %v3230_v57, 4 }
 0x56a   : > { %v4020_v20 = vrot.slane %v9074_v28, 4 }
 0x56c   : > { %v2855_v54 = vpop.permute.xlu2 %2854  ;;  %v3220_v29 = vld [vmem:[#allocation4 + $0x30] sm:$0xff] }
 0x56d   : > { %2895 = vst.msk [vmem:[#allocation4 + $0x51] sm:$0xff] %vm502_vm3, %v2855_v54  ;;  %v2920_v61 = vrot.slane %v3220_v29, 4  ;;  %v9124_v52 = vld [vmem:[#allocation4 + $0x31] sm:$0xff] }
 0x56e   : > { %v3984_v18 = vrot.slane %v9124_v52, 4 }
 0x570   : > { %v2871_v1 = vpop.permute.xlu1 %2870  ;;  %v9096_v59 = vld [vmem:[#allocation4 + $0x18] sm:$0xff] }
 0x571   : > { %2903 = vst.msk [vmem:[#allocation4 + $0xb1] sm:$0xff] %vm502_vm3, %v2871_v1  ;;  %v9122_v33 = vld [vmem:[#allocation4 + $0x19] sm:$0xff]  ;;  %v2934_v51 = vrot.slane %v9096_v59, 4 }
 0x572   : > { %v2851_v38 = vpop.permute.xlu0 %2850 }
 0x573   : > { %2893 = vst.msk [vmem:[#allocation4 + $0x39] sm:$0xff] %vm502_vm3, %v2851_v38 }
 0x574   : > { %v2861_v56 = vpop.permute.xlu2 %2860  ;;  %v9120_v49 = vld [vmem:[#allocation4 + $0x51] sm:$0xff] }
 0x575   : > { %2898 = vst.msk [vmem:[#allocation4 + $0x79] sm:$0xff] %vm502_vm3, %v2861_v56  ;;  %v4108_v1 = vrot.slane %v9120_v49, 4 }
 0x578   : > { %v2841_v35 = vpop.permute.xlu1 %2840  ;;  %v9072_v14 = vld [vmem:[#allocation4 + $0xb0] sm:$0xff] }
 0x579   : > { %v9076_v9 = vld [vmem:[#allocation4 + $0xb1] sm:$0xff]  ;;  %2888 = vst.msk [vmem:[#allocation4 + $0x1] sm:$0xff] %vm502_vm3, %v2841_v35  ;;  %v6406_v12 = vpack.i.bf16 %v9072_v14, %v3230_v57  ;;  %v3068_v54 = vrot.slane %v9072_v14, 4 }
 0x57a   : > { %v6416_v8 = vpack.i.bf16 %v9076_v9, %v9074_v28  ;;  %v2857_v32 = vpop.permute.xlu0 %2856  ;;  %v5734_v10 = vld [vmem:[#allocation4 + $0xaa] sm:$0xff]  ;;  %v5735_v37 = vld [vmem:[#allocation4 + $0xb2] sm:$0xff] }
 0x57b   : > { %2896 = vst.msk [vmem:[#allocation4 + $0x61] sm:$0xff] %vm502_vm3, %v2857_v32  ;;  %6407 = vrot.lane.b32.xlu1 %v6406_v12, %s7042_s12  ;;  %v9098_v63 = vld [vmem:[#allocation4 + $0x39] sm:$0xff]  ;;  %v6426_v3 = vpack.i.bf16 %v5735_v37, %v5734_v10  ;;  %v4132_v32 = vrot.slane %v9076_v9, 4 }
 0x57c   : > { %6417 = vrot.lane.b32.xlu2 %v6416_v8, %s7042_s12  ;;  %v2867_v5 = vpop.permute.xlu2 %2866  ;;  %v3226_v47 = vld [vmem:[#allocation4 + $0x78] sm:$0xff]  ;;  %v4099_v34 = vsel %vm319_vm0, %v9098_v63, %v4098_v13  ;;  %v4096_v31 = vrot.slane %v9098_v63, 4 }
 0x57d   : > { %2901 = vst.msk [vmem:[#allocation4 + $0x99] sm:$0xff] %vm502_vm3, %v2867_v5  ;;  %v3221_v17 = vld [vmem:[#allocation4 + $0x38] sm:$0xff]  ;;  %v2957_v25 = vsel %vm319_vm0, %v2956_v62, %v3226_v47  ;;  %v2958_v30 = vrot.slane %v3226_v47, 4 }
 0x57e   : > { %v3032_v11 = vrot.slane %v3221_v17, 4  ;;  %v9118_v55 = vld [vmem:[#allocation4 + $0x79] sm:$0xff]  ;;  %v4097_v19 = vsel %vm319_vm0, %v4096_v31, %v9094_v43  ;;  %v9141_v60 = vpack.i.bf16 %v3221_v17, %v3220_v29 }
 0x57f   : > { %v2959_v45 = vsel %vm319_vm0, %v3230_v57, %v2958_v30  ;;  %v4022_v58 = vrot.slane %v9118_v55, 4  ;;  %v4021_v7 = vsel %vm319_vm0, %v4020_v20, %v9118_v55 }
 0x580   : > { %v2847_v53 = vpop.permute.xlu1 %2846  ;;  %v3216_v21 = vld [vmem:[#allocation4] sm:$0xff]  ;;  %v3217_v15 = vld [vmem:[#allocation4 + $0x8] sm:$0xff]  ;;  %v9165_v5 = vperm.slane %v4021_v7, %v12407_v16  ;;  %v9180_v37 = vperm.slane %v2959_v45, %v12407_v16 }
 0x581   : > { %2891 = vst.msk [vmem:[#allocation4 + $0x21] sm:$0xff] %vm502_vm3, %v2847_v53  ;;  %v9087_v0 = vpack.i.bf16 %v3217_v15, %v3216_v21  ;;  %v2921_v50 = vsel %vm319_vm0, %v2920_v61, %v3216_v21  ;;  %v3033_v36 = vsel %vm319_vm0, %v3032_v11, %v3217_v15  ;;  %v2922_v46 = vrot.slane %v3216_v21, 4  ;;  %v4280_v48 = vld [vmem:[#allocation4 + $0x1] sm:$0xff] }
 0x582   : > { %v2863_v40 = vpop.permute.xlu0 %2862  ;;  %v3034_v24 = vrot.slane %v3217_v15, 4  ;;  %v3986_v38 = vrot.slane %v4280_v48, 4  ;;  %v4023_v21 = vsel %vm319_vm0, %v9074_v28, %v4022_v58  ;;  %v9172_v15 = vperm.slane %v4099_v34, %v12407_v16  ;;  %v9197_v34 = vld [vmem:[#allocation4 + $0x61] sm:$0xff] }
 0x583   : > { %2899 = vst.msk [vmem:[#allocation4 + $0x81] sm:$0xff] %vm502_vm3, %v2863_v40  ;;  %6412 = vrot.lane.b32.xlu1 %v6406_v12, %s7043_s13  ;;  %6437 = vrot.lane.b32.xlu0 %v9087_v0, %s7042_s12  ;;  %v2923_v27 = vsel %vm319_vm0, %v3220_v29, %v2922_v46  ;;  %v9158_v12 = vperm.slane %v2957_v25, %v12407_v16  ;;  %v9174_v40 = vld [vmem:[#allocation4 + $0x60] sm:$0xff] }
 0x584   : > { %6422 = vrot.lane.b32.xlu2 %v6416_v8, %s7043_s13  ;;  %v3035_v26 = vsel %vm319_vm0, %v3221_v17, %v3034_v24  ;;  %v9161_v8 = vperm.slane %v4097_v19, %v12407_v16  ;;  %v9177_v10 = vperm.slane %v2921_v50, %v12407_v16  ;;  %v3987_v13 = vsel %vm319_vm0, %v9124_v52, %v3986_v38  ;;  %v9207_v45 = vld [vmem:[#allocation4 + $0x99] sm:$0xff] }
 0x585   : > { %v9191_v28 = vperm.slane %v3033_v36, %v12407_v16  ;;  %v3985_v29 = vsel %vm319_vm0, %v3984_v18, %v4280_v48  ;;  %v2931_v61 = vperm.slane %v2923_v27, %v12407_v16  ;;  %v3043_v31 = vperm.slane %v3035_v26, %v12407_v16 }
 0x586   : > { %12409 = vst [vmem:[#allocation23_spill] sm:$0xff] %v9161_v8  ;;  %v4120_v18 = vrot.slane %v9207_v45, 4  ;;  %v9234_v7 = vperm.slane %v4023_v21, %v12407_v16 }
 0x587   : > { %v3082_v20 = vrot.slane %v9191_v28, 4  ;;  %v2982_v19 = vrot.slane %v2931_v61, 4 }
 0x588   : > { %v2853_v41 = vpop.permute.xlu1 %2852  ;;  %v9101_v44 = vld [vmem:[#allocation4 + $0x20] sm:$0xff] }
 0x589   : > { %2894 = vst.msk [vmem:[#allocation4 + $0x49] sm:$0xff] %vm502_vm3, %v2853_v41  ;;  %v9106_v39 = vpack.i.bf16 %v9101_v44, %v9096_v59  ;;  %v9155_v35 = vld [vmem:[#allocation4 + $0x21] sm:$0xff]  ;;  %v9188_v41 = vpack.i.bf16 %v9094_v43, %v4280_v48  ;;  %v4146_v43 = vrot.slane %v9161_v8, 4  ;;  %v3046_v58 = vrot.slane %v9101_v44, 4 }
 0x58a   : > { %v3227_v23 = vld [vmem:[#allocation4 + $0x80] sm:$0xff]  ;;  %v4109_v53 = vsel %vm319_vm0, %v4108_v1, %v9155_v35  ;;  %v4110_v17 = vrot.slane %v9155_v35, 4 }
 0x58b   : > { %6442 = vrot.lane.b32.xlu1 %v9106_v39, %s7042_s12  ;;  %v9153_v57 = vpack.i.bf16 %v3227_v23, %v3226_v47  ;;  %v9183_v47 = vperm.slane %v4109_v53, %v12407_v16  ;;  %v3069_v25 = vsel %vm319_vm0, %v3068_v54, %v3227_v23  ;;  %v3070_v30 = vrot.slane %v3227_v23, 4  ;;  %v9236_v54 = vld [vmem:[#allocation4 + $0x81] sm:$0xff] }
 0x58c   : > { %6427 = vrot.lane.b32.xlu2 %v6426_v3, %s7043_s13  ;;  %v9226_v23 = vperm.slane %v3985_v29, %v12407_v16  ;;  %v4111_v26 = vsel %vm319_vm0, %v9120_v49, %v4110_v17  ;;  %v3094_v53 = vrot.slane %v3043_v31, 4  ;;  %v9241_v29 = vperm.slane %v3987_v13, %v12407_v16 }
 0x58d   : > { %12410 = vst [vmem:[#allocation24_spill] sm:$0xff] %v9183_v47  ;;  %v3071_v24 = vsel %vm319_vm0, %v9072_v14, %v3070_v30  ;;  %v4147_v48 = vsel %vm319_vm0, %v9183_v47, %v4146_v43  ;;  %v9244_v17 = vperm.slane %v3069_v25, %v12407_v16 }
 0x590   : > { %v2859_v4 = vpop.permute.xlu1 %2858  ;;  %v9126_v2 = vld [vmem:[#allocation4 + $0x48] sm:$0xff]  ;;  %v9128_v6 = vld [vmem:[#allocation4 + $0x50] sm:$0xff] }
 0x591   : > { %2897 = vst.msk [vmem:[#allocation4 + $0x69] sm:$0xff] %vm502_vm3, %v2859_v4  ;;  %v9135_v22 = vpack.i.bf16 %v9128_v6, %v9126_v2  ;;  %v2970_v4 = vrot.slane %v9177_v10, 4  ;;  %v9222_v27 = vld [vmem:[#allocation4 + $0x49] sm:$0xff]  ;;  %v2932_v1 = vrot.slane %v9126_v2, 4  ;;  %v3044_v38 = vrot.slane %v9128_v6, 4 }
 0x592   : > { %v3047_v21 = vsel %vm319_vm0, %v9128_v6, %v3046_v58  ;;  %v3996_v30 = vrot.slane %v9222_v27, 4 }
 0x593   : > { %6452 = vrot.lane.b32.xlu0 %v9135_v22, %s7042_s12  ;;  %v2933_v43 = vsel %vm319_vm0, %v2932_v1, %v9096_v59  ;;  %v3045_v14 = vsel %vm319_vm0, %v3044_v38, %v9101_v44  ;;  %v3055_v36 = vperm.slane %v3047_v21, %v12407_v16  ;;  %v4133_v59 = vsel %vm319_vm0, %v4132_v32, %v9236_v54 }
 0x594   : > { %6432 = vrot.lane.b32.xlu2 %v6426_v3, %s7042_s12  ;;  %v3051_v6 = vperm.slane %v3045_v14, %v12407_v16  ;;  %v4134_v14 = vrot.slane %v9236_v54, 4 }
 0x595   : > { %v3092_v1 = vrot.slane %v3055_v36, 4 }
 0x596   : > { %v3080_v21 = vrot.slane %v3051_v6, 4 }
 0x597   : > { %v3093_v50 = vsel %vm319_vm0, %v3092_v1, %v3043_v31  ;;  %v4158_v31 = vrot.slane %v9172_v15, 4 }
 0x598   : > { %v2865_v62 = vpop.permute.xlu1 %2864  ;;  %v9195_v3 = vld [vmem:[#allocation4 + $0x68] sm:$0xff] }
 0x599   : > { %2900 = vst.msk [vmem:[#allocation4 + $0x91] sm:$0xff] %vm502_vm3, %v2865_v62  ;;  %v9205_v11 = vpack.i.bf16 %v9195_v3, %v9174_v40  ;;  %v2935_v62 = vsel %vm319_vm0, %v9126_v2, %v2934_v51  ;;  %v2939_v2 = vperm.slane %v2933_v43, %v12407_v16  ;;  %v3997_v51 = vsel %vm319_vm0, %v3996_v30, %v9122_v33 }
 0x59a   : > { %v2943_v13 = vperm.slane %v2935_v62, %v12407_v16  ;;  %v3095_v43 = vsel %vm319_vm0, %v3055_v36, %v3094_v53  ;;  %v9280_v30 = vperm.slane %v3071_v24, %v12407_v16  ;;  %v9288_v36 = vpack.i.bf16 %v9120_v49, %v9222_v27 }
 0x59b   : > { %6457 = vrot.lane.b32.xlu1 %v9205_v11, %s7042_s12  ;;  %v2968_v62 = vrot.slane %v2939_v2, 4  ;;  %v9301_v24 = vpack.i.bf16 %v9155_v35, %v9122_v33  ;;  %v9307_v49 = vperm.slane %v4147_v48, %v12408_v42  ;;  %v2971_v1 = vsel %vm319_vm0, %v2939_v2, %v2970_v4 }
 0x59c   : > { %6447 = vrot.lane.b32.xlu2 %v9141_v60, %s7042_s12  ;;  %v2980_v58 = vrot.slane %v2943_v13, 4  ;;  %v2983_v38 = vsel %vm319_vm0, %v2943_v13, %v2982_v19  ;;  %v4034_v19 = vrot.slane %v9226_v23, 4  ;;  %v9304_v13 = vperm.slane %v4133_v59, %v12407_v16 }
 0x59d   : > { %v9292_v53 = vsel %vm319_vm0, %v2968_v62, %v9177_v10  ;;  %v3104_v10 = vrot.slane %v9244_v17, 4  ;;  %v4135_v62 = vsel %vm319_vm0, %v9076_v9, %v4134_v14  ;;  %v3116_v59 = vrot.slane %v9280_v30, 4 }
 0x59e   : > { %v2981_v32 = vsel %vm319_vm0, %v2980_v58, %v2931_v61  ;;  %12411 = vst [vmem:[#allocation25_spill] sm:$0xff] %v9292_v53  ;;  %v9296_v61 = vsel %vm319_vm0, %v3080_v21, %v9191_v28  ;;  %v4046_v58 = vrot.slane %v9241_v29, 4  ;;  %v9313_v28 = vperm.slane %v4111_v26, %v12407_v16 }
 0x59f   : > { %12412 = vst [vmem:[#allocation28_spill] sm:$0xff] %v9296_v61  ;;  %v9322_v48 = vperm.slane %v2983_v38, %v12408_v42  ;;  %v3083_v21 = vsel %vm319_vm0, %v3051_v6, %v3082_v20  ;;  %v9326_v56 = vperm.slane %v3095_v43, %v12408_v42  ;;  %v9329_v4 = vperm.slane %v3997_v51, %v12407_v16 }
 0x5a0   : > { %v9257_v25 = vld [vmem:[#allocation4 + $0x90] sm:$0xff]  ;;  %v9259_v46 = vld [vmem:[#allocation4 + $0x98] sm:$0xff]  ;;  %v9333_v9 = vperm.slane %v2971_v1, %v12408_v42  ;;  %v12414_v61 = vrot.slane %v9122_v33, 4  ;;  %v9344_v6 = vperm.slane %v2981_v32, %v12408_v42  ;;  %v9361_v32 = vperm.slane %v3093_v50, %v12408_v42 }
 0x5a1   : > { %v9269_v44 = vpack.i.bf16 %v9259_v46, %v9257_v25  ;;  %v9357_v33 = vld [vmem:[#allocation4 + $0x91] sm:$0xff]  ;;  %v2944_v1 = vrot.slane %v9257_v25, 4 }
 0x5a2   : > { %v3999_v20 = vsel %vm319_vm0, %v9222_v27, %v12414_v61  ;;  %v3058_v27 = vrot.slane %v9195_v3, 4  ;;  %v9373_v61 = vperm.slane %v3083_v21, %v12408_v42  ;;  %v4008_v38 = vrot.slane %v9357_v33, 4 }
 0x5a3   : > { %6477 = vrot.lane.b32.xlu1 %v9106_v39, %s7043_s13  ;;  %6467 = vrot.lane.b32.xlu0 %v9269_v44, %s7042_s12  ;;  %v4289_v39 = vld [vmem:[#allocation4 + $0x69] sm:$0xff]  ;;  %v9349_v51 = vperm.slane %v3999_v20, %v12407_v16  ;;  %v2945_v53 = vsel %vm319_vm0, %v2944_v1, %v9174_v40 }
 0x5a4   : > { %6462 = vrot.lane.b32.xlu2 %v9153_v57, %s7042_s12  ;;  %v9318_v35 = vpack.i.bf16 %v4289_v39, %v9197_v34  ;;  %v4121_v26 = vsel %vm319_vm0, %v4120_v18, %v4289_v39  ;;  %v4122_v2 = vrot.slane %v4289_v39, 4  ;;  %v4035_v18 = vsel %vm319_vm0, %v9329_v4, %v4034_v19 }
 0x5a5   : > { %v9336_v14 = vperm.slane %v4121_v26, %v12407_v16  ;;  %v9366_v39 = vsel %vm319_vm0, %v9313_v28, %v4158_v31  ;;  %v9377_v50 = vsel %vm319_vm0, %v9349_v51, %v4046_v58  ;;  %v3056_v26 = vrot.slane %v9259_v46, 4 }
 0x5a6   : > { %v4123_v43 = vsel %vm319_vm0, %v9207_v45, %v4122_v2  ;;  %v12415_v31 = vrot.slane %v9174_v40, 4  ;;  %v3022_v2 = vrot.slane %v9333_v9, 4  ;;  %v3059_v21 = vsel %vm319_vm0, %v9259_v46, %v3058_v27 }
 0x5a7   : > { %12413 = vst [vmem:[#allocation27_spill] sm:$0xff] %v9336_v14  ;;  %v4170_v19 = vrot.slane %v9336_v14, 4  ;;  %v9391_v58 = vperm.slane %v4135_v62, %v12407_v16  ;;  %v3057_v14 = vsel %vm319_vm0, %v3056_v26, %v9195_v3  ;;  %v12416_v27 = vrot.slane %v9180_v37, 4 }
 0x5a8   : > { %v3063_v46 = vperm.slane %v3057_v14, %v12407_v16  ;;  %v9410_v1 = vperm.slane %v4035_v18, %v12408_v42 }
 0x5aa   : > { %v9418_v14 = vsel %vm319_vm0, %v3104_v10, %v3063_v46  ;;  %v4009_v10 = vsel %vm319_vm0, %v4008_v38, %v9197_v34  ;;  %v3026_v38 = vrot.slane %v9344_v6, 4 }
 0x5ab   : > { %6492 = vrot.lane.b32.xlu1 %v9205_v11, %s7043_s13  ;;  %6472 = vrot.lane.b32.xlu0 %v9087_v0, %s7043_s13  ;;  %v3030_v11 = vrot.slane %v9322_v48, 4  ;;  %v2947_v0 = vsel %vm319_vm0, %v9257_v25, %v12415_v31  ;;  %v3067_v25 = vperm.slane %v3059_v21, %v12407_v16  ;;  %v4171_v31 = vsel %vm319_vm0, %v9304_v13, %v4170_v19 }
 0x5ac   : > { %6482 = vrot.lane.b32.xlu2 %v9141_v60, %s7043_s13  ;;  %v3142_v60 = vrot.slane %v9326_v56, 4  ;;  %v2955_v20 = vperm.slane %v2947_v0, %v12407_v16  ;;  %v2951_v0 = vperm.slane %v2945_v53, %v12407_v16  ;;  %v12417_v19 = vrot.slane %v9158_v12, 4 }
 0x5ad   : > { %v3117_v40 = vsel %vm319_vm0, %v3116_v59, %v3067_v25  ;;  %v3118_v3 = vrot.slane %v3067_v25, 4  ;;  %v3134_v21 = vrot.slane %v9373_v61, 4 }
 0x5ae   : > { %v3005_v62 = vsel %vm319_vm0, %v12416_v27, %v2955_v20  ;;  %v3006_v8 = vrot.slane %v2955_v20, 4  ;;  %v9415_v53 = vsel %vm319_vm0, %v12417_v19, %v2951_v0  ;;  %v9421_v26 = vperm.slane %v3117_v40, %v12408_v42 }
 0x5af   : > { %v9406_v47 = vperm.slane %v3005_v62, %v12408_v42  ;;  %v2994_v25 = vrot.slane %v2951_v0, 4  ;;  %v3106_v27 = vrot.slane %v3063_v46, 4  ;;  %v9447_v40 = vperm.slane %v4123_v43, %v12407_v16 }
 0x5b0   : > { %v3007_v20 = vsel %vm319_vm0, %v9180_v37, %v3006_v8  ;;  %v3136_v8 = vrot.slane %v9421_v26, 4  ;;  %v3119_v37 = vsel %vm319_vm0, %v9280_v30, %v3118_v3  ;;  %v4086_v46 = vrot.slane %v9410_v1, 4 }
 0x5b1   : > { %v3024_v59 = vrot.slane %v9406_v47, 4  ;;  %v3015_v18 = vperm.slane %v3007_v20, %v12408_v42  ;;  %v3127_v30 = vperm.slane %v3119_v37, %v12408_v42  ;;  %v2995_v0 = vsel %vm319_vm0, %v9158_v12, %v2994_v25 }
 0x5b2   : > { %v3003_v3 = vperm.slane %v2995_v0, %v12408_v42  ;;  %v3107_v43 = vsel %vm319_vm0, %v9244_v17, %v3106_v27  ;;  %v4179_v12 = vperm.slane %v4171_v31, %v12408_v42 }
 0x5b3   : > { %6507 = vrot.lane.b32.xlu1 %v9188_v41, %s7042_s12  ;;  %6487 = vrot.lane.b32.xlu0 %v9135_v22, %s7043_s13  ;;  %v9444_v62 = vsel %vm319_vm0, %v3015_v18, %v3030_v11  ;;  %v9452_v22 = vsel %vm319_vm0, %v3136_v8, %v9361_v32  ;;  %v9467_v19 = vsel %vm319_vm0, %v3127_v30, %v3142_v60  ;;  %v3140_v17 = vrot.slane %v3127_v30, 4 }
 0x5b4   : > { %6497 = vrot.lane.b32.xlu2 %v9153_v57, %s7043_s13  ;;  %v9441_v57 = vsel %vm319_vm0, %v3024_v59, %v9344_v6  ;;  %v9464_v6 = vperm.slane %v4009_v10, %v12407_v16  ;;  %v3115_v20 = vperm.slane %v3107_v43, %v12408_v42  ;;  %v3028_v59 = vrot.slane %v3015_v18, 4 }
 0x5b5   : > { %v9474_v37 = vsel %vm319_vm0, %v3003_v3, %v3022_v2  ;;  %v12418_v60 = vrot.slane %v9307_v49, 4  ;;  %v3020_v18 = vrot.slane %v3003_v3, 4  ;;  %v9499_v30 = vsel %vm319_vm0, %v3140_v17, %v9326_v56  ;;  %v9678_v2 = vld [vmem:[#allocation4 + $0x82] sm:$0xff] }
 0x5b6   : > { %v4058_v25 = vrot.slane %v9464_v6, 4  ;;  %v9478_v10 = vsel %vm319_vm0, %v3115_v20, %v3134_v21  ;;  %v9487_v31 = vsel %vm319_vm0, %v3028_v59, %v9322_v48  ;;  %v3132_v0 = vrot.slane %v3115_v20, 4 }
 0x5b7   : > { %v9483_v27 = vsel %vm319_vm0, %v4179_v12, %v12418_v60  ;;  %v9508_v43 = vsel %vm319_vm0, %v3020_v18, %v9333_v9  ;;  %v12419_v59 = vrot.slane %v9197_v34, 4  ;;  %v4182_v20 = vrot.slane %v9447_v40, 4 }
 0x5b8   : > { %v4059_v21 = vsel %vm319_vm0, %v9165_v5, %v4058_v25  ;;  %v9516_v56 = vsel %vm319_vm0, %v3132_v0, %v9373_v61  ;;  %v3138_v17 = vrot.slane %v9361_v32, 4  ;;  %v4196_v18 = vrot.slane %v4179_v12, 4 }
 0x5b9   : > { %v4067_v48 = vperm.slane %v4059_v21, %v12408_v42  ;;  %v4011_v25 = vsel %vm319_vm0, %v9357_v33, %v12419_v59  ;;  %v4183_v61 = vsel %vm319_vm0, %v9391_v58, %v4182_v20  ;;  %v9532_v0 = vsel %vm319_vm0, %v9406_v47, %v3026_v38  ;;  %v9664_v38 = vld [vmem:[#allocation4 + $0x22] sm:$0xff] }
 0x5ba   : > { %12420 = vst [vmem:[#allocation30_spill] sm:$0xff] %v9532_v0  ;;  %v9535_v32 = vperm.slane %v4183_v61, %v12408_v42  ;;  %v9543_v12 = vsel %vm319_vm0, %v4196_v18, %v9307_v49  ;;  %v6516_v49 = vpack.i.bf16 %v9098_v63, %v9124_v52  ;;  %v9576_v63 = vperm.slane %v9377_v50, %v12408_v42 }
 0x5bb   : > { %6522 = vrot.lane.b32.xlu1 %v9288_v36, %s7042_s12  ;;  %6502 = vrot.lane.b32.xlu0 %v9269_v44, %s7043_s13  ;;  %v4019_v44 = vperm.slane %v4011_v25, %v12407_v16  ;;  %v9522_v60 = vsel %vm319_vm0, %v4067_v48, %v4086_v46  ;;  %v4084_v34 = vrot.slane %v4067_v48, 4  ;;  %12422 = vst [vmem:[#allocation31_spill] sm:$0xff] %v9543_v12  ;;  %v5174_v12 = vrot.slane %v9664_v38, 4 }
 0x5bc   : > { %6512 = vrot.lane.b32.xlu2 %v9301_v24, %s7042_s12  ;;  %v9547_v48 = vsel %vm319_vm0, %v9421_v26, %v3138_v17  ;;  %v9551_v25 = vpack.i.bf16 %v9207_v45, %v9357_v33  ;;  %v9566_v26 = vperm.slane %v9366_v39, %v12408_v42  ;;  %v4204_v45 = vrot.slane %v9535_v32, 4 }
 0x5bd   : > { %v4070_v59 = vrot.slane %v4019_v44, 4  ;;  %v9539_v46 = vsel %vm319_vm0, %v4084_v34, %v9410_v1  ;;  %12423 = vst [vmem:[#allocation33_spill] sm:$0xff] %v9547_v48  ;;  %v4044_v34 = vrot.slane %v9349_v51, 4  ;;  %v6531_v18 = vpack.i.bf16 %v9236_v54, %v9118_v55 }
 0x5be   : > { %12421 = vst [vmem:[#allocation26_spill] sm:$0xff] %v9539_v46  ;;  %v9581_v33 = vsel %vm319_vm0, %v4204_v45, %v9566_v26  ;;  %v4180_v51 = vrot.slane %v9391_v58, 4  ;;  %v4032_v55 = vrot.slane %v9329_v4, 4  ;;  %v4168_v58 = vrot.slane %v9304_v13, 4 }
 0x5bf   : > { %v4071_v47 = vsel %vm319_vm0, %v9234_v7, %v4070_v59  ;;  %12424 = vst [vmem:[#allocation32_spill] sm:$0xff] %v9581_v33  ;;  %v4045_v50 = vsel %vm319_vm0, %v4044_v34, %v9241_v29  ;;  %v4156_v59 = vrot.slane %v9313_v28, 4  ;;  %v12426_v29 = vld [vmem:[#allocation24_spill] sm:$0xff]  ;;  %v4068_v4 = vrot.slane %v9234_v7, 4 }
 0x5c0   : > { %v9562_v20 = vperm.slane %v4071_v47, %v12408_v42  ;;  %v4144_v28 = vrot.slane %v12426_v29, 4  ;;  %v4051_v47 = vperm.slane %v4045_v50, %v12408_v42  ;;  %v4056_v7 = vrot.slane %v9165_v5, 4 }
 0x5c1   : > { %v4157_v61 = vsel %vm319_vm0, %v4156_v59, %v9172_v15  ;;  %v4069_v13 = vsel %vm319_vm0, %v4068_v4, %v4019_v44  ;;  %v5732_v44 = vld [vmem:[#allocation4 + $0x92] sm:$0xff]  ;;  %v5722_v4 = vld [vmem:[#allocation4 + $0x1a] sm:$0xff]  ;;  %v4094_v9 = vrot.slane %v9576_v63, 4  ;;  %v4206_v3 = vrot.slane %v9566_v26, 4 }
 0x5c2   : > { %v4092_v52 = vrot.slane %v9562_v20, 4  ;;  %v4163_v54 = vperm.slane %v4157_v61, %v12408_v42  ;;  %v4075_v50 = vperm.slane %v4069_v13, %v12408_v42  ;;  %v4090_v61 = vrot.slane %v4051_v47, 4  ;;  %v5730_v13 = vld [vmem:[#allocation4 + $0x7a] sm:$0xff] }
 0x5c3   : > { %6537 = vrot.lane.b32.xlu1 %v9551_v25, %s7042_s12  ;;  %6517 = vrot.lane.b32.xlu0 %v6516_v49, %s7042_s12  ;;  %v5086_v8 = vrot.slane %v5730_v13, 4 }
 0x5c4   : > { %6527 = vrot.lane.b32.xlu2 %v9318_v35, %s7042_s12  ;;  %v9585_v39 = vsel %vm319_vm0, %v4092_v52, %v9576_v63  ;;  %v4202_v15 = vrot.slane %v4163_v54, 4  ;;  %v12427_v52 = vld [vmem:[#allocation23_spill] sm:$0xff]  ;;  %v9642_v29 = vsel %vm319_vm0, %v4075_v50, %v4090_v61 }
 0x5c5   : > { %12425 = vst [vmem:[#allocation29_spill] sm:$0xff] %v9585_v39  ;;  %v9618_v34 = vsel %vm319_vm0, %v4144_v28, %v12427_v52  ;;  %v5046_v28 = vld [vmem:[#allocation4 + $0xaa] sm:$0xff] }
 0x5c6   : > { %12431 = vst [vmem:[#allocation34_spill] sm:$0xff] %v9642_v29  ;;  %v5084_v61 = vrot.slane %v5046_v28, 4 }
 0x5cb   : > { %6542 = vrot.lane.b32.xlu1 %v9188_v41, %s7043_s13  ;;  %6532 = vrot.lane.b32.xlu0 %v6531_v18, %s7042_s12  ;;  %v9609_v41 = vsel %vm319_vm0, %v4032_v55, %v9226_v23  ;;  %v12429_v23 = vld [vmem:[#allocation27_spill] sm:$0xff]  ;;  %v9639_v55 = vsel %vm319_vm0, %v4056_v7, %v9464_v6 }
 0x5cc   : > { %6547 = vrot.lane.b32.xlu2 %v9301_v24, %s7043_s13  ;;  %v4181_v24 = vsel %vm319_vm0, %v4180_v51, %v9447_v40  ;;  %v9625_v59 = vsel %vm319_vm0, %v4168_v58, %v12429_v23  ;;  %v9650_v58 = vld [vmem:[#allocation4 + $0x2] sm:$0xff]  ;;  %v4088_v23 = vrot.slane %v4075_v50, 4 }
 0x5cd   : > { %v4187_v45 = vperm.slane %v4181_v24, %v12408_v42  ;;  %v5350_v24 = vld [vmem:[#allocation4 + $0x4a] sm:$0xff]  ;;  %v9653_v7 = vld [vmem:[#allocation4 + $0x62] sm:$0xff]  ;;  %v5050_v63 = vrot.slane %v9650_v58, 4 }
 0x5ce   : > { %v9669_v17 = vsel %vm319_vm0, %v4088_v23, %v4051_v47  ;;  %v9683_v47 = vsel %vm319_vm0, %v9562_v20, %v4094_v9 }
 0x5cf   : > { %v9621_v40 = vsel %vm319_vm0, %v4187_v45, %v4202_v15  ;;  %v9648_v15 = vld [vmem:[#allocation4 + $0x3a] sm:$0xff]  ;;  %12433 = vst [vmem:[#allocation15_spill] sm:$0xff] %v9669_v17 }
 0x5d0   : > { %12428 = vst [vmem:[#allocation18_spill] sm:$0xff] %v9621_v40  ;;  %v5160_v11 = vrot.slane %v9648_v15, 4 }
 0x5d1   : > { %12435 = vst [vmem:[#allocation35_spill] sm:$0xff] %v9683_v47  ;;  %v12437_v47 = vld [vmem:[#allocation25_spill] sm:$0xff] }
 0x5d3   : > { %6557 = vrot.lane.b32.xlu1 %v9288_v36, %s7043_s13  ;;  %6552 = vrot.lane.b32.xlu0 %v6516_v49, %s7043_s13  ;;  %v4200_v36 = vrot.slane %v4187_v45, 4  ;;  %v9646_v49 = vld [vmem:[#allocation4 + $0x52] sm:$0xff]  ;;  %v5072_v45 = vrot.slane %v5732_v44, 4 }
 0x5d4   : > { %6562 = vrot.lane.b32.xlu2 %v9318_v35, %s7043_s13  ;;  %v5724_v35 = vld [vmem:[#allocation4 + $0x32] sm:$0xff]  ;;  %v6586_v6 = vpack.i.bf16 %v9646_v49, %v5350_v24 }
 0x5d5   : > { %v5048_v52 = vrot.slane %v5724_v35, 4  ;;  %v9656_v1 = vsel %vm319_vm0, %v4200_v36, %v4163_v54  ;;  %v9662_v5 = vpack.i.bf16 %v9648_v15, %v5724_v35  ;;  %v5060_v54 = vrot.slane %v5350_v24, 4 }
 0x5d6   : > { %v9635_v51 = vpop.permute.xlu2 %6417  ;;  %12432 = vst [vmem:[#allocation16_spill] sm:$0xff] %v9656_v1  ;;  %v5062_v36 = vrot.slane %v5722_v4, 4  ;;  %v5073_v26 = vsel %vm319_vm0, %v5072_v45, %v9653_v7  ;;  %v6611_v1 = vpack.i.bf16 %v9678_v2, %v5730_v13  ;;  %v5085_v45 = vsel %vm319_vm0, %v5084_v61, %v5730_v13  ;;  %v9725_v13 = vld [vmem:[#allocation4 + $0xa] sm:$0xff] }
 0x5d7   : > { %12430 = vst [vmem:[#allocation19_spill] sm:$0xff] %v9635_v51  ;;  %v5049_v50 = vsel %vm319_vm0, %v5048_v52, %v9650_v58  ;;  %v5074_v52 = vrot.slane %v9653_v7, 4  ;;  %v5061_v29 = vsel %vm319_vm0, %v5060_v54, %v5722_v4  ;;  %v9715_v9 = vperm.slane %v5073_v26, %v12407_v16 }
 0x5d8   : > { %v9690_v23 = vperm.slane %v5049_v50, %v12407_v16  ;;  %v5063_v20 = vsel %vm319_vm0, %v5350_v24, %v5062_v36  ;;  %v9704_v50 = vld [vmem:[#allocation4 + $0x9a] sm:$0xff]  ;;  %v5051_v24 = vsel %vm319_vm0, %v5724_v35, %v5050_v63  ;;  %v5087_v36 = vsel %vm319_vm0, %v5046_v28, %v5086_v8  ;;  %v12440_v63 = vld [vmem:[#allocation28_spill] sm:$0xff] }
 0x5d9   : > { %v5075_v17 = vsel %vm319_vm0, %v5732_v44, %v5074_v52  ;;  %v9719_v52 = vld [vmem:[#allocation4 + $0x6a] sm:$0xff]  ;;  %v5067_v8 = vperm.slane %v5061_v29, %v12407_v16  ;;  %v5161_v35 = vsel %vm319_vm0, %v5160_v11, %v9725_v13  ;;  %v5172_v28 = vrot.slane %v9646_v49, 4 }
 0x5da   : > { %v9728_v61 = vperm.slane %v5075_v17, %v12407_v16  ;;  %v5184_v17 = vrot.slane %v9704_v50, 4  ;;  %v9749_v26 = vperm.slane %v12440_v63, %v12408_v42  ;;  %v9765_v63 = vperm.slane %v9418_v14, %v12408_v42 }
 0x5db   : > { %6572 = vrot.lane.b32.xlu1 %v9551_v25, %s7043_s13  ;;  %6567 = vrot.lane.b32.xlu0 %v6531_v18, %s7043_s13  ;;  %v9687_v18 = vpack.i.bf16 %v9664_v38, %v5722_v4  ;;  %v9696_v25 = vsel %vm319_vm0, %v9535_v32, %v4206_v3  ;;  %v9709_v3 = vperm.slane %v5063_v20, %v12407_v16 }
 0x5dc   : > { %6587 = vrot.lane.b32.xlu2 %v6586_v6, %s7042_s12  ;;  %12436 = vst [vmem:[#allocation21_spill] sm:$0xff] %v9696_v25  ;;  %v9712_v32 = vpack.i.bf16 %v9704_v50, %v5732_v44  ;;  %v9723_v4 = vperm.slane %v12437_v47, %v12408_v42  ;;  %v9731_v44 = vperm.slane %v5087_v36, %v12407_v16  ;;  %v5098_v36 = vrot.slane %v9690_v23, 4 }
 0x5dd   : > { %v5108_v54 = vrot.slane %v9709_v3, 4  ;;  %v9745_v47 = vperm.slane %v9415_v53, %v12408_v42  ;;  %12441 = vst [vmem:[#allocation14_spill] sm:$0xff] %v9749_v26  ;;  %v9752_v20 = vperm.slane %v5051_v24, %v12407_v16  ;;  %v5122_v25 = vrot.slane %v9715_v9, 4  ;;  %v5047_v24 = vld [vmem:[#allocation4 + $0xb2] sm:$0xff] }
 0x5de   : > { %v9676_v21 = vpop.permute.xlu2 %6422  ;;  %12438 = vst [vmem:[#allocation17_spill] sm:$0xff] %v9723_v4  ;;  %v5132_v29 = vrot.slane %v9731_v44, 4  ;;  %v5185_v53 = vsel %vm319_vm0, %v5184_v17, %v9719_v52  ;;  %v5167_v40 = vperm.slane %v5161_v35, %v12407_v16  ;;  %v5091_v46 = vperm.slane %v5085_v45, %v12407_v16 }
 0x5df   : > { %12434 = vst [vmem:[#allocation22_spill] sm:$0xff] %v9676_v21  ;;  %v5109_v0 = vsel %vm319_vm0, %v5108_v54, %v9752_v20  ;;  %v3018_v14 = vrot.slane %v9723_v4, 4  ;;  %v3130_v39 = vrot.slane %v9749_v26, 4  ;;  %v5191_v54 = vperm.slane %v5185_v53, %v12407_v16 }
 0x5e0   : > { %12439 = vst [vmem:[#allocation20_spill] sm:$0xff] %v9745_v47  ;;  %v5133_v48 = vsel %vm319_vm0, %v5132_v29, %v9728_v61  ;;  %v5123_v33 = vsel %vm319_vm0, %v5091_v46, %v5122_v25  ;;  %v5196_v29 = vrot.slane %v5047_v24, 4  ;;  %v9784_v45 = vperm.slane %v5109_v0, %v12408_v42 }
 0x5e1   : > { %12443 = vst [vmem:[#allocation13_spill] sm:$0xff] %v9765_v63  ;;  %v9776_v17 = vperm.slane %v5133_v48, %v12408_v42  ;;  %v3019_v48 = vsel %vm319_vm0, %v9745_v47, %v3018_v14  ;;  %v5096_v25 = vrot.slane %v5067_v8, 4  ;;  %v5198_v47 = vrot.slane %v9678_v2, 4 }
 0x5e2   : > { %v5197_v0 = vsel %vm319_vm0, %v5196_v29, %v9678_v2  ;;  %v9814_v29 = vpack.i.bf16 %v9719_v52, %v9653_v7  ;;  %v9841_v2 = vperm.slane %v9609_v41, %v12408_v42  ;;  %v12264_v41 = vunpack.i.h.bf16 %v9635_v51 }
 0x5e3   : > { %6582 = vrot.lane.b32.xlu1 %v9712_v32, %s7043_s13  ;;  %6577 = vrot.lane.b32.xlu0 %v6586_v6, %s7043_s13  ;;  %v5173_v6 = vsel %vm319_vm0, %v5172_v28, %v9664_v38  ;;  %v5099_v28 = vsel %vm319_vm0, %v5067_v8, %v5098_v36  ;;  %v5152_v36 = vrot.slane %v9776_v17, 4  ;;  %v3131_v38 = vsel %vm319_vm0, %v9765_v63, %v3130_v39 }
 0x5e4   : > { %6612 = vrot.lane.b32.xlu2 %v6611_v1, %s7043_s13  ;;  %v5179_v35 = vperm.slane %v5173_v6, %v12407_v16  ;;  %v9792_v26 = vperm.slane %v5099_v28, %v12408_v42  ;;  %v5210_v6 = vrot.slane %v5167_v40, 4  ;;  %v5175_v39 = vsel %vm319_vm0, %v9646_v49, %v5174_v12  ;;  %12445 = vst [vmem:[#allocation23_spill] sm:$0xff] %v9841_v2 }
 0x5e5   : > { %v9801_v53 = vsel %vm319_vm0, %v5152_v36, %v9784_v45  ;;  %v9808_v28 = vperm.slane %v5123_v33, %v12408_v42  ;;  %v6646_v8 = vpack.i.bf16 %v3131_v38, %v3019_v48  ;;  %v9818_v36 = vpack.i.bf16 %v9725_v13, %v9650_v58 }
 0x5e6   : > { %v9755_v11 = vpop.permute.xlu2 %6427  ;;  %v5211_v12 = vsel %vm319_vm0, %v5179_v35, %v5210_v6  ;;  %v5150_v49 = vrot.slane %v9792_v26, 4  ;;  %v5203_v4 = vperm.slane %v5197_v0, %v12407_v16  ;;  %v5208_v33 = vrot.slane %v5179_v35, 4 }
 0x5e7   : > { %12442 = vst [vmem:[#allocation12_spill] sm:$0xff] %v9755_v11  ;;  %v9824_v63 = vperm.slane %v5175_v39, %v12407_v16  ;;  %v5097_v7 = vsel %vm319_vm0, %v5096_v25, %v9690_v23  ;;  %v5120_v48 = vrot.slane %v5091_v46, 4  ;;  %v5162_v38 = vrot.slane %v9725_v13, 4 }
 0x5e8   : > { %v9832_v58 = vsel %vm319_vm0, %v9808_v28, %v5150_v49  ;;  %v5186_v6 = vrot.slane %v9719_v52, 4  ;;  %v5219_v0 = vperm.slane %v5211_v12, %v12408_v42  ;;  %v9845_v46 = vperm.slane %v9618_v34, %v12408_v42 }
 0x5e9   : > { %v5121_v23 = vsel %vm319_vm0, %v5120_v48, %v9715_v9  ;;  %v5163_v52 = vsel %vm319_vm0, %v9648_v15, %v5162_v38  ;;  %v9852_v13 = vperm.slane %v5097_v7, %v12408_v42  ;;  %v5209_v25 = vsel %vm319_vm0, %v5208_v33, %v5167_v40 }
 0x5ea   : > { %12446 = vst [vmem:[#allocation27_spill] sm:$0xff] %v9845_v46  ;;  %v5220_v12 = vrot.slane %v9824_v63, 4  ;;  %v9863_v15 = vperm.slane %v9625_v59, %v12408_v42  ;;  %v5199_v9 = vsel %vm319_vm0, %v5047_v24, %v5198_v47  ;;  %v9870_v40 = vperm.slane %v9639_v55, %v12408_v42 }
 0x5eb   : > { %6597 = vrot.lane.b32.xlu1 %v9662_v5, %s7043_s13  ;;  %6592 = vrot.lane.b32.xlu0 %v9687_v18, %s7043_s13  ;;  %12447 = vst [vmem:[#allocation25_spill] sm:$0xff] %v9852_v13  ;;  %v5171_v49 = vperm.slane %v5163_v52, %v12407_v16  ;;  %v5262_v59 = vrot.slane %v5219_v0, 4  ;;  %v4082_v7 = vrot.slane %v9841_v2, 4  ;;  %v4194_v47 = vrot.slane %v9845_v46, 4 }
 0x5ec   : > { %6637 = vrot.lane.b32.xlu2 %v6611_v1, %s7042_s12  ;;  %v5234_v1 = vrot.slane %v5191_v54, 4  ;;  %12448 = vst [vmem:[#allocation28_spill] sm:$0xff] %v9863_v15  ;;  %v12266_v55 = vunpack.i.l.bf16 %v9635_v51  ;;  %v5146_v24 = vrot.slane %v9852_v13, 4  ;;  %v9887_v48 = vperm.slane %v5199_v9, %v12407_v16 }
 0x5ed   : > { %v9837_v39 = vpop.permute.xlu1 %6407  ;;  %12449 = vst [vmem:[#allocation36_spill] sm:$0xff] %v9870_v40  ;;  %v5187_v52 = vsel %vm319_vm0, %v9704_v50, %v5186_v6 }
 0x5ee   : > { %v9810_v14 = vpop.permute.xlu2 %6432  ;;  %v5235_v35 = vsel %vm319_vm0, %v5203_v4, %v5234_v1  ;;  %v5232_v1 = vrot.slane %v5203_v4, 4  ;;  %v9873_v4 = vperm.slane %v5121_v23, %v12408_v42  ;;  %v5148_v23 = vrot.slane %v9808_v28, 4 }
 0x5ef   : > { %12444 = vst [vmem:[#allocation24_spill] sm:$0xff] %v9810_v14  ;;  %v5243_v34 = vperm.slane %v5235_v35, %v12408_v42  ;;  %v9917_v50 = vperm.slane %v5187_v52, %v12407_v16 }
 0x5f0   : > { %12450 = vst [vmem:[#allocation37_spill] sm:$0xff] %v9873_v4  ;;  %v9913_v9 = vsel %vm319_vm0, %v9873_v4, %v5146_v24  ;;  %v9940_v52 = vsel %vm319_vm0, %v5148_v23, %v9792_v26  ;;  %v5222_v24 = vrot.slane %v5171_v49, 4  ;;  %v5110_v26 = vrot.slane %v9752_v20, 4 }
 0x5f1   : > { %v9891_v38 = vsel %vm319_vm0, %v5243_v34, %v5262_v59  ;;  %v9922_v59 = vrot.slane %v12266_v55, 4  ;;  %v12455_v55 = vpack.i.bf16 %v9452_v22, %v9441_v57 }
 0x5f3   : > { %6607 = vrot.lane.b32.xlu1 %v9814_v29, %s7043_s13  ;;  %6602 = vrot.lane.b32.xlu0 %v9712_v32, %s7042_s12  ;;  %v9882_v32 = vperm.slane %v5209_v25, %v12408_v42  ;;  %v9901_v25 = vrot.slane %v12264_v41, 4  ;;  %12454 = vst [vmem:[#allocation41_spill] sm:$0xff] %v9922_v59  ;;  %v5244_v41 = vrot.slane %v9887_v48, 4  ;;  %v12482_v59 = vld [vmem:[#allocation31_spill] sm:$0xff] }
 0x5f4   : > { %6647 = vrot.lane.b32.xlu2 %v6646_v8, %s7037_s10  ;;  %v5233_v8 = vsel %vm319_vm0, %v5232_v1, %v5191_v54  ;;  %v5221_v54 = vsel %vm319_vm0, %v5220_v12, %v5171_v49  ;;  %v9905_v1 = vsel %vm319_vm0, %v9870_v40, %v4082_v7  ;;  %v9909_v12 = vsel %vm319_vm0, %v9863_v15, %v4194_v47 }
 0x5f5   : > { %12451 = vst [vmem:[#allocation38_spill] sm:$0xff] %v9882_v32  ;;  %v9894_v35 = vperm.slane %v5233_v8, %v12408_v42  ;;  %v5258_v28 = vrot.slane %v9882_v32, 4  ;;  %v5260_v8 = vrot.slane %v5243_v34, 4  ;;  %v5227_v6 = vperm.slane %v5221_v54, %v12408_v42  ;;  %v9928_v13 = vpop.permute.xlu1 %6412  ;;  %v9955_v23 = vpop.permute.xlu0 %6437 }
 0x5f6   : > { %v9877_v33 = vpop.permute.xlu2 %6447  ;;  %12453 = vst [vmem:[#allocation40_spill] sm:$0xff] %v9901_v25  ;;  %v12267_v7 = vunpack.i.h.bf16 %v9676_v21  ;;  %v12268_v47 = vunpack.i.l.bf16 %v9676_v21  ;;  %v6409_v32 = vunpack.i.l.bf16 %v9837_v39  ;;  %v5134_v49 = vrot.slane %v9728_v61, 4 }
 0x5f7   : > { %12452 = vst [vmem:[#allocation39_spill] sm:$0xff] %v9894_v35  ;;  %v9936_v54 = vsel %vm319_vm0, %v9894_v35, %v5258_v28  ;;  %v5245_v28 = vsel %vm319_vm0, %v5244_v41, %v9917_v50  ;;  %v5266_v22 = vrot.slane %v5227_v6, 4  ;;  %v5154_v35 = vrot.slane %v9784_v45, 4 }
 0x5f8   : > { %v5251_v57 = vperm.slane %v5245_v28, %v12408_v42  ;;  %v9967_v34 = vrot.slane %v12268_v47, 4  ;;  %v6410_v47 = vunpack.i.h.bf16 %v9837_v39  ;;  %v6450_v4 = vunpack.i.h.bf16 %v9877_v33 }
 0x5f9   : > { %v6440_v20 = vunpack.i.h.bf16 %v9955_v23  ;;  %v10003_v61 = vsel %vm319_vm0, %v9776_v17, %v5154_v35  ;;  %v12463_v17 = vpack.i.bf16 %v9467_v19, %v9444_v62  ;;  %v5246_v62 = vrot.slane %v9917_v50, 4 }
 0x5fa   : > { %12457 = vst [vmem:[#allocation43_spill] sm:$0xff] %v9967_v34  ;;  %v3408_v35 = vrot.slane %v6450_v4, 4  ;;  %v12464_v19 = vunpack.i.h.bf16 %v9810_v14  ;;  %v12466_v40 = vunpack.i.l.bf16 %v9810_v14  ;;  %v12469_v50 = vunpack.i.h.bf16 %v9928_v13 }
 0x5fb   : > { %6622 = vrot.lane.b32.xlu1 %v9662_v5, %s7042_s12  ;;  %6617 = vrot.lane.b32.xlu0 %v9687_v18, %s7042_s12  ;;  %v9958_v18 = vsel %vm319_vm0, %v5260_v8, %v5219_v0  ;;  %v5223_v0 = vsel %vm319_vm0, %v9824_v63, %v5222_v24  ;;  %v12458_v8 = vunpack.i.h.bf16 %v9755_v11  ;;  %v5264_v5 = vrot.slane %v5251_v57, 4 }
 0x5fc   : > { %6662 = vrot.lane.b32.xlu2 %v12455_v55, %s7035_s29  ;;  %v9963_v55 = vrot.slane %v12267_v7, 4  ;;  %v9980_v7 = vsel %vm319_vm0, %v5251_v57, %v5266_v22  ;;  %v12460_v63 = vunpack.i.l.bf16 %v9755_v11  ;;  %v9994_v57 = vperm.slane %v5223_v0, %v12408_v42 }
 0x5fd   : > { %v9977_v28 = vrot.slane %v12458_v8, 4  ;;  %v6449_v22 = vunpack.i.l.bf16 %v9877_v33  ;;  %v9999_v39 = vsel %vm319_vm0, %v5264_v5, %v5227_v6  ;;  %v5135_v33 = vsel %vm319_vm0, %v9731_v44, %v5134_v49 }
 0x5fe   : > { %12456 = vst [vmem:[#allocation42_spill] sm:$0xff] %v9963_v55  ;;  %v9969_v41 = vpop.permute.xlu2 %6462  ;;  %v9989_v24 = vrot.slane %v12460_v63, 4  ;;  %v6439_v63 = vunpack.i.l.bf16 %v9955_v23  ;;  %v3444_v8 = vrot.slane %v6410_v47, 4  ;;  %v3332_v6 = vrot.slane %v6409_v32, 4  ;;  %v6443_v23 = vpop.permute.xlu1 %6442 }
 0x5ff   : > { %12459 = vst [vmem:[#allocation44_spill] sm:$0xff] %v9977_v28  ;;  %v6465_v0 = vunpack.i.h.bf16 %v9969_v41  ;;  %v6464_v44 = vunpack.i.l.bf16 %v9969_v41  ;;  %v3410_v46 = vrot.slane %v6440_v20, 4  ;;  %v3296_v2 = vrot.slane %v6449_v22, 4 }
 0x600   : > { %12461 = vst [vmem:[#allocation45_spill] sm:$0xff] %v9989_v24  ;;  %v10034_v41 = vrot.slane %v12466_v40, 4  ;;  %v6445_v55 = vunpack.i.h.bf16 %v6443_v23  ;;  %v6444_v34 = vunpack.i.l.bf16 %v6443_v23  ;;  %v10043_v21 = vrot.slane %v12469_v50, 4 }
 0x601   : > { %12462 = vst [vmem:[#allocation46_spill] sm:$0xff] %v9994_v57  ;;  %v3334_v28 = vrot.slane %v6464_v44, 4  ;;  %v3411_v40 = vsel %vm319_vm0, %v6450_v4, %v3410_v46  ;;  %v3297_v23 = vsel %vm319_vm0, %v3296_v2, %v6439_v63  ;;  %v3445_v50 = vsel %vm319_vm0, %v3444_v8, %v6465_v0 }
 0x602   : > { %12467 = vst [vmem:[#allocation48_spill] sm:$0xff] %v10034_v41  ;;  %v3422_v46 = vrot.slane %v6445_v55, 4  ;;  %v3310_v4 = vrot.slane %v6444_v34, 4  ;;  %v3333_v2 = vsel %vm319_vm0, %v3332_v6, %v6464_v44 }
 0x603   : > { %6632 = vrot.lane.b32.xlu1 %v9814_v29, %s7042_s12  ;;  %6627 = vrot.lane.b32.xlu0 %v9818_v36, %s7043_s13  ;;  %v5111_v29 = vsel %vm319_vm0, %v9709_v3, %v5110_v26  ;;  %v3298_v3 = vrot.slane %v6439_v63, 4 }
 0x604   : > { %6677 = vrot.lane.b32.xlu2 %v12463_v17, %s7032_s20  ;;  %v10030_v17 = vrot.slane %v12464_v19, 4  ;;  %v10039_v45 = vperm.slane %v5111_v29, %v12408_v42  ;;  %v3409_v19 = vsel %vm319_vm0, %v3408_v35, %v6440_v20  ;;  %v5247_v29 = vsel %vm319_vm0, %v9887_v48, %v5246_v62 }
 0x605   : > { %v6453_v49 = vpop.permute.xlu0 %6452  ;;  %v3299_v41 = vsel %vm319_vm0, %v6449_v22, %v3298_v3  ;;  %v12471_v20 = vpack.i.bf16 %v9478_v10, %v9474_v37  ;;  %v10061_v35 = vperm.slane %v3409_v19, %v12407_v16  ;;  %v12472_v48 = vpack.i.bf16 %v9483_v27, %v9522_v60 }
 0x606   : > { %12465 = vst [vmem:[#allocation47_spill] sm:$0xff] %v10030_v17  ;;  %v6455_v26 = vunpack.i.h.bf16 %v6453_v49  ;;  %v6454_v15 = vunpack.i.l.bf16 %v6453_v49  ;;  %v10036_v5 = vpop.permute.xlu2 %6482  ;;  %v3446_v17 = vrot.slane %v6465_v0, 4  ;;  %v12470_v49 = vunpack.i.l.bf16 %v9928_v13 }
 0x607   : > { %12468 = vst [vmem:[#allocation49_spill] sm:$0xff] %v10039_v45  ;;  %v3335_v37 = vsel %vm319_vm0, %v6409_v32, %v3334_v28  ;;  %v10075_v22 = vperm.slane %v5135_v33, %v12408_v42  ;;  %v10078_v63 = vperm.slane %v5247_v29, %v12408_v42  ;;  %v10081_v0 = vperm.slane %v3411_v40, %v12407_v16 }
 0x608   : > { %v10048_v14 = vrot.slane %v12470_v49, 4  ;;  %v3420_v11 = vrot.slane %v6455_v26, 4  ;;  %v3308_v24 = vrot.slane %v6454_v15, 4  ;;  %v3447_v8 = vsel %vm319_vm0, %v6410_v47, %v3446_v17 }
 0x609   : > { %12473 = vst [vmem:[#allocation50_spill] sm:$0xff] %v10075_v22  ;;  %v3307_v27 = vperm.slane %v3299_v41, %v12407_v16  ;;  %v10086_v60 = vperm.slane %v3445_v50, %v12407_v16  ;;  %v3423_v47 = vsel %vm319_vm0, %v6455_v26, %v3422_v46  ;;  %v3311_v33 = vsel %vm319_vm0, %v6454_v15, %v3310_v4 }
 0x60a   : > { %12474 = vst [vmem:[#allocation51_spill] sm:$0xff] %v10078_v63  ;;  %v3421_v32 = vsel %vm319_vm0, %v3420_v11, %v6445_v55  ;;  %v3309_v28 = vsel %vm319_vm0, %v3308_v24, %v6444_v34  ;;  %v10094_v44 = vperm.slane %v3447_v8, %v12407_v16  ;;  %v10097_v62 = vperm.slane %v3333_v2, %v12407_v16  ;;  %v12478_v8 = vld [vmem:[#allocation29_spill] sm:$0xff] }
 0x60b   : > { %6657 = vrot.lane.b32.xlu1 %v12471_v20, %s7033_s26  ;;  %6642 = vrot.lane.b32.xlu0 %v9818_v36, %s7042_s12  ;;  %v3303_v36 = vperm.slane %v3297_v23, %v12407_v16  ;;  %v10100_v17 = vperm.slane %v3335_v37, %v12407_v16  ;;  %v12282_v3 = vunpack.i.h.bf16 %v10036_v5  ;;  %v12283_v11 = vunpack.i.l.bf16 %v10036_v5 }
 0x60c   : > { %6692 = vrot.lane.b32.xlu2 %v12472_v48, %s7033_s26  ;;  %v5156_v55 = vrot.slane %v10075_v22, 4  ;;  %v5268_v34 = vrot.slane %v10078_v63, 4  ;;  %v3427_v15 = vperm.slane %v3421_v32, %v12407_v16  ;;  %v10108_v24 = vperm.slane %v3423_v47, %v12407_v16  ;;  %v12477_v48 = vld [vmem:[#allocation32_spill] sm:$0xff]  ;;  %v12483_v22 = vld [vmem:[#allocation26_spill] sm:$0xff] }
 0x60d   : > { %v10072_v10 = vpop.permute.xlu1 %6457  ;;  %v3315_v26 = vperm.slane %v3309_v28, %v12407_v16  ;;  %v3319_v41 = vperm.slane %v3311_v33, %v12407_v16  ;;  %v3470_v49 = vrot.slane %v10081_v0, 4  ;;  %v3346_v40 = vrot.slane %v3303_v36, 4  ;;  %v12480_v32 = vld [vmem:[#allocation20_spill] sm:$0xff] }
 0x60e   : > { %v10112_v19 = vpop.permute.xlu2 %6497  ;;  %v3358_v23 = vrot.slane %v3307_v27, 4  ;;  %v3480_v29 = vrot.slane %v10086_v60, 4  ;;  %v12475_v50 = vpack.i.bf16 %v9499_v30, %v9487_v31  ;;  %v3368_v46 = vrot.slane %v10097_v62, 4 }
 0x60f   : > { %v12476_v2 = vpack.i.bf16 %v9516_v56, %v9508_v43  ;;  %v12479_v37 = vpack.i.bf16 %v12477_v48, %v12478_v8  ;;  %v10134_v31 = vrot.slane %v12282_v3, 4  ;;  %v10138_v30 = vrot.slane %v12283_v11, 4 }
 0x610   : > { %v10144_v43 = vsel %vm319_vm0, %v5156_v55, %v10039_v45  ;;  %v10148_v56 = vsel %vm319_vm0, %v5268_v34, %v9994_v57  ;;  %v3456_v33 = vrot.slane %v3427_v15, 4  ;;  %v3356_v48 = vrot.slane %v3319_v41, 4  ;;  %v12481_v57 = vld [vmem:[#allocation13_spill] sm:$0xff] }
 0x611   : > { %v6459_v3 = vunpack.i.l.bf16 %v10072_v10  ;;  %v3359_v20 = vsel %vm319_vm0, %v3319_v41, %v3358_v23  ;;  %v3471_v55 = vsel %vm319_vm0, %v10108_v24, %v3470_v49  ;;  %v6500_v34 = vunpack.i.h.bf16 %v10112_v19 }
 0x612   : > { %v6499_v4 = vunpack.i.l.bf16 %v10112_v19  ;;  %v3357_v41 = vsel %vm319_vm0, %v3356_v48, %v3307_v27  ;;  %v12484_v25 = vpack.i.bf16 %v12482_v59, %v12483_v22  ;;  %v12488_v59 = vpack.i.bf16 %v9891_v38, %v9832_v58 }
 0x613   : > { %6672 = vrot.lane.b32.xlu1 %v12475_v50, %s7034_s28  ;;  %6652 = vrot.lane.b32.xlu0 %v12476_v2, %s7036_s9  ;;  %v3468_v50 = vrot.slane %v10108_v24, 4  ;;  %v3344_v2 = vrot.slane %v3315_v26, 4  ;;  %v3457_v24 = vsel %vm319_vm0, %v3456_v33, %v10061_v35  ;;  %v3322_v23 = vrot.slane %v6459_v3, 4  ;;  %v12485_v33 = vld [vmem:[#allocation33_spill] sm:$0xff] }
 0x614   : > { %6707 = vrot.lane.b32.xlu2 %v12479_v37, %s7034_s28  ;;  %v6460_v37 = vunpack.i.h.bf16 %v10072_v10  ;;  %v3822_v45 = vrot.slane %v6500_v34, 4  ;;  %v10192_v22 = vperm.slane %v3359_v20, %v12408_v42 }
 0x615   : > { %v10140_v28 = vpop.permute.xlu1 %6477  ;;  %v6468_v8 = vpop.permute.xlu0 %6467  ;;  %v3345_v10 = vsel %vm319_vm0, %v3344_v2, %v3303_v36  ;;  %v3710_v36 = vrot.slane %v6499_v4, 4 }
 0x616   : > { %v6470_v11 = vunpack.i.h.bf16 %v6468_v8  ;;  %v6469_v47 = vunpack.i.l.bf16 %v6468_v8  ;;  %v3347_v8 = vsel %vm319_vm0, %v3315_v26, %v3346_v40  ;;  %v3434_v49 = vrot.slane %v6460_v37, 4  ;;  %v10178_v40 = vpop.permute.xlu2 %6512 }
 0x617   : > { %v10208_v20 = vperm.slane %v3345_v10, %v12408_v42 }
 0x618   : > { %v3432_v6 = vrot.slane %v6470_v11, 4  ;;  %v3320_v63 = vrot.slane %v6469_v47, 4 }
 0x619   : > { %12490 = vst [vmem:[#allocation32_spill] sm:$0xff] %v10208_v20 }
 0x61a   : > { %v3433_v19 = vsel %vm319_vm0, %v3432_v6, %v6460_v37  ;;  %v3321_v51 = vsel %vm319_vm0, %v3320_v63, %v6459_v3  ;;  %v12486_v6 = vld [vmem:[#allocation30_spill] sm:$0xff]  ;;  %v3323_v63 = vsel %vm319_vm0, %v6469_v47, %v3322_v23  ;;  %v12489_v3 = vrot.slane %v10061_v35, 4 }
 0x61b   : > { %6687 = vrot.lane.b32.xlu1 %v12484_v25, %s7036_s9  ;;  %v10173_v26 = vperm.slane %v3433_v19, %v12407_v16  ;;  %v10176_v27 = vperm.slane %v3321_v51, %v12407_v16  ;;  %v12487_v2 = vpack.i.bf16 %v12485_v33, %v12486_v6  ;;  %v10189_v25 = vperm.slane %v3347_v8, %v12408_v42  ;;  %v12498_v33 = vld [vmem:[#allocation18_spill] sm:$0xff] }
 0x61c   : > { %6727 = vrot.lane.b32.xlu2 %v12488_v59, %s7033_s26  ;;  %v3435_v51 = vsel %vm319_vm0, %v6470_v11, %v3434_v49  ;;  %v3459_v48 = vsel %vm319_vm0, %v3427_v15, %v12489_v3  ;;  %v3469_v11 = vsel %vm319_vm0, %v3468_v50, %v10081_v0  ;;  %v3821_v35 = vsel %vm319_vm0, %v10043_v21, %v6500_v34  ;;  %v12499_v6 = vld [vmem:[#allocation34_spill] sm:$0xff] }
 0x61d   : > { %6667 = vrot.lane.b32.xlu0 %v12487_v2, %s7031_s19  ;;  %v3369_v37 = vsel %vm319_vm0, %v3368_v46, %v10176_v27  ;;  %v3481_v58 = vsel %vm319_vm0, %v3480_v29, %v10173_v26  ;;  %v10203_v38 = vpop.permute.xlu1 %6492  ;;  %v10205_v8 = vpop.permute.xlu0 %6472  ;;  %v3709_v15 = vsel %vm319_vm0, %v10048_v14, %v6499_v4  ;;  %v10217_v46 = vperm.slane %v3457_v24, %v12408_v42 }
 0x61e   : > { %v12492_v29 = vunpack.i.h.bf16 %v9928_v13  ;;  %v12493_v49 = vunpack.i.l.bf16 %v9928_v13  ;;  %v10226_v23 = vperm.slane %v3435_v51, %v12407_v16  ;;  %v3331_v0 = vperm.slane %v3323_v63, %v12407_v16 }
 0x61f   : > { %12491 = vst [vmem:[#allocation29_spill] sm:$0xff] %v10217_v46  ;;  %v10230_v21 = vperm.slane %v3459_v48, %v12408_v42  ;;  %v10233_v14 = vperm.slane %v3471_v55, %v12408_v42  ;;  %v10236_v4 = vperm.slane %v3369_v37, %v12408_v42  ;;  %v10242_v13 = vperm.slane %v3821_v35, %v12407_v16 }
 0x620   : > { %v3823_v47 = vsel %vm319_vm0, %v12492_v29, %v3822_v45  ;;  %v3711_v10 = vsel %vm319_vm0, %v12493_v49, %v3710_v36  ;;  %v10239_v45 = vperm.slane %v3481_v58, %v12408_v42  ;;  %v3394_v50 = vrot.slane %v10208_v20, 4  ;;  %v12504_v29 = vld [vmem:[#allocation17_spill] sm:$0xff] }
 0x621   : > { %12494 = vst [vmem:[#allocation20_spill] sm:$0xff] %v10236_v4  ;;  %v10246_v34 = vperm.slane %v3357_v41, %v12408_v42  ;;  %v10249_v24 = vperm.slane %v3469_v11, %v12408_v42  ;;  %v10252_v55 = vperm.slane %v3823_v47, %v12407_v16  ;;  %v10255_v19 = vperm.slane %v3709_v15, %v12407_v16 }
 0x622   : > { %12495 = vst [vmem:[#allocation13_spill] sm:$0xff] %v10239_v45  ;;  %v10258_v36 = vperm.slane %v3711_v10, %v12407_v16  ;;  %v12500_v2 = vpack.i.bf16 %v12498_v33, %v12499_v6  ;;  %v3506_v41 = vrot.slane %v10217_v46, 4  ;;  %v12291_v59 = vunpack.i.h.bf16 %v10140_v28 }
 0x623   : > { %12496 = vst [vmem:[#allocation31_spill] sm:$0xff] %v10246_v34  ;;  %v12501_v51 = vrot.slane %v10100_v17, 4  ;;  %v12502_v3 = vrot.slane %v10094_v44, 4  ;;  %v12503_v37 = vpack.i.bf16 %v9909_v12, %v9905_v1  ;;  %v3395_v58 = vsel %vm319_vm0, %v10236_v4, %v3394_v50  ;;  %v10292_v50 = vpop.permute.xlu2 %6527 }
 0x624   : > { %12497 = vst [vmem:[#allocation26_spill] sm:$0xff] %v10249_v24  ;;  %6702 = vrot.lane.b32.xlu1 %v12500_v2, %s7031_s19  ;;  %v6479_v11 = vunpack.i.l.bf16 %v10140_v28  ;;  %v12290_v35 = vunpack.i.h.bf16 %v10178_v40  ;;  %v3507_v15 = vsel %vm319_vm0, %v10239_v45, %v3506_v41  ;;  %v12505_v47 = vrot.slane %v12480_v32, 4 }
 0x625   : > { %v3381_v63 = vsel %vm319_vm0, %v12501_v51, %v3331_v0  ;;  %v3493_v48 = vsel %vm319_vm0, %v12502_v3, %v10226_v23  ;;  %6682 = vrot.lane.b32.xlu0 %v12503_v37, %s7037_s10  ;;  %v12293_v1 = vunpack.i.l.bf16 %v10178_v40  ;;  %v6474_v12 = vunpack.i.l.bf16 %v10205_v8  ;;  %v6488_v6 = vpop.permute.xlu0 %6487  ;;  %v12509_v51 = vld [vmem:[#allocation14_spill] sm:$0xff] }
 0x626   : > { %v10287_v49 = vsel %vm319_vm0, %v12505_v47, %v12504_v29  ;;  %v6746_v33 = vpack.i.bf16 %v3507_v15, %v3395_v58  ;;  %v10295_v2 = vperm.slane %v3381_v63, %v12408_v42  ;;  %v10298_v41 = vperm.slane %v3493_v48, %v12408_v42  ;;  %v10313_v48 = vpop.permute.xlu1 %6507  ;;  %v12513_v47 = vld [vmem:[#allocation16_spill] sm:$0xff] }
 0x627   : > { %12506 = vst [vmem:[#allocation33_spill] sm:$0xff] %v10287_v49  ;;  %v6475_v32 = vunpack.i.h.bf16 %v10205_v8  ;;  %v12510_v3 = vrot.slane %v12481_v57, 4  ;;  %v3798_v63 = vrot.slane %v12291_v59, 4  ;;  %v3686_v8 = vrot.slane %v6479_v11, 4 }
 0x628   : > { %12507 = vst [vmem:[#allocation30_spill] sm:$0xff] %v10295_v2  ;;  %6747 = vrot.lane.b32.xlu2 %v6746_v33, %s7037_s10  ;;  %v3382_v15 = vrot.slane %v3331_v0, 4  ;;  %v10317_v57 = vrot.slane %v12290_v35, 4  ;;  %v10322_v10 = vrot.slane %v12293_v1, 4  ;;  %v3674_v58 = vrot.slane %v6474_v12, 4 }
 0x629   : > { %12508 = vst [vmem:[#allocation18_spill] sm:$0xff] %v10298_v41  ;;  %v10305_v37 = vsel %vm319_vm0, %v12510_v3, %v12509_v51  ;;  %v6489_v51 = vunpack.i.l.bf16 %v6488_v6  ;;  %v3494_v3 = vrot.slane %v10226_v23, 4  ;;  %v3786_v29 = vrot.slane %v6475_v32, 4 }
 0x62a   : > { %12511 = vst [vmem:[#allocation34_spill] sm:$0xff] %v10305_v37  ;;  %v6490_v33 = vunpack.i.h.bf16 %v6488_v6  ;;  %v12512_v0 = vpack.i.bf16 %v9936_v54, %v9913_v9  ;;  %v3400_v35 = vrot.slane %v10295_v2, 4  ;;  %v3512_v59 = vrot.slane %v10298_v41, 4  ;;  %v12514_v6 = vld [vmem:[#allocation15_spill] sm:$0xff] }
 0x62b   : > { %v12515_v45 = vpack.i.bf16 %v12513_v47, %v12514_v6  ;;  %v3383_v9 = vsel %vm319_vm0, %v10100_v17, %v3382_v15  ;;  %v3673_v54 = vsel %vm319_vm0, %v10138_v30, %v6474_v12  ;;  %v3684_v23 = vrot.slane %v6489_v51, 4 }
 0x62c   : > { %6717 = vrot.lane.b32.xlu1 %v12512_v0, %s7037_s10  ;;  %v12296_v0 = vunpack.i.h.bf16 %v10292_v50  ;;  %v12516_v20 = vunpack.i.l.bf16 %v10036_v5  ;;  %v3785_v46 = vsel %vm319_vm0, %v10134_v31, %v6475_v32  ;;  %v3401_v47 = vsel %vm319_vm0, %v3400_v35, %v10246_v34 }
 0x62d   : > { %6697 = vrot.lane.b32.xlu0 %v12515_v45, %s7035_s29  ;;  %v3513_v45 = vsel %vm319_vm0, %v3512_v59, %v10249_v24  ;;  %v3495_v17 = vsel %vm319_vm0, %v10094_v44, %v3494_v3  ;;  %v12517_v30 = vunpack.i.h.bf16 %v10036_v5  ;;  %v3796_v15 = vrot.slane %v6490_v33, 4  ;;  %v10369_v44 = vpop.permute.xlu2 %6547  ;;  %v10376_v3 = vpop.permute.xlu0 %6502 }
 0x62e   : > { %v3675_v1 = vsel %vm319_vm0, %v12516_v20, %v3674_v58  ;;  %v3687_v6 = vsel %vm319_vm0, %v6489_v51, %v3686_v8  ;;  %v12518_v20 = vunpack.i.h.bf16 %v10203_v38  ;;  %v12519_v31 = vunpack.i.l.bf16 %v10203_v38  ;;  %12520 = vst [vmem:[#allocation17_spill] sm:$0xff] %v10369_v44  ;;  %v6523_v59 = vpop.permute.xlu1 %6522 }
 0x62f   : > { %v3787_v12 = vsel %vm319_vm0, %v12517_v30, %v3786_v29  ;;  %v10366_v35 = vperm.slane %v3673_v54, %v12407_v16  ;;  %v3683_v5 = vperm.slane %v3675_v1, %v12407_v16  ;;  %v10373_v29 = vperm.slane %v3785_v46, %v12407_v16 }
 0x630   : > { %v3810_v58 = vrot.slane %v12518_v20, 4  ;;  %v10363_v32 = vrot.slane %v12519_v31, 4  ;;  %v3685_v8 = vsel %vm319_vm0, %v3684_v23, %v6479_v11  ;;  %v6761_v51 = vpack.i.bf16 %v3513_v45, %v3401_v47 }
 0x631   : > { %v3795_v30 = vperm.slane %v3787_v12, %v12407_v16  ;;  %v10381_v54 = vrot.slane %v12296_v0, 4  ;;  %v3799_v20 = vsel %vm319_vm0, %v6490_v33, %v3798_v63  ;;  %v3695_v31 = vperm.slane %v3687_v6, %v12407_v16 }
 0x632   : > { %v12521_v11 = vunpack.i.h.bf16 %v10140_v28  ;;  %6762 = vrot.lane.b32.xlu2 %v6761_v51, %s7035_s29  ;;  %v12522_v45 = vpack.i.bf16 %v9958_v18, %v9940_v52  ;;  %v3722_v63 = vrot.slane %v10366_v35, 4  ;;  %v12523_v33 = vunpack.i.l.bf16 %v10292_v50 }
 0x633   : > { %v3691_v6 = vperm.slane %v3685_v8, %v12407_v16  ;;  %v3734_v51 = vrot.slane %v3683_v5, 4  ;;  %v3834_v47 = vrot.slane %v10373_v29, 4  ;;  %v3807_v52 = vperm.slane %v3799_v20, %v12407_v16 }
 0x634   : > { %v3797_v23 = vsel %vm319_vm0, %v3796_v15, %v12521_v11  ;;  %6722 = vrot.lane.b32.xlu1 %v12522_v45, %s7036_s9  ;;  %v10399_v12 = vrot.slane %v12523_v33, 4  ;;  %v12524_v15 = vld [vmem:[#allocation21_spill] sm:$0xff]  ;;  %v12525_v11 = vld [vmem:[#allocation35_spill] sm:$0xff]  ;;  %v6524_v18 = vunpack.i.l.bf16 %v6523_v59  ;;  %v3846_v45 = vrot.slane %v3795_v30, 4 }
 0x635   : > { %v12526_v0 = vpack.i.bf16 %v12524_v15, %v12525_v11  ;;  %v3803_v46 = vperm.slane %v3797_v23, %v12407_v16  ;;  %v3732_v33 = vrot.slane %v3695_v31, 4  ;;  %v6525_v1 = vunpack.i.h.bf16 %v6523_v59 }
 0x636   : > { %v12527_v8 = vunpack.i.h.bf16 %v10313_v48  ;;  %v12528_v28 = vunpack.i.l.bf16 %v10313_v48  ;;  %v6505_v20 = vunpack.i.h.bf16 %v10376_v3  ;;  %v3723_v11 = vsel %vm319_vm0, %v3691_v6, %v3722_v63 }
 0x637   : > { %6712 = vrot.lane.b32.xlu0 %v12526_v0, %s7032_s20  ;;  %v12529_v0 = vunpack.i.h.bf16 %v10369_v44  ;;  %v12531_v23 = vunpack.i.l.bf16 %v10369_v44  ;;  %v6504_v59 = vunpack.i.l.bf16 %v10376_v3  ;;  %v3844_v41 = vrot.slane %v3807_v52, 4  ;;  %v10443_v44 = vpop.permute.xlu0 %6517 }
 0x638   : > { %v10412_v4 = vrot.slane %v12527_v8, 4  ;;  %v10416_v49 = vrot.slane %v12528_v28, 4  ;;  %v10430_v8 = vperm.slane %v3383_v9, %v12408_v42  ;;  %v3735_v28 = vsel %vm319_vm0, %v3695_v31, %v3734_v51 }
 0x639   : > { %v10420_v15 = vrot.slane %v12529_v0, 4  ;;  %v10426_v37 = vrot.slane %v12531_v23, 4  ;;  %v3847_v2 = vsel %vm319_vm0, %v3807_v52, %v3846_v45  ;;  %v4372_v0 = vrot.slane %v6524_v18, 4 }
 0x63a   : > { %v3832_v24 = vrot.slane %v3803_v46, 4  ;;  %v3720_v34 = vrot.slane %v3691_v6, 4  ;;  %v4484_v63 = vrot.slane %v6525_v1, 4  ;;  %v10438_v23 = vperm.slane %v3723_v11, %v12408_v42 }
 0x63b   : > { %12530 = vst [vmem:[#allocation14_spill] sm:$0xff] %v10420_v15  ;;  %v10435_v15 = vsel %vm319_vm0, %v3732_v33, %v3683_v5  ;;  %v4375_v3 = vsel %vm319_vm0, %v6524_v18, %v10322_v10  ;;  %v3808_v9 = vrot.slane %v6505_v20, 4  ;;  %v3696_v31 = vrot.slane %v6504_v59, 4 }
 0x63c   : > { %12532 = vst [vmem:[#allocation16_spill] sm:$0xff] %v10426_v37  ;;  %v3811_v37 = vsel %vm319_vm0, %v6505_v20, %v3810_v58  ;;  %v12533_v51 = vrot.slane %v10192_v22, 4  ;;  %v10450_v5 = vperm.slane %v3495_v17, %v12408_v42  ;;  %v3518_v52 = vrot.slane %v10233_v14, 4 }
 0x63d   : > { %v12534_v10 = vpack.i.bf16 %v9999_v39, %v9801_v53  ;;  %v10458_v58 = vperm.slane %v3735_v28, %v12408_v42  ;;  %v3835_v18 = vsel %vm319_vm0, %v3803_v46, %v3834_v47  ;;  %v12535_v45 = vunpack.i.l.bf16 %v10178_v40  ;;  %v6538_v46 = vpop.permute.xlu1 %6537 }
 0x63e   : > { %v3407_v6 = vsel %vm319_vm0, %v10430_v8, %v12533_v51  ;;  %v4487_v17 = vsel %vm319_vm0, %v6525_v1, %v10317_v57  ;;  %v10467_v20 = vsel %vm319_vm0, %v3844_v41, %v3795_v30  ;;  %v12536_v11 = vunpack.i.h.bf16 %v10178_v40  ;;  %v10483_v30 = vpop.permute.xlu2 %6562 }
 0x63f   : > { %6732 = vrot.lane.b32.xlu0 %v12534_v10, %s7035_s29  ;;  %v4373_v33 = vsel %vm319_vm0, %v4372_v0, %v12535_v45  ;;  %v3819_v39 = vperm.slane %v3811_v37, %v12407_v16  ;;  %v3519_v28 = vsel %vm319_vm0, %v10450_v5, %v3518_v52  ;;  %v3721_v47 = vsel %vm319_vm0, %v3720_v34, %v10366_v35 }
 0x640   : > { %v4485_v53 = vsel %vm319_vm0, %v4484_v63, %v12536_v11  ;;  %v10478_v0 = vperm.slane %v4375_v3, %v12407_v16  ;;  %v12537_v57 = vunpack.i.h.bf16 %v10203_v38  ;;  %v6776_v40 = vpack.i.bf16 %v3519_v28, %v3407_v6 }
 0x641   : > { %v10486_v1 = vperm.slane %v4373_v33, %v12407_v16  ;;  %v10489_v37 = vperm.slane %v4487_v17, %v12407_v16  ;;  %v12538_v63 = vunpack.i.l.bf16 %v10203_v38  ;;  %v3699_v35 = vsel %vm319_vm0, %v6504_v59, %v10363_v32 }
 0x642   : > { %v3809_v41 = vsel %vm319_vm0, %v3808_v9, %v12537_v57  ;;  %v3833_v3 = vsel %vm319_vm0, %v3832_v24, %v10373_v29  ;;  %v10499_v9 = vperm.slane %v4485_v53, %v12407_v16  ;;  %6777 = vrot.lane.b32.xlu2 %v6776_v40, %s7032_s20  ;;  %v6539_v51 = vunpack.i.l.bf16 %v6538_v46 }
 0x643   : > { %v3697_v34 = vsel %vm319_vm0, %v3696_v31, %v12538_v63  ;;  %v6520_v6 = vunpack.i.h.bf16 %v10443_v44  ;;  %v10504_v52 = vperm.slane %v3835_v18, %v12408_v42  ;;  %v10507_v38 = vperm.slane %v3809_v41, %v12407_v16  ;;  %v10529_v41 = vpop.permute.xlu0 %6532 }
 0x644   : > { %v3870_v31 = vrot.slane %v3819_v39, 4  ;;  %v12304_v32 = vunpack.i.h.bf16 %v10483_v30  ;;  %v10511_v59 = vperm.slane %v3847_v2, %v12408_v42  ;;  %v10514_v24 = vperm.slane %v3697_v34, %v12407_v16 }
 0x645   : > { %v10517_v29 = vperm.slane %v3699_v35, %v12407_v16  ;;  %v12305_v10 = vunpack.i.l.bf16 %v10483_v30  ;;  %v6540_v17 = vunpack.i.h.bf16 %v6538_v46  ;;  %v12539_v2 = vpack.i.bf16 %v9980_v7, %v10003_v61 }
 0x646   : > { %v4520_v11 = vrot.slane %v10499_v9, 4  ;;  %v4384_v53 = vrot.slane %v6539_v51, 4  ;;  %v4472_v28 = vrot.slane %v6520_v6, 4  ;;  %v6519_v57 = vunpack.i.l.bf16 %v10443_v44 }
 0x647   : > { %6737 = vrot.lane.b32.xlu0 %v12539_v2, %s7031_s19  ;;  %v12540_v63 = vrot.slane %v10252_v55, 4  ;;  %v10537_v46 = vsel %vm319_vm0, %v10252_v55, %v3870_v31  ;;  %v10541_v7 = vrot.slane %v12304_v32, 4  ;;  %v12541_v61 = vrot.slane %v10255_v19, 4 }
 0x648   : > { %v12542_v2 = vrot.slane %v10258_v36, 4  ;;  %v12543_v55 = vrot.slane %v10242_v13, 4  ;;  %v4387_v32 = vsel %vm319_vm0, %v6539_v51, %v10399_v12  ;;  %v4499_v40 = vsel %vm319_vm0, %v6540_v17, %v10381_v54 }
 0x649   : > { %v3869_v34 = vsel %vm319_vm0, %v12540_v63, %v3819_v39  ;;  %v3745_v44 = vsel %vm319_vm0, %v12541_v61, %v10514_v24  ;;  %v4496_v63 = vrot.slane %v6540_v17, 4  ;;  %v4475_v61 = vsel %vm319_vm0, %v6520_v6, %v10412_v4 }
 0x64a   : > { %v3757_v39 = vsel %vm319_vm0, %v12542_v2, %v10517_v29  ;;  %v3857_v31 = vsel %vm319_vm0, %v12543_v55, %v10507_v38  ;;  %v12544_v35 = vunpack.i.l.bf16 %v10292_v50  ;;  %v12545_v2 = vunpack.i.h.bf16 %v10313_v48 }
 0x64b   : > { %v4360_v33 = vrot.slane %v6519_v57, 4  ;;  %v12546_v55 = vrot.slane %v10176_v27, 4  ;;  %v3398_v54 = vrot.slane %v10189_v25, 4  ;;  %v12547_v4 = vrot.slane %v10173_v26, 4 }
 0x64c   : > { %v4385_v45 = vsel %vm319_vm0, %v4384_v53, %v12544_v35  ;;  %v4473_v18 = vsel %vm319_vm0, %v4472_v28, %v12545_v2  ;;  %v3510_v17 = vrot.slane %v10230_v21, 4  ;;  %v10585_v27 = vperm.slane %v3721_v47, %v12408_v42 }
 0x64d   : > { %v3371_v12 = vsel %vm319_vm0, %v10097_v62, %v12546_v55  ;;  %v3483_v6 = vsel %vm319_vm0, %v10086_v60, %v12547_v4  ;;  %v10588_v62 = vperm.slane %v3745_v44, %v12408_v42  ;;  %v10591_v28 = vperm.slane %v3833_v3, %v12408_v42 }
 0x64e   : > { %v10573_v51 = vperm.slane %v3371_v12, %v12408_v42  ;;  %v10582_v53 = vperm.slane %v3483_v6, %v12408_v42  ;;  %12548 = vst [vmem:[#allocation15_spill] sm:$0xff] %v10585_v27  ;;  %v12551_v35 = vunpack.i.h.bf16 %v10292_v50  ;;  %v4483_v60 = vperm.slane %v4475_v61, %v12407_v16  ;;  %v10627_v6 = vpop.permute.xlu1 %6542 }
 0x64f   : > { %12549 = vst [vmem:[#allocation21_spill] sm:$0xff] %v10588_v62  ;;  %v10600_v55 = vperm.slane %v3857_v31, %v12408_v42  ;;  %v12553_v47 = vpack.i.bf16 %v10148_v56, %v10144_v43  ;;  %v4479_v3 = vperm.slane %v4473_v18, %v12407_v16  ;;  %v3770_v44 = vrot.slane %v10585_v27, 4  ;;  %v12567_v27 = vld [vmem:[#allocation41_spill] sm:$0xff] }
 0x650   : > { %12550 = vst [vmem:[#allocation35_spill] sm:$0xff] %v10591_v28  ;;  %v4497_v26 = vsel %vm319_vm0, %v4496_v63, %v12551_v35  ;;  %v3399_v2 = vsel %vm319_vm0, %v10573_v51, %v3398_v54  ;;  %v3511_v50 = vsel %vm319_vm0, %v10582_v53, %v3510_v17  ;;  %v3882_v63 = vrot.slane %v10591_v28, 4 }
 0x651   : > { %12552 = vst [vmem:[#allocation52_spill] sm:$0xff] %v10600_v55  ;;  %6742 = vrot.lane.b32.xlu0 %v12553_v47, %s7034_s28  ;;  %v3758_v61 = vrot.slane %v10517_v29, 4  ;;  %v12554_v12 = vunpack.i.l.bf16 %v10313_v48  ;;  %v4363_v54 = vsel %vm319_vm0, %v6519_v57, %v10416_v49  ;;  %v6756_v43 = vpack.i.bf16 %v3511_v50, %v3399_v2  ;;  %v10629_v48 = vpop.permute.xlu0 %6552 }
 0x652   : > { %v10618_v56 = vperm.slane %v3869_v34, %v12408_v42  ;;  %v10621_v18 = vperm.slane %v4387_v32, %v12407_v16  ;;  %v3771_v4 = vsel %vm319_vm0, %v10588_v62, %v3770_v44  ;;  %v3883_v29 = vsel %vm319_vm0, %v10600_v55, %v3882_v63  ;;  %v10640_v32 = vpop.permute.xlu2 %6587 }
 0x653   : > { %v4361_v31 = vsel %vm319_vm0, %v4360_v33, %v12554_v12  ;;  %v10632_v33 = vperm.slane %v4385_v45, %v12407_v16  ;;  %v10635_v49 = vperm.slane %v4497_v26, %v12407_v16  ;;  %v10638_v57 = vperm.slane %v4499_v40, %v12407_v16  ;;  %12556 = vst [vmem:[#allocation54_spill] sm:$0xff] %v10640_v32 }
 0x654   : > { %12555 = vst [vmem:[#allocation53_spill] sm:$0xff] %v10618_v56  ;;  %6757 = vrot.lane.b32.xlu1 %v6756_v43, %s7033_s26  ;;  %v6781_v34 = vpack.i.bf16 %v3883_v29, %v3771_v4  ;;  %v4534_v17 = vrot.slane %v4483_v60, 4  ;;  %v10644_v35 = vperm.slane %v4361_v31, %v12407_v16  ;;  %v10647_v2 = vperm.slane %v4363_v54, %v12407_v16 }
 0x655   : > { %v4521_v45 = vsel %vm319_vm0, %v4520_v11, %v4479_v3  ;;  %v10652_v26 = vsel %vm319_vm0, %v10258_v36, %v3758_v61  ;;  %v10655_v40 = vperm.slane %v3757_v39, %v12408_v42  ;;  %v10659_v47 = vrot.slane %v12305_v10, 4 }
 0x656   : > { %v4522_v50 = vrot.slane %v4479_v3, 4  ;;  %6782 = vrot.lane.b32.xlu2 %v6781_v34, %s7037_s10  ;;  %v12558_v63 = vrot.slane %v10489_v37, 4  ;;  %v12306_v12 = vunpack.i.h.bf16 %v10640_v32  ;;  %v12307_v36 = vunpack.i.l.bf16 %v10640_v32  ;;  %v12569_v32 = vld [vmem:[#allocation19_spill] sm:$0xff] }
 0x657   : > { %12557 = vst [vmem:[#allocation55_spill] sm:$0xff] %v10655_v40  ;;  %v4546_v61 = vrot.slane %v10635_v49, 4  ;;  %v10672_v3 = vperm.slane %v4521_v45, %v12408_v42  ;;  %v12560_v54 = vrot.slane %v10486_v1, 4  ;;  %v10684_v29 = vsel %vm319_vm0, %v10489_v37, %v4534_v17 }
 0x658   : > { %v4533_v11 = vsel %vm319_vm0, %v12558_v63, %v4483_v60  ;;  %v12561_v60 = vrot.slane %v10478_v0, 4  ;;  %v6535_v34 = vunpack.i.h.bf16 %v10529_v41  ;;  %v4422_v63 = vrot.slane %v10647_v2, 4 }
 0x659   : > { %12559 = vst [vmem:[#allocation56_spill] sm:$0xff] %v10672_v3  ;;  %v4409_v43 = vsel %vm319_vm0, %v12560_v54, %v10644_v35  ;;  %v10690_v45 = vsel %vm319_vm0, %v10499_v9, %v4522_v50  ;;  %v10693_v10 = vperm.slane %v4533_v11, %v12408_v42  ;;  %v6534_v54 = vunpack.i.l.bf16 %v10529_v41  ;;  %v10721_v31 = vpop.permute.xlu0 %6567 }
 0x65a   : > { %v4421_v4 = vsel %vm319_vm0, %v12561_v60, %v10647_v2  ;;  %v4410_v44 = vrot.slane %v10644_v35, 4  ;;  %v10699_v60 = vrot.slane %v12306_v12, 4  ;;  %v3404_v37 = vrot.slane %v10430_v8, 4  ;;  %v12565_v12 = vld [vmem:[#allocation40_spill] sm:$0xff]  ;;  %v6613_v39 = vpop.permute.xlu2 %6612 }
 0x65b   : > { %v3516_v17 = vrot.slane %v10450_v5, 4  ;;  %v10704_v2 = vperm.slane %v4409_v43, %v12408_v42  ;;  %v10707_v9 = vperm.slane %v4421_v4, %v12408_v42  ;;  %v10711_v50 = vrot.slane %v12307_v36, 4  ;;  %v10719_v43 = vpop.permute.xlu1 %6557 }
 0x65c   : > { %12562 = vst [vmem:[#allocation57_spill] sm:$0xff] %v10699_v60  ;;  %v6545_v41 = vunpack.i.h.bf16 %v10627_v6  ;;  %v4510_v11 = vrot.slane %v6535_v34, 4  ;;  %v4509_v8 = vsel %vm319_vm0, %v12565_v12, %v6535_v34  ;;  %v3405_v5 = vsel %vm319_vm0, %v3404_v37, %v10192_v22 }
 0x65d   : > { %12563 = vst [vmem:[#allocation58_spill] sm:$0xff] %v10704_v2  ;;  %v4398_v4 = vrot.slane %v6534_v54, 4  ;;  %v3517_v36 = vsel %vm319_vm0, %v3516_v17, %v10233_v14  ;;  %v10727_v28 = vperm.slane %v10435_v15, %v12408_v42  ;;  %v3776_v35 = vrot.slane %v10655_v40, 4  ;;  %v12572_v2 = vld [vmem:[#allocation14_spill] sm:$0xff] }
 0x65e   : > { %12564 = vst [vmem:[#allocation59_spill] sm:$0xff] %v10711_v50  ;;  %v4397_v12 = vsel %vm319_vm0, %v12567_v27, %v6534_v54  ;;  %v6771_v34 = vpack.i.bf16 %v3517_v36, %v3405_v5  ;;  %v10734_v22 = vperm.slane %v10467_v20, %v12408_v42  ;;  %v3888_v37 = vrot.slane %v10618_v56, 4 }
 0x65f   : > { %12566 = vst [vmem:[#allocation40_spill] sm:$0xff] %v10727_v28  ;;  %v4515_v55 = vperm.slane %v4509_v8, %v12407_v16  ;;  %v3777_v14 = vsel %vm319_vm0, %v3776_v35, %v10727_v28  ;;  %v6560_v15 = vunpack.i.h.bf16 %v10719_v43  ;;  %v6555_v17 = vunpack.i.h.bf16 %v10629_v48 }
 0x660   : > { %12568 = vst [vmem:[#allocation41_spill] sm:$0xff] %v10734_v22  ;;  %v4850_v62 = vrot.slane %v6545_v41, 4  ;;  %v12570_v60 = vunpack.i.h.bf16 %v12569_v32  ;;  %v6614_v36 = vunpack.i.l.bf16 %v6613_v39  ;;  %6772 = vrot.lane.b32.xlu1 %v6771_v34, %s7034_s28  ;;  %v3889_v20 = vsel %vm319_vm0, %v3888_v37, %v10734_v22 }
 0x661   : > { %v12571_v54 = vunpack.i.l.bf16 %v12569_v32  ;;  %v4403_v35 = vperm.slane %v4397_v12, %v12407_v16  ;;  %v6796_v5 = vpack.i.bf16 %v3889_v20, %v3777_v14  ;;  %v4860_v50 = vrot.slane %v6560_v15, 4  ;;  %v12573_v32 = vld [vmem:[#allocation17_spill] sm:$0xff] }
 0x662   : > { %v4511_v27 = vsel %vm319_vm0, %v12570_v60, %v4510_v11  ;;  %v6615_v3 = vunpack.i.h.bf16 %v6613_v39  ;;  %v4863_v56 = vsel %vm319_vm0, %v6560_v15, %v12572_v2  ;;  %v4848_v40 = vrot.slane %v6555_v17, 4 }
 0x663   : > { %v4399_v8 = vsel %vm319_vm0, %v12571_v54, %v4398_v4  ;;  %v4851_v60 = vsel %vm319_vm0, %v6555_v17, %v4850_v62  ;;  %v10756_v11 = vperm.slane %v4511_v27, %v12407_v16  ;;  %v4544_v34 = vrot.slane %v4515_v55, 4  ;;  %6797 = vrot.lane.b32.xlu2 %v6796_v5, %s7035_s29 }
 0x664   : > { %v12574_v37 = vunpack.i.h.bf16 %v12573_v32  ;;  %v10765_v12 = vperm.slane %v4851_v60, %v12407_v16  ;;  %v10768_v39 = vperm.slane %v4399_v8, %v12407_v16  ;;  %v4547_v2 = vsel %vm319_vm0, %v4515_v55, %v4546_v61  ;;  %v10793_v8 = vpop.permute.xlu0 %6577  ;;  %v12582_v60 = vld [vmem:[#allocation12_spill] sm:$0xff] }
 0x665   : > { %v5838_v62 = vrot.slane %v6614_v36, 4  ;;  %v10772_v14 = vsel %vm319_vm0, %v4848_v40, %v6545_v41  ;;  %v4432_v15 = vrot.slane %v4403_v35, 4  ;;  %v12576_v17 = vrot.slane %v10632_v33, 4 }
 0x666   : > { %v10762_v4 = vsel %vm319_vm0, %v4860_v50, %v12574_v37  ;;  %12575 = vst [vmem:[#allocation19_spill] sm:$0xff] %v10765_v12  ;;  %v10778_v50 = vperm.slane %v4863_v56, %v12407_v16  ;;  %v4910_v20 = vrot.slane %v10765_v12, 4  ;;  %v10783_v54 = vsel %vm319_vm0, %v10486_v1, %v4410_v44  ;;  %v12580_v44 = vld [vmem:[#allocation45_spill] sm:$0xff] }
 0x667   : > { %v4435_v27 = vsel %vm319_vm0, %v4403_v35, %v12576_v17  ;;  %v10787_v55 = vsel %vm319_vm0, %v10478_v0, %v4422_v63  ;;  %v12578_v40 = vunpack.i.l.bf16 %v10627_v6  ;;  %v5950_v41 = vrot.slane %v6615_v3, 4  ;;  %v12584_v17 = vld [vmem:[#allocation44_spill] sm:$0xff] }
 0x668   : > { %12577 = vst [vmem:[#allocation14_spill] sm:$0xff] %v10778_v50  ;;  %v10796_v56 = vperm.slane %v4547_v2, %v12408_v42  ;;  %v12579_v35 = vrot.slane %v10638_v57, 4  ;;  %v5837_v5 = vsel %vm319_vm0, %v12580_v44, %v6614_v36  ;;  %v10806_v0 = vsel %vm319_vm0, %v10778_v50, %v4910_v20  ;;  %v6638_v36 = vpop.permute.xlu2 %6637 }
 0x669   : > { %v10791_v61 = vrot.slane %v12578_v40, 4  ;;  %12581 = vst [vmem:[#allocation17_spill] sm:$0xff] %v10806_v0  ;;  %v10809_v63 = vperm.slane %v4435_v27, %v12408_v42  ;;  %v12583_v37 = vunpack.i.l.bf16 %v12582_v60  ;;  %v5949_v40 = vsel %vm319_vm0, %v12584_v17, %v6615_v3 }
 0x66a   : > { %v4559_v1 = vsel %vm319_vm0, %v10756_v11, %v12579_v35  ;;  %v6559_v12 = vunpack.i.l.bf16 %v10719_v43  ;;  %v10819_v35 = vsel %vm319_vm0, %v4432_v15, %v10632_v33  ;;  %v10824_v20 = vsel %vm319_vm0, %v4544_v34, %v10635_v49 }
 0x66b   : > { %v5839_v2 = vsel %vm319_vm0, %v12583_v37, %v5838_v62  ;;  %12585 = vst [vmem:[#allocation45_spill] sm:$0xff] %v10819_v35  ;;  %v12587_v44 = vrot.slane %v10621_v18, 4  ;;  %v10832_v3 = vperm.slane %v4559_v1, %v12408_v42  ;;  %v10835_v43 = vperm.slane %v5837_v5, %v12407_v16 }
 0x66c   : > { %12586 = vst [vmem:[#allocation12_spill] sm:$0xff] %v10824_v20  ;;  %v12588_v33 = vunpack.i.h.bf16 %v12582_v60  ;;  %v10841_v49 = vperm.slane %v5839_v2, %v12407_v16  ;;  %v10844_v34 = vperm.slane %v5949_v40, %v12407_v16  ;;  %v6554_v37 = vunpack.i.l.bf16 %v10629_v48  ;;  %v10859_v40 = vpop.permute.xlu1 %6572  ;;  %v10887_v35 = vpop.permute.xlu0 %6592 }
 0x66d   : > { %v4447_v62 = vsel %vm319_vm0, %v10768_v39, %v12587_v44  ;;  %v12590_v17 = vrot.slane %v10514_v24, 4  ;;  %v4748_v44 = vrot.slane %v6559_v12, 4  ;;  %v3774_v60 = vrot.slane %v10438_v23, 4 }
 0x66e   : > { %v5951_v15 = vsel %vm319_vm0, %v12588_v33, %v5950_v41  ;;  %12589 = vst [vmem:[#allocation44_spill] sm:$0xff] %v10841_v49  ;;  %v12591_v41 = vrot.slane %v10507_v38, 4  ;;  %v12592_v33 = vld [vmem:[#allocation16_spill] sm:$0xff]  ;;  %v3782_v38 = vrot.slane %v10458_v58, 4  ;;  %v12594_v27 = vunpack.i.l.bf16 %v12573_v32 }
 0x66f   : > { %v3747_v1 = vsel %vm319_vm0, %v10255_v19, %v12590_v17  ;;  %v4751_v48 = vsel %vm319_vm0, %v6559_v12, %v12592_v33  ;;  %v3886_v19 = vrot.slane %v10504_v52, 4  ;;  %v3767_v17 = vperm.slane %v10652_v26, %v12408_v42 }
 0x670   : > { %v10852_v5 = vperm.slane %v3747_v1, %v12408_v42  ;;  %v3859_v2 = vsel %vm319_vm0, %v10242_v13, %v12591_v41  ;;  %v3879_v13 = vperm.slane %v10537_v46, %v12408_v42  ;;  %v3894_v41 = vrot.slane %v10511_v59, 4 }
 0x671   : > { %v10864_v24 = vperm.slane %v3859_v2, %v12408_v42  ;;  %v10876_v12 = vperm.slane %v5951_v15, %v12407_v16  ;;  %v6575_v33 = vunpack.i.h.bf16 %v10859_v40  ;;  %v3783_v46 = vsel %vm319_vm0, %v3767_v17, %v3782_v38 }
 0x672   : > { %v3775_v1 = vsel %vm319_vm0, %v10852_v5, %v3774_v60  ;;  %v4749_v60 = vsel %vm319_vm0, %v4748_v44, %v12594_v27  ;;  %v3895_v20 = vsel %vm319_vm0, %v3879_v13, %v3894_v41  ;;  %v10890_v15 = vperm.slane %v4447_v62, %v12408_v42 }
 0x673   : > { %12593 = vst [vmem:[#allocation16_spill] sm:$0xff] %v10876_v12  ;;  %v3887_v2 = vsel %vm319_vm0, %v10864_v24, %v3886_v19  ;;  %v10893_v19 = vperm.slane %v4751_v48, %v12407_v16  ;;  %v6811_v22 = vpack.i.bf16 %v3895_v20, %v3783_v46  ;;  %v4872_v26 = vrot.slane %v6575_v33, 4 }
 0x674   : > { %v6791_v0 = vpack.i.bf16 %v3887_v2, %v3775_v1  ;;  %v4736_v28 = vrot.slane %v6554_v37, 4  ;;  %v4875_v27 = vsel %vm319_vm0, %v6575_v33, %v10541_v7  ;;  %v12595_v44 = vunpack.i.h.bf16 %v10721_v31 }
 0x675   : > { %v10902_v38 = vperm.slane %v4749_v60, %v12407_v16  ;;  %v6640_v62 = vunpack.i.h.bf16 %v6638_v36  ;;  %6812 = vrot.lane.b32.xlu2 %v6811_v22, %s7032_s20  ;;  %v12596_v20 = vunpack.i.h.bf16 %v10483_v30  ;;  %v10911_v41 = vperm.slane %v4875_v27, %v12407_v16 }
 0x676   : > { %6792 = vrot.lane.b32.xlu1 %v6791_v0, %s7033_s26  ;;  %v4886_v1 = vrot.slane %v12595_v44, 4  ;;  %v6639_v33 = vunpack.i.l.bf16 %v6638_v36  ;;  %v4739_v22 = vsel %vm319_vm0, %v6554_v37, %v10791_v61  ;;  %v12598_v44 = vld [vmem:[#allocation22_spill] sm:$0xff]  ;;  %v10925_v27 = vperm.slane %v10762_v4, %v12407_v16 }
 0x677   : > { %v10908_v48 = vsel %vm319_vm0, %v4872_v26, %v12596_v20  ;;  %12597 = vst [vmem:[#allocation60_spill] sm:$0xff] %v10911_v41  ;;  %v4934_v46 = vrot.slane %v10911_v41, 4  ;;  %v12599_v26 = vunpack.i.h.bf16 %v12598_v44  ;;  %v12601_v2 = vunpack.i.l.bf16 %v10627_v6 }
 0x678   : > { %12600 = vst [vmem:[#allocation22_spill] sm:$0xff] %v10925_v27  ;;  %v6574_v32 = vunpack.i.l.bf16 %v10859_v40  ;;  %v10935_v37 = vperm.slane %v10772_v14, %v12407_v16  ;;  %v5574_v7 = vrot.slane %v6640_v62, 4  ;;  %v10941_v4 = vperm.slane %v4739_v22, %v12407_v16  ;;  %v10961_v22 = vpop.permute.xlu0 %6602 }
 0x679   : > { %v4887_v20 = vsel %vm319_vm0, %v12599_v26, %v4886_v1  ;;  %v4737_v36 = vsel %vm319_vm0, %v4736_v28, %v12601_v2  ;;  %v3780_v26 = vrot.slane %v3767_v17, 4  ;;  %v3892_v0 = vrot.slane %v3879_v13, 4  ;;  %v10944_v28 = vpop.permute.xlu1 %6582  ;;  %v12603_v2 = vld [vmem:[#allocation48_spill] sm:$0xff] }
 0x67a   : > { %v10938_v1 = vperm.slane %v4887_v20, %v12407_v16  ;;  %v3396_v6 = vrot.slane %v10573_v51, 4  ;;  %v10947_v40 = vperm.slane %v4737_v36, %v12407_v16  ;;  %v5461_v14 = vsel %vm319_vm0, %v12603_v2, %v6639_v33 }
 0x67b   : > { %v5462_v61 = vrot.slane %v6639_v33, 4  ;;  %v4760_v60 = vrot.slane %v6574_v32, 4  ;;  %v3781_v17 = vsel %vm319_vm0, %v3780_v26, %v10458_v58  ;;  %v3893_v51 = vsel %vm319_vm0, %v3892_v0, %v10511_v59 }
 0x67c   : > { %12602 = vst [vmem:[#allocation61_spill] sm:$0xff] %v10938_v1  ;;  %v10953_v20 = vsel %vm319_vm0, %v10938_v1, %v4934_v46  ;;  %v3397_v13 = vsel %vm319_vm0, %v3396_v6, %v10189_v25  ;;  %v6806_v36 = vpack.i.bf16 %v3893_v51, %v3781_v17  ;;  %v3508_v2 = vrot.slane %v10582_v53, 4  ;;  %v12605_v25 = vld [vmem:[#allocation47_spill] sm:$0xff]  ;;  %v12606_v17 = vld [vmem:[#allocation24_spill] sm:$0xff] }
 0x67d   : > { %12604 = vst [vmem:[#allocation48_spill] sm:$0xff] %v10953_v20  ;;  %v4419_v33 = vperm.slane %v10783_v54, %v12408_v42  ;;  %v4531_v46 = vperm.slane %v10690_v45, %v12408_v42  ;;  %v10972_v0 = vperm.slane %v5461_v14, %v12407_v16  ;;  %v5573_v26 = vsel %vm319_vm0, %v12605_v25, %v6640_v62 }
 0x67e   : > { %6807 = vrot.lane.b32.xlu1 %v6806_v36, %s7034_s28  ;;  %v3509_v53 = vsel %vm319_vm0, %v3508_v2, %v10230_v21  ;;  %v4786_v45 = vrot.slane %v10947_v40, 4  ;;  %v12607_v51 = vunpack.i.h.bf16 %v12606_v17  ;;  %v6569_v20 = vunpack.i.l.bf16 %v10721_v31 }
 0x67f   : > { %v4462_v54 = vrot.slane %v4419_v33, 4  ;;  %v4574_v6 = vrot.slane %v4531_v46, 4  ;;  %v6751_v14 = vpack.i.bf16 %v3509_v53, %v3397_v13  ;;  %v12608_v59 = vunpack.i.l.bf16 %v12606_v17 }
 0x680   : > { %v5575_v58 = vsel %vm319_vm0, %v12607_v51, %v5574_v7  ;;  %v12609_v36 = vunpack.i.l.bf16 %v10483_v30  ;;  %v10995_v41 = vperm.slane %v5573_v26, %v12407_v16  ;;  %v4763_v7 = vsel %vm319_vm0, %v6574_v32, %v10659_v47  ;;  %v12611_v30 = vld [vmem:[#allocation26_spill] sm:$0xff] }
 0x681   : > { %v5463_v62 = vsel %vm319_vm0, %v12608_v59, %v5462_v61  ;;  %v4463_v21 = vsel %vm319_vm0, %v10809_v63, %v4462_v54  ;;  %v4575_v2 = vsel %vm319_vm0, %v10796_v56, %v4574_v6  ;;  %6752 = vrot.lane.b32.xlu0 %v6751_v14, %s7036_s9  ;;  %v12610_v61 = vld [vmem:[#allocation31_spill] sm:$0xff]  ;;  %v3514_v53 = vrot.slane %v12611_v30, 4  ;;  %v11014_v51 = vpop.permute.xlu1 %6597  ;;  %v12612_v14 = vld [vmem:[#allocation30_spill] sm:$0xff] }
 0x682   : > { %v4761_v25 = vsel %vm319_vm0, %v4760_v60, %v12609_v36  ;;  %v6826_v13 = vpack.i.bf16 %v4575_v2, %v4463_v21  ;;  %v3402_v59 = vrot.slane %v12610_v61, 4  ;;  %v4468_v60 = vrot.slane %v10890_v15, 4  ;;  %v12613_v21 = vld [vmem:[#allocation18_spill] sm:$0xff] }
 0x683   : > { %v4580_v54 = vrot.slane %v10832_v3, 4  ;;  %v4460_v17 = vrot.slane %v10809_v63, 4  ;;  %v11006_v6 = vperm.slane %v4761_v25, %v12407_v16  ;;  %v4774_v26 = vrot.slane %v6569_v20, 4 }
 0x684   : > { %6827 = vrot.lane.b32.xlu2 %v6826_v13, %s7033_s26  ;;  %v11011_v47 = vperm.slane %v10787_v55, %v12408_v42  ;;  %v4572_v32 = vrot.slane %v10796_v56, 4  ;;  %v3403_v36 = vsel %vm319_vm0, %v12612_v14, %v3402_v59  ;;  %v3515_v63 = vsel %vm319_vm0, %v12613_v21, %v3514_v53  ;;  %v11035_v59 = vpop.permute.xlu0 %6617  ;;  %v12615_v53 = vld [vmem:[#allocation43_spill] sm:$0xff]  ;;  %v11054_v21 = vpop.permute.xlu2 %6647 }
 0x685   : > { %v11022_v25 = vperm.slane %v10684_v29, %v12408_v42  ;;  %v4461_v2 = vsel %vm319_vm0, %v4460_v17, %v4419_v33  ;;  %v11026_v13 = vperm.slane %v5463_v62, %v12407_v16  ;;  %v11029_v55 = vperm.slane %v5575_v58, %v12407_v16 }
 0x686   : > { %v11032_v56 = vperm.slane %v4763_v7, %v12407_v16  ;;  %v4573_v61 = vsel %vm319_vm0, %v4572_v32, %v4531_v46  ;;  %v11039_v30 = vperm.slane %v10908_v48, %v12407_v16  ;;  %v4469_v29 = vsel %vm319_vm0, %v4468_v60, %v11011_v47  ;;  %v12624_v32 = vld [vmem:[#allocation33_spill] sm:$0xff] }
 0x687   : > { %v4581_v33 = vsel %vm319_vm0, %v4580_v54, %v11022_v25  ;;  %v6821_v62 = vpack.i.bf16 %v4573_v61, %v4461_v2  ;;  %v4773_v7 = vsel %vm319_vm0, %v12615_v53, %v6569_v20  ;;  %v6766_v17 = vpack.i.bf16 %v3515_v63, %v3403_v36  ;;  %v12618_v61 = vld [vmem:[#allocation42_spill] sm:$0xff] }
 0x688   : > { %12614 = vst [vmem:[#allocation47_spill] sm:$0xff] %v11039_v30  ;;  %v3772_v46 = vrot.slane %v10852_v5, 4  ;;  %v4810_v48 = vrot.slane %v11006_v6, 4  ;;  %v12616_v14 = vunpack.i.l.bf16 %v12598_v44  ;;  %v3884_v54 = vrot.slane %v10864_v24, 4 }
 0x689   : > { %6822 = vrot.lane.b32.xlu1 %v6821_v62, %s7036_s9  ;;  %6767 = vrot.lane.b32.xlu0 %v6766_v17, %s7031_s19  ;;  %v6841_v36 = vpack.i.bf16 %v4581_v33, %v4469_v29  ;;  %v11064_v44 = vperm.slane %v4773_v7, %v12407_v16  ;;  %v4787_v24 = vsel %vm319_vm0, %v10902_v38, %v4786_v45  ;;  %v6595_v29 = vunpack.i.h.bf16 %v10887_v35 }
 0x68a   : > { %v4775_v60 = vsel %vm319_vm0, %v12616_v14, %v4774_v26  ;;  %v12617_v26 = vunpack.i.h.bf16 %v10721_v31  ;;  %v6594_v33 = vunpack.i.l.bf16 %v10887_v35  ;;  %v3773_v7 = vsel %vm319_vm0, %v3772_v46, %v10438_v23  ;;  %v6608_v46 = vpop.permute.xlu1 %6607 }
 0x68b   : > { %v11073_v53 = vperm.slane %v4775_v60, %v12407_v16  ;;  %v3885_v31 = vsel %vm319_vm0, %v3884_v54, %v10504_v52  ;;  %v11083_v17 = vperm.slane %v4787_v24, %v12408_v42  ;;  %v4811_v45 = vsel %vm319_vm0, %v11064_v44, %v4810_v48 }
 0x68c   : > { %v4885_v62 = vsel %vm319_vm0, %v12618_v61, %v12617_v26  ;;  %6842 = vrot.lane.b32.xlu2 %v6841_v36, %s7034_s28  ;;  %v12619_v14 = vrot.slane %v10768_v39, 4  ;;  %v6579_v35 = vunpack.i.l.bf16 %v10793_v8  ;;  %v4466_v52 = vrot.slane %v10707_v9, 4 }
 0x68d   : > { %v11092_v36 = vperm.slane %v4885_v62, %v12407_v16  ;;  %v6650_v54 = vunpack.i.h.bf16 %v11054_v21  ;;  %v6580_v48 = vunpack.i.h.bf16 %v10793_v8  ;;  %v4819_v26 = vperm.slane %v4811_v45, %v12408_v42 }
 0x68e   : > { %v4445_v60 = vsel %vm319_vm0, %v12619_v14, %v10621_v18  ;;  %v12621_v18 = vrot.slane %v10756_v11, 4  ;;  %v6786_v61 = vpack.i.bf16 %v3885_v31, %v3773_v7  ;;  %v4578_v14 = vrot.slane %v10693_v10, 4 }
 0x68f   : > { %12620 = vst [vmem:[#allocation24_spill] sm:$0xff] %v11092_v36  ;;  %v11096_v23 = vperm.slane %v4445_v60, %v12408_v42  ;;  %v11112_v60 = vpop.permute.xlu0 %6627  ;;  %v6649_v8 = vunpack.i.l.bf16 %v11054_v21  ;;  %v5926_v63 = vrot.slane %v6595_v29, 4  ;;  %v5814_v45 = vrot.slane %v6594_v33, 4 }
 0x690   : > { %v4557_v39 = vsel %vm319_vm0, %v12621_v18, %v10638_v57  ;;  %v4838_v20 = vrot.slane %v11083_v17, 4  ;;  %v6584_v57 = vunpack.i.l.bf16 %v10944_v28  ;;  %v5812_v7 = vrot.slane %v6579_v35, 4  ;;  %v11121_v18 = vpop.permute.xlu2 %6662 }
 0x691   : > { %v4467_v62 = vsel %vm319_vm0, %v11096_v23, %v4466_v52  ;;  %v11109_v24 = vperm.slane %v4557_v39, %v12408_v42  ;;  %6787 = vrot.lane.b32.xlu0 %v6786_v61, %s7036_s9  ;;  %v5924_v52 = vrot.slane %v6580_v48, 4  ;;  %12622 = vst [vmem:[#allocation31_spill] sm:$0xff] %v11121_v18  ;;  %v4820_v58 = vrot.slane %v11073_v53, 4 }
 0x692   : > { %v4839_v21 = vsel %vm319_vm0, %v4819_v26, %v4838_v20  ;;  %v5813_v5 = vsel %vm319_vm0, %v5812_v7, %v6594_v33  ;;  %v6610_v61 = vunpack.i.h.bf16 %v6608_v46  ;;  %v5815_v11 = vsel %vm319_vm0, %v6579_v35, %v5814_v45 }
 0x693   : > { %v4579_v31 = vsel %vm319_vm0, %v11109_v24, %v4578_v14  ;;  %v5925_v14 = vsel %vm319_vm0, %v5924_v52, %v6595_v29  ;;  %v5927_v18 = vsel %vm319_vm0, %v6580_v48, %v5926_v63  ;;  %v6609_v39 = vunpack.i.l.bf16 %v6608_v46  ;;  %v11162_v52 = vpop.permute.xlu1 %6622 }
 0x694   : > { %v6836_v2 = vpack.i.bf16 %v4579_v31, %v4467_v62  ;;  %4969 = vrot.lane.b32.xlu2 %v4839_v21, %s7033_s26  ;;  %v12623_v62 = vld [vmem:[#allocation34_spill] sm:$0xff]  ;;  %v11140_v33 = vsel %vm687_vm4, %v12624_v32, %v6649_v8  ;;  %v12625_v7 = vunpack.i.h.bf16 %v10944_v28  ;;  %v5824_v45 = vrot.slane %v6584_v57, 4 }
 0x695   : > { %v11136_v31 = vsel %vm687_vm4, %v12623_v62, %v6650_v54  ;;  %v12626_v29 = vunpack.i.h.bf16 %v11014_v51  ;;  %v11150_v46 = vperm.slane %v5813_v5, %v12407_v16  ;;  %v11153_v54 = vperm.slane %v5815_v11, %v12407_v16  ;;  %v12628_v5 = vld [vmem:[#allocation41_spill] sm:$0xff] }
 0x696   : > { %6837 = vrot.lane.b32.xlu1 %v6836_v2, %s7031_s19  ;;  %v5936_v35 = vrot.slane %v12625_v7, 4  ;;  %v11156_v48 = vperm.slane %v5925_v14, %v12407_v16  ;;  %v11159_v32 = vperm.slane %v5927_v18, %v12407_v16  ;;  %v5938_v21 = vrot.slane %v6610_v61, 4  ;;  %v12627_v7 = vld [vmem:[#allocation40_spill] sm:$0xff] }
 0x697   : > { %v11146_v63 = vrot.slane %v12626_v29, 4  ;;  %v5825_v62 = vsel %vm319_vm0, %v5824_v45, %v6609_v39  ;;  %v3778_v29 = vrot.slane %v12627_v7, 4  ;;  %v3890_v20 = vrot.slane %v12628_v5, 4  ;;  %v11175_v1 = vpop.permute.xlu0 %6642  ;;  %v12631_v45 = vld [vmem:[#allocation55_spill] sm:$0xff]  ;;  %v12632_v5 = vld [vmem:[#allocation53_spill] sm:$0xff] }
 0x698   : > { %v5937_v8 = vsel %vm319_vm0, %v5936_v35, %v6610_v61  ;;  %v5826_v2 = vrot.slane %v6609_v39, 4  ;;  %v12629_v11 = vrot.slane %v10941_v4, 4  ;;  %v12630_v18 = vrot.slane %v11032_v56, 4  ;;  %v11193_v27 = vpop.permute.xlu2 %6677 }
 0x699   : > { %v4836_v50 = vrot.slane %v4819_v26, 4  ;;  %v5943_v61 = vperm.slane %v5937_v8, %v12407_v16  ;;  %v3779_v7 = vsel %vm319_vm0, %v12631_v45, %v3778_v29  ;;  %v3891_v39 = vsel %vm319_vm0, %v12632_v5, %v3890_v20  ;;  %12635 = vst [vmem:[#allocation30_spill] sm:$0xff] %v11193_v27 }
 0x69a   : > { %v4799_v14 = vsel %vm319_vm0, %v10893_v19, %v12629_v11  ;;  %v4823_v35 = vsel %vm319_vm0, %v11073_v53, %v12630_v18  ;;  %v12634_v11 = vunpack.i.l.bf16 %v11014_v51  ;;  %v6801_v26 = vpack.i.bf16 %v3891_v39, %v3779_v7  ;;  %v12647_v53 = vld [vmem:[#allocation56_spill] sm:$0xff] }
 0x69b   : > { %v11183_v36 = vperm.slane %v4823_v35, %v12408_v42  ;;  %v4837_v18 = vsel %vm319_vm0, %v4836_v50, %v11083_v17  ;;  %v5831_v29 = vperm.slane %v5825_v62, %v12407_v16  ;;  %v11197_v20 = vperm.slane %v4799_v14, %v12408_v42 }
 0x69c   : > { %v11187_v30 = vrot.slane %v12634_v11, 4  ;;  %v5827_v7 = vsel %vm319_vm0, %v6584_v57, %v5826_v2  ;;  %v12331_v5 = vunpack.i.h.bf16 %v10961_v22  ;;  %6802 = vrot.lane.b32.xlu0 %v6801_v26, %s7031_s19  ;;  %v12637_v50 = vrot.slane %v10893_v19, 4 }
 0x69d   : > { %12633 = vst [vmem:[#allocation26_spill] sm:$0xff] %v11183_v36  ;;  %v4844_v35 = vrot.slane %v11183_v36, 4  ;;  %v12638_v14 = vunpack.i.h.bf16 %v10944_v28  ;;  %v12639_v11 = vrot.slane %v10844_v34, 4  ;;  %v5986_v2 = vrot.slane %v5943_v61, 4 }
 0x69e   : > { %12636 = vst [vmem:[#allocation18_spill] sm:$0xff] %v11197_v20  ;;  %4965 = vrot.lane.b32.xlu1 %v4837_v18, %s7036_s9  ;;  %v4797_v17 = vsel %vm319_vm0, %v12637_v50, %v10941_v4  ;;  %v6604_v26 = vunpack.i.l.bf16 %v10961_v22  ;;  %v4821_v4 = vsel %vm319_vm0, %v4820_v58, %v11032_v56  ;;  %v11226_v28 = vperm.slane %v5827_v7, %v12407_v16  ;;  %v6633_v7 = vpop.permute.xlu1 %6632 }
 0x69f   : > { %v5939_v39 = vsel %vm319_vm0, %v12638_v14, %v5938_v21  ;;  %v5985_v18 = vsel %vm319_vm0, %v12639_v11, %v5943_v61  ;;  %v4845_v57 = vsel %vm319_vm0, %v4844_v35, %v11197_v20  ;;  %v11221_v19 = vperm.slane %v4797_v17, %v12408_v42  ;;  %v11261_v27 = vpop.permute.xlu0 %6652 }
 0x6a0   : > { %4981 = vrot.lane.b32.xlu2 %v4845_v57, %s7034_s28  ;;  %v12640_v21 = vrot.slane %v10835_v43, 4  ;;  %v5874_v14 = vrot.slane %v5831_v29, 4  ;;  %v11232_v61 = vperm.slane %v4821_v4, %v12408_v42  ;;  %v11235_v35 = vperm.slane %v5939_v39, %v12407_v16  ;;  %v12642_v57 = vld [vmem:[#allocation45_spill] sm:$0xff]  ;;  %v12644_v4 = vld [vmem:[#allocation58_spill] sm:$0xff]  ;;  %v12645_v39 = vld [vmem:[#allocation12_spill] sm:$0xff]  ;;  %v11280_v20 = vpop.permute.xlu2 %6692 }
 0x6a1   : > { %v11238_v17 = vperm.slane %v5985_v18, %v12408_v42  ;;  %v5560_v56 = vrot.slane %v12331_v5, 4  ;;  %v4842_v58 = vrot.slane %v11221_v19, 4  ;;  %v6619_v11 = vunpack.i.l.bf16 %v11035_v59  ;;  %12650 = vst [vmem:[#allocation33_spill] sm:$0xff] %v11280_v20 }
 0x6a2   : > { %v5873_v50 = vsel %vm319_vm0, %v12640_v21, %v5831_v29  ;;  %12641 = vst [vmem:[#allocation43_spill] sm:$0xff] %v11235_v35  ;;  %v11246_v29 = vperm.slane %v12642_v57, %v12408_v42  ;;  %v4458_v21 = vrot.slane %v12644_v4, 4  ;;  %v11251_v45 = vperm.slane %v12645_v39, %v12408_v42 }
 0x6a3   : > { %v11254_v18 = vperm.slane %v5873_v50, %v12408_v42  ;;  %v5987_v62 = vsel %vm319_vm0, %v10844_v34, %v5986_v2  ;;  %v4843_v8 = vsel %vm319_vm0, %v11232_v61, %v4842_v58  ;;  %v4570_v5 = vrot.slane %v12647_v53, 4 }
 0x6a4   : > { %12643 = vst [vmem:[#allocation42_spill] sm:$0xff] %v11246_v29  ;;  %v5875_v57 = vsel %vm319_vm0, %v10835_v43, %v5874_v14  ;;  %v12648_v39 = vrot.slane %v10841_v49, 4  ;;  %v4459_v34 = vsel %vm319_vm0, %v11246_v29, %v4458_v21  ;;  %v6634_v2 = vunpack.i.l.bf16 %v6633_v7  ;;  %v12653_v29 = vld [vmem:[#allocation57_spill] sm:$0xff] }
 0x6a5   : > { %12646 = vst [vmem:[#allocation34_spill] sm:$0xff] %v11251_v45  ;;  %v12649_v50 = vrot.slane %v10876_v12, 4  ;;  %v6620_v53 = vunpack.i.h.bf16 %v11035_v59  ;;  %v4571_v43 = vsel %vm319_vm0, %v11251_v45, %v4570_v5  ;;  %v6635_v14 = vunpack.i.h.bf16 %v6633_v7 }
 0x6a6   : > { %v5885_v4 = vsel %vm319_vm0, %v12648_v39, %v11226_v28  ;;  %4977 = vrot.lane.b32.xlu1 %v4843_v8, %s7031_s19  ;;  %v5448_v39 = vrot.slane %v6604_v26, 4  ;;  %v5438_v8 = vrot.slane %v6619_v11, 4  ;;  %v6816_v49 = vpack.i.bf16 %v4571_v43, %v4459_v34 }
 0x6a7   : > { %v5997_v58 = vsel %vm319_vm0, %v12649_v50, %v11235_v35  ;;  %v11283_v21 = vperm.slane %v5875_v57, %v12408_v42  ;;  %v11287_v50 = vperm.slane %v5885_v4, %v12408_v42  ;;  %v11290_v59 = vperm.slane %v5987_v62, %v12408_v42  ;;  %v12652_v57 = vld [vmem:[#allocation59_spill] sm:$0xff]  ;;  %v12654_v62 = vld [vmem:[#allocation54_spill] sm:$0xff] }
 0x6a8   : > { %6817 = vrot.lane.b32.xlu0 %v6816_v49, %s7037_s10  ;;  %v5449_v36 = vsel %vm319_vm0, %v5448_v39, %v6634_v2  ;;  %v5450_v34 = vrot.slane %v6634_v2, 4  ;;  %v5550_v43 = vrot.slane %v6620_v53, 4  ;;  %v5437_v45 = vsel %vm319_vm0, %v12652_v57, %v6619_v11 }
 0x6a9   : > { %12651 = vst [vmem:[#allocation40_spill] sm:$0xff] %v11287_v50  ;;  %v5549_v4 = vsel %vm319_vm0, %v12653_v29, %v6620_v53  ;;  %v5561_v50 = vsel %vm319_vm0, %v5560_v56, %v6635_v14  ;;  %v12655_v12 = vunpack.i.l.bf16 %v12654_v62  ;;  %v5562_v35 = vrot.slane %v6635_v14, 4  ;;  %v11312_v29 = vpop.permute.xlu1 %6657 }
 0x6aa   : > { %v6630_v7 = vunpack.i.h.bf16 %v11112_v60  ;;  %v6629_v49 = vunpack.i.l.bf16 %v11112_v60  ;;  %v11307_v2 = vperm.slane %v5997_v58, %v12408_v42  ;;  %v5455_v53 = vperm.slane %v5449_v36, %v12407_v16 }
 0x6ab   : > { %v5439_v5 = vsel %vm319_vm0, %v12655_v12, %v5438_v8  ;;  %v11315_v56 = vperm.slane %v5437_v45, %v12407_v16  ;;  %v11318_v12 = vperm.slane %v5549_v4, %v12407_v16  ;;  %v5451_v14 = vsel %vm319_vm0, %v6604_v26, %v5450_v34 }
 0x6ac   : > { %12656 = vst [vmem:[#allocation41_spill] sm:$0xff] %v11307_v2  ;;  %v5567_v60 = vperm.slane %v5561_v50, %v12407_v16  ;;  %v12657_v58 = vunpack.i.h.bf16 %v11162_v52  ;;  %v12658_v57 = vunpack.i.l.bf16 %v11162_v52  ;;  %v11327_v36 = vperm.slane %v5439_v5, %v12407_v16  ;;  %v11332_v2 = vpop.permute.xlu0 %6667 }
 0x6ad   : > { %v12659_v11 = vunpack.i.h.bf16 %v12654_v62  ;;  %12660 = vst [vmem:[#allocation55_spill] sm:$0xff] %v11332_v2  ;;  %v12661_v4 = vunpack.i.h.bf16 %v10961_v22  ;;  %v5913_v50 = vsel %vm319_vm0, %v11146_v63, %v6630_v7  ;;  %v5914_v34 = vrot.slane %v6630_v7, 4  ;;  %v11351_v7 = vpop.permute.xlu2 %6707 }
 0x6ae   : > { %v5536_v8 = vrot.slane %v12657_v58, 4  ;;  %v5424_v39 = vrot.slane %v12658_v57, 4  ;;  %v5801_v58 = vsel %vm319_vm0, %v11187_v30, %v6629_v49  ;;  %v5459_v5 = vperm.slane %v5451_v14, %v12407_v16  ;;  %12663 = vst [vmem:[#allocation53_spill] sm:$0xff] %v11351_v7 }
 0x6af   : > { %v5551_v45 = vsel %vm319_vm0, %v12659_v11, %v5550_v43  ;;  %v5563_v26 = vsel %vm319_vm0, %v12661_v4, %v5562_v35  ;;  %v12662_v57 = vrot.slane %v10972_v0, 4  ;;  %v5498_v43 = vrot.slane %v5455_v53, 4 }
 0x6b0   : > { %v4464_v11 = vrot.slane %v11096_v23, 4  ;;  %v11348_v35 = vperm.slane %v5551_v45, %v12407_v16  ;;  %v5610_v4 = vrot.slane %v5567_v60, 4  ;;  %v5571_v14 = vperm.slane %v5563_v26, %v12407_v16 }
 0x6b1   : > { %v5497_v62 = vsel %vm319_vm0, %v12662_v57, %v5455_v53  ;;  %v5919_v2 = vperm.slane %v5913_v50, %v12407_v16  ;;  %v5807_v53 = vperm.slane %v5801_v58, %v12407_v16  ;;  %v12665_v57 = vrot.slane %v10995_v41, 4 }
 0x6b2   : > { %v11358_v23 = vperm.slane %v5497_v62, %v12408_v42  ;;  %v4465_v63 = vsel %vm319_vm0, %v4464_v11, %v10707_v9  ;;  %v4576_v22 = vrot.slane %v11109_v24, 4  ;;  %v5499_v30 = vsel %vm319_vm0, %v10972_v0, %v5498_v43 }
 0x6b3   : > { %v5609_v45 = vsel %vm319_vm0, %v12665_v57, %v5567_v60  ;;  %v12666_v26 = vrot.slane %v11026_v13, 4  ;;  %v12667_v58 = vunpack.i.h.bf16 %v11014_v51  ;;  %v6645_v7 = vunpack.i.h.bf16 %v11175_v1 }
 0x6b4   : > { %12664 = vst [vmem:[#allocation45_spill] sm:$0xff] %v11358_v23  ;;  %v5510_v20 = vrot.slane %v5459_v5, 4  ;;  %v5611_v60 = vsel %vm319_vm0, %v10995_v41, %v5610_v4  ;;  %v4577_v9 = vsel %vm319_vm0, %v4576_v22, %v10693_v10  ;;  %v6644_v24 = vunpack.i.l.bf16 %v11175_v1 }
 0x6b5   : > { %v5509_v50 = vsel %vm319_vm0, %v12666_v26, %v5459_v5  ;;  %v5915_v62 = vsel %vm319_vm0, %v12667_v58, %v5914_v34  ;;  %v5802_v0 = vrot.slane %v6629_v49, 4  ;;  %v5850_v43 = vrot.slane %v5807_v53, 4  ;;  %v11381_v26 = vpop.permute.xlu1 %6672 }
 0x6b6   : > { %v6831_v11 = vpack.i.bf16 %v4577_v9, %v4465_v63  ;;  %v5537_v57 = vsel %vm319_vm0, %v5536_v8, %v6645_v7  ;;  %12668 = vst [vmem:[#allocation12_spill] sm:$0xff] %v11381_v26  ;;  %v5962_v23 = vrot.slane %v5919_v2, 4  ;;  %v12669_v34 = vrot.slane %v11150_v46, 4  ;;  %v11400_v63 = vpop.permute.xlu0 %6682 }
 0x6b7   : > { %v11387_v58 = vperm.slane %v5537_v57, %v12407_v16  ;;  %v5425_v41 = vsel %vm319_vm0, %v5424_v39, %v6644_v24  ;;  %v5622_v10 = vrot.slane %v5571_v14, 4  ;;  %v11391_v1 = vperm.slane %v5915_v62, %v12407_v16 }
 0x6b8   : > { %v5849_v5 = vsel %vm319_vm0, %v12669_v34, %v5807_v53  ;;  %v12670_v49 = vrot.slane %v11156_v48, 4  ;;  %6832 = vrot.lane.b32.xlu0 %v6831_v11, %s7035_s29  ;;  %v11398_v22 = vperm.slane %v5425_v41, %v12407_v16  ;;  %v11403_v4 = vperm.slane %v5499_v30, %v12408_v42 }
 0x6b9   : > { %v11406_v39 = vperm.slane %v5509_v50, %v12408_v42  ;;  %v11409_v53 = vperm.slane %v5609_v45, %v12408_v42  ;;  %v12671_v62 = vrot.slane %v11029_v55, 4  ;;  %v11416_v9 = vsel %vm319_vm0, %v11026_v13, %v5510_v20  ;;  %v11434_v13 = vpop.permute.xlu2 %6727 }
 0x6ba   : > { %v5961_v8 = vsel %vm319_vm0, %v12670_v49, %v5919_v2  ;;  %v12672_v11 = vunpack.i.l.bf16 %v11014_v51  ;;  %v5851_v30 = vsel %vm319_vm0, %v11150_v46, %v5850_v43  ;;  %v11424_v50 = vperm.slane %v5849_v5, %v12408_v42  ;;  %12675 = vst [vmem:[#allocation54_spill] sm:$0xff] %v11434_v13 }
 0x6bb   : > { %v5621_v2 = vsel %vm319_vm0, %v12671_v62, %v5571_v14  ;;  %v11427_v45 = vperm.slane %v5611_v60, %v12408_v42  ;;  %v5963_v14 = vsel %vm319_vm0, %v11156_v48, %v5962_v23  ;;  %v11432_v34 = vperm.slane %v5961_v8, %v12408_v42 }
 0x6bc   : > { %v5803_v57 = vsel %vm319_vm0, %v12672_v11, %v5802_v0  ;;  %12673 = vst [vmem:[#allocation59_spill] sm:$0xff] %v11424_v50  ;;  %v5586_v51 = vrot.slane %v11387_v58, 4  ;;  %v11439_v20 = vsel %vm319_vm0, %v11029_v55, %v5622_v10  ;;  %v11442_v46 = vperm.slane %v5621_v2, %v12408_v42 }
 0x6bd   : > { %12674 = vst [vmem:[#allocation57_spill] sm:$0xff] %v11432_v34  ;;  %v5974_v60 = vrot.slane %v11391_v1, 4  ;;  %v5474_v0 = vrot.slane %v11398_v22, 4  ;;  %v11447_v48 = vperm.slane %v5803_v57, %v12407_v16  ;;  %v5538_v23 = vrot.slane %v6645_v7, 4 }
 0x6be   : > { %v6660_v43 = vunpack.i.h.bf16 %v11312_v29  ;;  %v5859_v5 = vperm.slane %v5851_v30, %v12408_v42  ;;  %v5900_v41 = vrot.slane %v11283_v21, 4  ;;  %v5971_v55 = vperm.slane %v5963_v14, %v12408_v42  ;;  %v11476_v13 = vpop.permute.xlu0 %6697 }
 0x6bf   : > { %v6012_v10 = vrot.slane %v11290_v59, 4  ;;  %v5898_v49 = vrot.slane %v11424_v50, 4  ;;  %v5587_v8 = vsel %vm319_vm0, %v11318_v12, %v5586_v51  ;;  %v6010_v62 = vrot.slane %v11432_v34, 4  ;;  %v11466_v50 = vpop.permute.xlu1 %6687 }
 0x6c0   : > { %v4470_v2 = vrot.slane %v11011_v47, 4  ;;  %v4582_v7 = vrot.slane %v11022_v25, 4  ;;  %v5475_v11 = vsel %vm319_vm0, %v11315_v56, %v5474_v0  ;;  %v5901_v57 = vsel %vm319_vm0, %v5900_v41, %v5859_v5 }
 0x6c1   : > { %v6013_v30 = vsel %vm319_vm0, %v6012_v10, %v5971_v55  ;;  %v5899_v14 = vsel %vm319_vm0, %v11254_v18, %v5898_v49  ;;  %v6011_v51 = vsel %vm319_vm0, %v11238_v17, %v6010_v62  ;;  %v6659_v0 = vunpack.i.l.bf16 %v11312_v29 }
 0x6c2   : > { %v6856_v26 = vpack.i.bf16 %v6013_v30, %v5901_v57  ;;  %v4471_v47 = vsel %vm319_vm0, %v10890_v15, %v4470_v2  ;;  %v4583_v25 = vsel %vm319_vm0, %v10832_v3, %v4582_v7  ;;  %v6851_v41 = vpack.i.bf16 %v6011_v51, %v5899_v14 }
 0x6c3   : > { %v6846_v34 = vpack.i.bf16 %v4583_v25, %v4471_v47  ;;  %v6655_v10 = vunpack.i.h.bf16 %v11261_v27  ;;  %v12676_v49 = vunpack.i.h.bf16 %v11162_v52  ;;  %v5426_v30 = vrot.slane %v6644_v24, 4  ;;  %v11491_v24 = vpop.permute.xlu2 %6747 }
 0x6c4   : > { %6857 = vrot.lane.b32.xlu2 %v6856_v26, %s7036_s9  ;;  %v6654_v15 = vunpack.i.l.bf16 %v11261_v27  ;;  %v5483_v62 = vperm.slane %v5475_v11, %v12408_v42  ;;  %6852 = vrot.lane.b32.xlu1 %v6851_v41, %s7037_s10  ;;  %v5524_v29 = vrot.slane %v11403_v4, 4  ;;  %v5595_v2 = vperm.slane %v5587_v8, %v12408_v42 }
 0x6c5   : > { %v5539_v57 = vsel %vm319_vm0, %v12676_v49, %v5538_v23  ;;  %6847 = vrot.lane.b32.xlu0 %v6846_v34, %s7032_s20  ;;  %v3208_v3 = vsel %vm689_vm5, %v11136_v31, %v6655_v10  ;;  %v5636_v23 = vrot.slane %v11427_v45, 4  ;;  %v5902_v7 = vrot.slane %v5859_v5, 4 }
 0x6c6   : > { %v3201_v27 = vsel %vm689_vm5, %v11140_v33, %v6654_v15  ;;  %v11496_v26 = vsel %vm691_vm6, %v3208_v3, %v6660_v43  ;;  %v6014_v11 = vrot.slane %v5971_v55, 4  ;;  %v5525_v31 = vsel %vm319_vm0, %v5524_v29, %v5483_v62 }
 0x6c7   : > { %12677 = vst [vmem:[#allocation62_spill] sm:$0xff] %v11496_v26  ;;  %v11499_v34 = vsel %vm691_vm6, %v3201_v27, %v6659_v0  ;;  %v5637_v14 = vsel %vm319_vm0, %v5636_v23, %v5595_v2  ;;  %v12678_v8 = vrot.slane %v10902_v38, 4  ;;  %v5903_v33 = vsel %vm319_vm0, %v11283_v21, %v5902_v7  ;;  %v12685_v23 = vld [vmem:[#allocation47_spill] sm:$0xff] }
 0x6c8   : > { %v6871_v47 = vpack.i.bf16 %v5637_v14, %v5525_v31  ;;  %v6015_v43 = vsel %vm319_vm0, %v11290_v59, %v6014_v11  ;;  %v5862_v55 = vrot.slane %v11447_v48, 4  ;;  %v12679_v25 = vrot.slane %v11159_v32, 4  ;;  %v11569_v14 = vpop.permute.xlu0 %6712 }
 0x6c9   : > { %v4785_v51 = vsel %vm319_vm0, %v12678_v8, %v10947_v40  ;;  %v12680_v38 = vunpack.i.l.bf16 %v11162_v52  ;;  %v12681_v21 = vrot.slane %v11064_v44, 4  ;;  %v5975_v41 = vsel %vm319_vm0, %v11159_v32, %v5974_v60 }
 0x6ca   : > { %v11512_v5 = vperm.slane %v4785_v51, %v12408_v42  ;;  %v11519_v0 = vsel %vm319_vm0, %v12679_v25, %v11391_v1  ;;  %v11531_v10 = vperm.slane %v5539_v57, %v12407_v16  ;;  %v12682_v52 = vrot.slane %v11315_v56, 4  ;;  %v12683_v57 = vld [vmem:[#allocation22_spill] sm:$0xff] }
 0x6cb   : > { %v5427_v40 = vsel %vm319_vm0, %v12680_v38, %v5426_v30  ;;  %v4809_v59 = vsel %vm319_vm0, %v12681_v21, %v11006_v6  ;;  %v6866_v15 = vpack.i.bf16 %v6015_v43, %v5903_v33  ;;  %v5526_v44 = vrot.slane %v5483_v62, 4  ;;  %v11541_v6 = vpop.permute.xlu1 %6702  ;;  %v12690_v33 = vld [vmem:[#allocation36_spill] sm:$0xff] }
 0x6cc   : > { %v11534_v49 = vperm.slane %v4809_v59, %v12408_v42  ;;  %v4834_v1 = vrot.slane %v11512_v5, 4  ;;  %v5473_v30 = vsel %vm319_vm0, %v12682_v52, %v11398_v22  ;;  %v5638_v3 = vrot.slane %v5595_v2, 4  ;;  %6872 = vrot.lane.b32.xlu2 %v6871_v47, %s7036_s9  ;;  %v12686_v22 = vld [vmem:[#allocation24_spill] sm:$0xff] }
 0x6cd   : > { %v11544_v32 = vperm.slane %v5427_v40, %v12407_v16  ;;  %v12684_v29 = vrot.slane %v12683_v57, 4  ;;  %v12687_v27 = vrot.slane %v12686_v22, 4  ;;  %v5596_v2 = vrot.slane %v11348_v35, 4  ;;  %6867 = vrot.lane.b32.xlu1 %v6866_v15, %s7033_s26 }
 0x6ce   : > { %v4835_v60 = vsel %vm319_vm0, %v11534_v49, %v4834_v1  ;;  %v5863_v16 = vsel %vm319_vm0, %v11153_v54, %v5862_v55  ;;  %v12688_v7 = vrot.slane %v11318_v12, 4  ;;  %v11572_v8 = vperm.slane %v5473_v30, %v12408_v42  ;;  %v12691_v55 = vld [vmem:[#allocation28_spill] sm:$0xff]  ;;  %v12693_v30 = vld [vmem:[#allocation23_spill] sm:$0xff] }
 0x6cf   : > { %v4897_v56 = vsel %vm319_vm0, %v12684_v29, %v10935_v37  ;;  %v4921_v62 = vsel %vm319_vm0, %v12687_v27, %v12685_v23  ;;  %4961 = vrot.lane.b32.xlu0 %v4835_v60, %s7037_s10  ;;  %v5527_v51 = vsel %vm319_vm0, %v11403_v4, %v5526_v44  ;;  %v5639_v12 = vsel %vm319_vm0, %v11427_v45, %v5638_v3  ;;  %v11591_v45 = vpop.permute.xlu2 %6762  ;;  %v12694_v44 = vld [vmem:[#allocation27_spill] sm:$0xff] }
 0x6d0   : > { %v5585_v11 = vsel %vm319_vm0, %v12688_v7, %v11387_v58  ;;  %v11567_v31 = vperm.slane %v4897_v56, %v12408_v42  ;;  %v4840_v58 = vrot.slane %v11232_v61, 4  ;;  %v11580_v47 = vperm.slane %v4921_v62, %v12408_v42 }
 0x6d1   : > { %v4080_v43 = vrot.slane %v12690_v33, 4  ;;  %v4192_v25 = vrot.slane %v12691_v55, 4  ;;  %v6685_v38 = vunpack.i.h.bf16 %v11400_v63  ;;  %v12692_v40 = vrot.slane %v11327_v36, 4  ;;  %v12696_v33 = vld [vmem:[#allocation44_spill] sm:$0xff] }
 0x6d2   : > { %12689 = vst [vmem:[#allocation22_spill] sm:$0xff] %v11567_v31  ;;  %v5597_v4 = vsel %vm319_vm0, %v5596_v2, %v11531_v10  ;;  %v6690_v61 = vunpack.i.h.bf16 %v11466_v50  ;;  %v6684_v59 = vunpack.i.l.bf16 %v11400_v63  ;;  %v6689_v1 = vunpack.i.l.bf16 %v11466_v50 }
 0x6d3   : > { %v5485_v21 = vsel %vm319_vm0, %v12692_v40, %v11544_v32  ;;  %v4946_v52 = vrot.slane %v11567_v31, 4  ;;  %v4081_v15 = vsel %vm319_vm0, %v4080_v43, %v12693_v30  ;;  %v4193_v3 = vsel %vm319_vm0, %v4192_v25, %v12694_v44  ;;  %v11654_v30 = vpop.permute.xlu0 %6732  ;;  %v12750_v31 = vld [vmem:[#allocation59_spill] sm:$0xff] }
 0x6d4   : > { %v11602_v60 = vperm.slane %v5585_v11, %v12408_v42  ;;  %v6881_v29 = vpack.i.bf16 %v5639_v12, %v5527_v51  ;;  %v4271_v56 = vsel %vm687_vm4, %v4193_v3, %v6685_v38  ;;  %v4264_v27 = vsel %vm687_vm4, %v4081_v15, %v6684_v59  ;;  %v6718_v38 = vpop.permute.xlu1 %6717  ;;  %v12700_v59 = vld [vmem:[#allocation16_spill] sm:$0xff]  ;;  %v12701_v15 = vld [vmem:[#allocation45_spill] sm:$0xff] }
 0x6d5   : > { %v4947_v63 = vsel %vm319_vm0, %v11580_v47, %v4946_v52  ;;  %v4841_v50 = vsel %vm319_vm0, %v4840_v58, %v11221_v19  ;;  %v4272_v62 = vsel %vm689_vm5, %v4271_v56, %v6690_v61  ;;  %v4265_v2 = vsel %vm689_vm5, %v4264_v27, %v6689_v1  ;;  %v12703_v27 = vld [vmem:[#allocation39_spill] sm:$0xff] }
 0x6d6   : > { %6882 = vrot.lane.b32.xlu2 %v6881_v29, %s7033_s26  ;;  %v11614_v7 = vperm.slane %v5485_v21, %v12408_v42  ;;  %v5528_v11 = vrot.slane %v11406_v39, 4  ;;  %v11618_v51 = vperm.slane %v5597_v4, %v12408_v42  ;;  %v5640_v12 = vrot.slane %v11442_v46, 4  ;;  %4989 = vrot.lane.b32.xlu1 %v4947_v63, %s7037_s10  ;;  %v12698_v4 = vld [vmem:[#allocation43_spill] sm:$0xff]  ;;  %v12702_v29 = vld [vmem:[#allocation37_spill] sm:$0xff] }
 0x6d7   : > { %4973 = vrot.lane.b32.xlu0 %v4841_v50, %s7035_s29  ;;  %v11624_v19 = vperm.slane %v5863_v16, %v12408_v42  ;;  %v12695_v58 = vrot.slane %v11226_v28, 4  ;;  %v11631_v55 = vperm.slane %v5975_v41, %v12408_v42  ;;  %v5522_v25 = vrot.slane %v11572_v8, 4 }
 0x6d8   : > { %v12697_v40 = vrot.slane %v11153_v54, 4  ;;  %v5529_v16 = vsel %vm319_vm0, %v5528_v11, %v11614_v7  ;;  %v5641_v28 = vsel %vm319_vm0, %v5640_v12, %v11618_v51  ;;  %v12699_v61 = vrot.slane %v12698_v4, 4 }
 0x6d9   : > { %v5887_v43 = vsel %vm319_vm0, %v12696_v33, %v12695_v58  ;;  %v5910_v52 = vrot.slane %v11624_v19, 4  ;;  %v5523_v44 = vsel %vm319_vm0, %v12701_v15, %v5522_v25  ;;  %v5634_v3 = vrot.slane %v11602_v60, 4 }
 0x6da   : > { %v5861_v21 = vsel %vm319_vm0, %v12697_v40, %v11447_v48  ;;  %v5999_v41 = vsel %vm319_vm0, %v12700_v59, %v12699_v61  ;;  %v11647_v1 = vperm.slane %v5887_v43, %v12408_v42  ;;  %v6022_v48 = vrot.slane %v11631_v55, 4  ;;  %v11667_v43 = vpop.permute.xlu2 %6777  ;;  %v12705_v59 = vld [vmem:[#allocation25_spill] sm:$0xff] }
 0x6db   : > { %v11651_v54 = vperm.slane %v5999_v41, %v12408_v42  ;;  %v5144_v56 = vrot.slane %v12702_v29, 4  ;;  %v5256_v63 = vrot.slane %v12703_v27, 4  ;;  %v5598_v50 = vrot.slane %v11531_v10, 4  ;;  %12704 = vst [vmem:[#allocation47_spill] sm:$0xff] %v11667_v43  ;;  %v12706_v41 = vld [vmem:[#allocation38_spill] sm:$0xff] }
 0x6dc   : > { %v5911_v11 = vsel %vm319_vm0, %v11647_v1, %v5910_v52  ;;  %v6720_v58 = vunpack.i.h.bf16 %v6718_v38  ;;  %v5486_v33 = vrot.slane %v11544_v32, 4  ;;  %v6891_v25 = vpack.i.bf16 %v5641_v28, %v5529_v16  ;;  %v12707_v16 = vld [vmem:[#allocation33_spill] sm:$0xff] }
 0x6dd   : > { %v6023_v12 = vsel %vm319_vm0, %v11651_v54, %v6022_v48  ;;  %v5635_v4 = vsel %vm319_vm0, %v11409_v53, %v5634_v3  ;;  %v5145_v10 = vsel %vm319_vm0, %v5144_v56, %v12705_v59  ;;  %v5257_v52 = vsel %vm319_vm0, %v5256_v63, %v12706_v41  ;;  %v12712_v41 = vld [vmem:[#allocation40_spill] sm:$0xff] }
 0x6de   : > { %v6906_v40 = vpack.i.bf16 %v6023_v12, %v5911_v11  ;;  %v6861_v61 = vpack.i.bf16 %v5635_v4, %v5523_v44  ;;  %v6700_v29 = vunpack.i.h.bf16 %v11476_v13  ;;  %6892 = vrot.lane.b32.xlu2 %v6891_v25, %s7035_s29  ;;  %v5335_v32 = vsel %vm687_vm4, %v5257_v52, %v6720_v58 }
 0x6df   : > { %v6699_v48 = vunpack.i.l.bf16 %v11476_v13  ;;  %v12708_v28 = vunpack.i.l.bf16 %v12707_v16  ;;  %v12709_v44 = vunpack.i.h.bf16 %v12707_v16  ;;  %v6719_v56 = vunpack.i.l.bf16 %v6718_v38  ;;  %v11718_v16 = vpop.permute.xlu0 %6737 }
 0x6e0   : > { %6907 = vrot.lane.b32.xlu1 %v6906_v40, %s7032_s20  ;;  %6862 = vrot.lane.b32.xlu0 %v6861_v61, %s7037_s10  ;;  %v12710_v11 = vrot.slane %v10935_v37, 4  ;;  %v12711_v12 = vrot.slane %v12685_v23, 4  ;;  %v5487_v25 = vsel %vm319_vm0, %v11327_v36, %v5486_v33  ;;  %v5599_v23 = vsel %vm319_vm0, %v11348_v35, %v5598_v50  ;;  %v6723_v40 = vpop.permute.xlu1 %6722 }
 0x6e1   : > { %v4266_v27 = vsel %vm691_vm6, %v4265_v2, %v12708_v28  ;;  %v4273_v3 = vsel %vm691_vm6, %v4272_v62, %v12709_v44  ;;  %v5495_v37 = vperm.slane %v5487_v25, %v12408_v42  ;;  %v5607_v61 = vperm.slane %v5599_v23, %v12408_v42  ;;  %v12714_v25 = vld [vmem:[#allocation61_spill] sm:$0xff] }
 0x6e2   : > { %v11688_v63 = vsel %vm693_vm7, %v4273_v3, %v6700_v29  ;;  %v4899_v13 = vsel %vm319_vm0, %v12683_v57, %v12710_v11  ;;  %v4923_v2 = vsel %vm319_vm0, %v12686_v22, %v12711_v12  ;;  %v11699_v62 = vsel %vm693_vm7, %v4266_v27, %v6699_v48  ;;  %v11726_v11 = vpop.permute.xlu2 %6782 }
 0x6e3   : > { %v4907_v58 = vperm.slane %v4899_v13, %v12408_v42  ;;  %v4931_v38 = vperm.slane %v4923_v2, %v12408_v42  ;;  %v5519_v57 = vperm.slane %v11416_v9, %v12408_v42  ;;  %v5631_v22 = vperm.slane %v11439_v20, %v12408_v42  ;;  %v12713_v9 = vld [vmem:[#allocation41_spill] sm:$0xff] }
 0x6e4   : > { %v5867_v59 = vperm.slane %v5861_v21, %v12408_v42  ;;  %v5904_v52 = vrot.slane %v12712_v41, 4  ;;  %v5979_v29 = vperm.slane %v11519_v0, %v12408_v42  ;;  %v6016_v48 = vrot.slane %v12713_v9, 4 }
 0x6e5   : > { %v4948_v4 = vrot.slane %v4931_v38, 4  ;;  %v5532_v36 = vrot.slane %v5519_v57, 4  ;;  %v5644_v33 = vrot.slane %v5631_v22, 4  ;;  %v6725_v50 = vunpack.i.h.bf16 %v6723_v40 }
 0x6e6   : > { %v5905_v20 = vsel %vm319_vm0, %v5904_v52, %v5867_v59  ;;  %v6724_v28 = vunpack.i.l.bf16 %v6723_v40  ;;  %v5328_v27 = vsel %vm687_vm4, %v5145_v10, %v6719_v56  ;;  %v6017_v3 = vsel %vm319_vm0, %v6016_v48, %v5979_v29  ;;  %v12715_v40 = vld [vmem:[#allocation54_spill] sm:$0xff] }
 0x6e7   : > { %v4949_v35 = vsel %vm319_vm0, %v4948_v4, %v4907_v58  ;;  %v5533_v21 = vsel %vm319_vm0, %v5532_v36, %v5495_v37  ;;  %v5645_v44 = vsel %vm319_vm0, %v5644_v33, %v5607_v61  ;;  %v6876_v13 = vpack.i.bf16 %v6017_v3, %v5905_v20  ;;  %v11759_v3 = vpop.permute.xlu0 %6742 }
 0x6e8   : > { %4993 = vrot.lane.b32.xlu2 %v4949_v35, %s7036_s9  ;;  %v6911_v0 = vpack.i.bf16 %v5645_v44, %v5533_v21  ;;  %v5329_v12 = vsel %vm689_vm5, %v5328_v27, %v6724_v28  ;;  %v5336_v2 = vsel %vm689_vm5, %v5335_v32, %v6725_v50  ;;  %v4932_v23 = vrot.slane %v12714_v25, 4  ;;  %v12717_v21 = vld [vmem:[#allocation14_spill] sm:$0xff]  ;;  %v12719_v44 = vld [vmem:[#allocation60_spill] sm:$0xff]  ;;  %s6340_s9 = sshll.u32 %s7101_s25, 4 }
 0x6e9   : > { %v6730_v10 = vunpack.i.h.bf16 %v12715_v40  ;;  %v6729_v56 = vunpack.i.l.bf16 %v12715_v40  ;;  %v4950_v4 = vrot.slane %v4907_v58, 4  ;;  %6877 = vrot.lane.b32.xlu0 %v6876_v13, %s7035_s29  ;;  %v5534_v52 = vrot.slane %v5495_v37, 4  ;;  %v12721_v40 = vld [vmem:[#allocation18_spill] sm:$0xff]  ;;  %s6235_s12 = scalar_lea.hbm %s12227_s6, %s6340_s9 }
 0x6ea   : > { %6912 = vrot.lane.b32.xlu1 %v6911_v0, %s7034_s28  ;;  %v5646_v36 = vrot.slane %v5607_v61, 4  ;;  %v5906_v33 = vrot.slane %v5867_v59, 4  ;;  %v6018_v48 = vrot.slane %v5979_v29, 4  ;;  %v6735_v20 = vunpack.i.h.bf16 %v11654_v30  ;;  %v6758_v59 = vpop.permute.xlu1 %6757  ;;  %v12716_v29 = vld [vmem:[#allocation19_spill] sm:$0xff]  ;;  %s6239_s15 = sshll.u32 %s6235_s12, 4  ;;  %s6240_s15 = int_to_ptr.hbm [resolvable:$true] %s6239_s15 }
 0x6eb   : > { %v4951_v35 = vsel %vm319_vm0, %v4931_v38, %v4950_v4  ;;  %v6734_v32 = vunpack.i.l.bf16 %v11654_v30  ;;  %v5330_v50 = vsel %vm691_vm6, %v5329_v12, %v6729_v56  ;;  %v5535_v28 = vsel %vm319_vm0, %v5519_v57, %v5534_v52  ;;  %v11767_v56 = vpop.permute.xlu2 %6797  ;;  %v12722_v52 = vld [vmem:[#allocation20_spill] sm:$0xff]  ;;  %s6976_s16 = sshra.s32 %s6240_s15, 4  ;;  %s6977_s16 = int_to_ptr.hbm [resolvable:$true] %s6976_s16 }
 0x6ec   : > { %v5647_v58 = vsel %vm319_vm0, %v5631_v22, %v5646_v36  ;;  %v5907_v27 = vsel %vm319_vm0, %v12712_v41, %v5906_v33  ;;  %v6019_v37 = vsel %vm319_vm0, %v12713_v9, %v6018_v48  ;;  %v5337_v38 = vsel %vm691_vm6, %v5336_v2, %v6730_v10  ;;  %v12720_v2 = vld [vmem:[#allocation17_spill] sm:$0xff]  ;;  %s6978_s17 = scalar_lea.hbm %s6977_s16, 16  ;;  %p6983_p3 = scmp.lt.s32.totalorder %s6977_s16, %s12227_s6 }
 0x6ed   : > { %v11747_v61 = vsel %vm693_vm7, %v5330_v50, %v6734_v32  ;;  %v11751_v30 = vsel %vm693_vm7, %v5337_v38, %v6735_v20  ;;  %v12718_v57 = vrot.slane %v12717_v21, 4  ;;  %v4933_v41 = vsel %vm319_vm0, %v4932_v23, %v12719_v44  ;;  %v12723_v33 = vld [vmem:[#allocation13_spill] sm:$0xff]  ;;  %p6979_p0 = scmp.ne.s32.totalorder %s6977_s16, %s6978_s17 }
 0x6ee   : > { %v6916_v9 = vpack.i.bf16 %v5647_v58, %v5535_v28  ;;  %v6886_v0 = vpack.i.bf16 %v6019_v37, %v5907_v27  ;;  %v4939_v12 = vperm.slane %v4933_v41, %v12408_v42  ;;  %v4919_v25 = vperm.slane %v12720_v2, %v12408_v42  ;;  %v12724_v58 = vld [vmem:[#allocation48_spill] sm:$0xff] }
 0x6ef   : > { %v4909_v22 = vsel %vm319_vm0, %v12718_v57, %v12716_v29  ;;  %v4846_v10 = vrot.slane %v12721_v40, 4  ;;  %v3392_v36 = vrot.slane %v12722_v52, 4  ;;  %v3504_v48 = vrot.slane %v12723_v33, 4  ;;  %v12725_v29 = vld [vmem:[#allocation26_spill] sm:$0xff]  ;;  %p6980_p1 = pnand %p6979_p0, %p7118_p5 }
 0x6f0   : > { %4997 = vrot.lane.b32.xlu2 %v4951_v35, %s7033_s26  ;;  %v4915_v13 = vperm.slane %v4909_v22, %v12408_v42  ;;  %v4952_v23 = vrot.slane %v4939_v12, 4  ;;  %v5908_v35 = vrot.slane %v11647_v1, 4  ;;  %v6020_v20 = vrot.slane %v11651_v54, 4  ;;  %v12726_v54 = vld [vmem:[#allocation29_spill] sm:$0xff] }
 0x6f1   : > { %6887 = vrot.lane.b32.xlu0 %v6886_v0, %s7031_s19  ;;  %v6750_v32 = vunpack.i.h.bf16 %v11491_v24  ;;  %v4943_v27 = vperm.slane %v12724_v58, %v12408_v42  ;;  %v4847_v1 = vsel %vm319_vm0, %v12725_v29, %v4846_v10  ;;  %v4958_v21 = vrot.slane %v4919_v25, 4  ;;  %v12727_v0 = vld [vmem:[#allocation32_spill] sm:$0xff]  ;;  %p6981_p2 = pneg %p6980_p1 }
 0x6f2   : > { %6917 = vrot.lane.b32.xlu1 %v6916_v9, %s7032_s20  ;;  %v4954_v4 = vrot.slane %v4915_v13, 4  ;;  %v4953_v50 = vsel %vm319_vm0, %v4952_v23, %v4915_v13  ;;  %v5909_v37 = vsel %vm319_vm0, %v5908_v35, %v11624_v19  ;;  %v6021_v38 = vsel %vm319_vm0, %v6020_v20, %v11631_v55  ;;  %v11789_v44 = vpop.permute.xlu1 %6772  ;;  %v12729_v23 = vld [vmem:[#allocation46_spill] sm:$0xff] }
 0x6f3   : > { %v3505_v57 = vsel %vm319_vm0, %v3504_v48, %v12726_v54  ;;  %v6749_v22 = vunpack.i.l.bf16 %v11491_v24  ;;  %v4959_v41 = vsel %vm319_vm0, %v4943_v27, %v4958_v21  ;;  %v6896_v19 = vpack.i.bf16 %v6021_v38, %v5909_v37  ;;  %v6753_v10 = vpop.permute.xlu0 %6752 }
 0x6f4   : > { %v4955_v28 = vsel %vm319_vm0, %v4939_v12, %v4954_v4  ;;  %v3583_v42 = vsel %vm687_vm4, %v3505_v57, %v6750_v32  ;;  %v6926_v9 = vpack.i.bf16 %v4959_v41, %v4847_v1  ;;  %v4956_v55 = vrot.slane %v4943_v27, 4  ;;  %v12728_v12 = vld [vmem:[#allocation49_spill] sm:$0xff]  ;;  %v12730_v32 = vld [vmem:[#allocation50_spill] sm:$0xff] }
 0x6f5   : > { %v3393_v13 = vsel %vm319_vm0, %v3392_v36, %v12727_v0  ;;  %v5158_v2 = vrot.slane %v12728_v12, 4  ;;  %v5530_v40 = vrot.slane %v11614_v7, 4  ;;  %v5642_v24 = vrot.slane %v11618_v51, 4  ;;  %v12731_v51 = vld [vmem:[#allocation51_spill] sm:$0xff] }
 0x6f6   : > { %v5270_v4 = vrot.slane %v12729_v23, 4  ;;  %v4957_v52 = vsel %vm319_vm0, %v4956_v55, %v4919_v25  ;;  %v6755_v33 = vunpack.i.h.bf16 %v6753_v10  ;;  %v6754_v48 = vunpack.i.l.bf16 %v6753_v10  ;;  %v12734_v0 = vld [vmem:[#allocation15_spill] sm:$0xff] }
 0x6f7   : > { %v3576_v35 = vsel %vm687_vm4, %v3393_v13, %v6749_v22  ;;  %v6760_v36 = vunpack.i.h.bf16 %v6758_v59  ;;  %v6759_v20 = vunpack.i.l.bf16 %v6758_v59  ;;  %v5159_v7 = vsel %vm319_vm0, %v12730_v32, %v5158_v2  ;;  %v12735_v12 = vld [vmem:[#allocation35_spill] sm:$0xff] }
 0x6f8   : > { %5001 = vrot.lane.b32.xlu2 %v4953_v50, %s7035_s29  ;;  %v11806_v50 = vpop.permute.xlu2 %6812  ;;  %v3577_v58 = vsel %vm689_vm5, %v3576_v35, %v6754_v48  ;;  %v3584_v27 = vsel %vm689_vm5, %v3583_v42, %v6755_v33  ;;  %v5531_v25 = vsel %vm319_vm0, %v11406_v39, %v5530_v40  ;;  %v5643_v37 = vsel %vm319_vm0, %v11442_v46, %v5642_v24  ;;  %v12732_v39 = vld [vmem:[#allocation21_spill] sm:$0xff]  ;;  %v12733_v46 = vld [vmem:[#allocation52_spill] sm:$0xff] }
 0x6f9   : > { %6897 = vrot.lane.b32.xlu0 %v6896_v19, %s7034_s28  ;;  %v11817_v59 = vsel %vm691_vm6, %v3577_v58, %v6759_v20  ;;  %v11820_v38 = vsel %vm691_vm6, %v3584_v27, %v6760_v36  ;;  %v6901_v1 = vpack.i.bf16 %v5643_v37, %v5531_v25  ;;  %v3768_v57 = vrot.slane %v12732_v39, 4  ;;  %v12737_v58 = vld [vmem:[#allocation42_spill] sm:$0xff] }
 0x6fa   : > { %5005 = vrot.lane.b32.xlu1 %v4955_v28, %s7031_s19  ;;  %v5271_v28 = vsel %vm319_vm0, %v12731_v51, %v5270_v4  ;;  %v6793_v21 = vpop.permute.xlu1 %6792  ;;  %v3880_v22 = vrot.slane %v12733_v46, 4  ;;  %v6785_v42 = vunpack.i.h.bf16 %v11726_v11  ;;  %v6784_v19 = vunpack.i.l.bf16 %v11726_v11  ;;  %v12736_v51 = vld [vmem:[#allocation34_spill] sm:$0xff] }
 0x6fb   : > { %v6921_v29 = vpack.i.bf16 %v5271_v28, %v5159_v7  ;;  %v11823_v54 = vpop.permute.xlu0 %6767  ;;  %v3769_v13 = vsel %vm319_vm0, %v3768_v57, %v12734_v0  ;;  %v6795_v23 = vunpack.i.h.bf16 %v6793_v21  ;;  %v6794_v4 = vunpack.i.l.bf16 %v6793_v21  ;;  %v12738_v57 = vld [vmem:[#allocation56_spill] sm:$0xff] }
 0x6fc   : > { %v3881_v2 = vsel %vm319_vm0, %v3880_v22, %v12735_v12  ;;  %v3952_v10 = vsel %vm687_vm4, %v3769_v13, %v6784_v19  ;;  %v4568_v28 = vrot.slane %v12736_v51, 4  ;;  %v4456_v27 = vrot.slane %v12737_v58, 4  ;;  %v12739_v22 = vld [vmem:[#allocation58_spill] sm:$0xff] }
 0x6fd   : > { %v3959_v24 = vsel %vm687_vm4, %v3881_v2, %v6785_v42 }
 0x6fe   : > { %v4569_v46 = vsel %vm319_vm0, %v4568_v28, %v12738_v57  ;;  %v4457_v42 = vsel %vm319_vm0, %v4456_v27, %v12739_v22 }
 0x700   : > { %6922 = vrot.lane.b32.xlu2 %v6921_v29, %s7032_s20  ;;  %v6828_v41 = vpop.permute.xlu2 %6827 }
 0x701   : > { %6902 = vrot.lane.b32.xlu0 %v6901_v1, %s7031_s19  ;;  %v6830_v19 = vunpack.i.h.bf16 %v6828_v41 }
 0x702   : > { %6927 = vrot.lane.b32.xlu1 %v6926_v9, %s7032_s20  ;;  %v11838_v33 = vpop.permute.xlu1 %6807  ;;  %s6982_s20 = scalar_lea.hbm %s12227_s6, 32 }
 0x703   : > { %v6788_v55 = vpop.permute.xlu0 %6787  ;;  %p6984_p4 = scmp.lt.s32.totalorder %s6982_s20, %s6978_s17 }
 0x704   : > { %v6790_v9 = vunpack.i.h.bf16 %v6788_v55  ;;  %v6789_v40 = vunpack.i.l.bf16 %v6788_v55  ;;  %v6829_v55 = vunpack.i.l.bf16 %v6828_v41 }
 0x705   : > { %p6985_p7 = por %p6984_p4, %p6983_p3 }
 0x706   : > { %v3953_v11 = vsel %vm689_vm5, %v3952_v10, %v6789_v40  ;;  %v3960_v48 = vsel %vm689_vm5, %v3959_v24, %v6790_v9 }
 0x707   : > { %v11843_v35 = vsel %vm691_vm6, %v3953_v11, %v6794_v4  ;;  %v11846_v36 = vsel %vm691_vm6, %v3960_v48, %v6795_v23  ;;  %p6986_p8 = pnand %p6985_p7, %p6981_p2 }
 0x709   : > { %5009 = vrot.lane.b32.xlu0 %v4957_v52, %s7034_s28  ;;  %v11848_v52 = vpop.permute.xlu2 %6842  ;;  %s257_s28 = sand.u32 1, %s7020_s22  }
 0x70a   : > { %v6823_v20 = vpop.permute.xlu1 %6822  ;;  %s6317_s29 = sshll.u32 %s257_s28, 4  ;;  %s6224_s25 = scalar_lea.sflag [#allocation8], %s257_s28 }
 0x70b   : > { %v6825_v21 = vunpack.i.h.bf16 %v6823_v20  ;;  %v6824_v39 = vunpack.i.l.bf16 %v6823_v20  ;;  %s259_s13 = scalar_lea.vmem [#allocation9], %s6317_s29 }
 0x70c   : > { %s6237_s14 = sshll.u32 %s259_s13, 4  ;;  %s6238_s14 = int_to_ptr.vmem [resolvable:$true] %s6237_s14 }
 0x70e   : > { %v11850_v32 = vpop.permute.xlu0 %6802 }
 0x711   : > { %v4970_v7 = vpop.permute.xlu2 %4969 }
 0x712   : > { %v11854_v25 = vpop.permute.xlu1 %6837 }
 0x719   : > { %v11862_v12 = vpop.permute.xlu2 %4981 }
 0x71a   : > { %v6818_v37 = vpop.permute.xlu0 %6817  ;;  %v4966_v10 = vpop.permute.xlu1 %4965 }
 0x71b   : > { %v6820_v29 = vunpack.i.h.bf16 %v6818_v37  ;;  %v6819_v1 = vunpack.i.l.bf16 %v6818_v37 }
 0x71d   : > { %v4647_v0 = vsel %vm687_vm4, %v4569_v46, %v6820_v29  ;;  %v4640_v13 = vsel %vm687_vm4, %v4457_v42, %v6819_v1  ;;  %v4832_v29 = vrot.slane %v11534_v49, 4 }
 0x71e   : > { %v4648_v2 = vsel %vm689_vm5, %v4647_v0, %v6825_v21  ;;  %v4641_v9 = vsel %vm689_vm5, %v4640_v13, %v6824_v39  ;;  %v12743_v13 = vld [vmem:[#allocation31_spill] sm:$0xff] }
 0x71f   : > { %v4642_v40 = vsel %vm691_vm6, %v4641_v9, %v6829_v55  ;;  %v4649_v24 = vsel %vm691_vm6, %v4648_v2, %v6830_v19  ;;  %v4833_v39 = vsel %vm319_vm0, %v4832_v29, %v11512_v5  ;;  %v6008_v29 = vrot.slane %v11238_v17, 4 }
 0x721   : > { %v11868_v23 = vpop.permute.xlu2 %6857 }
 0x722   : > { %v4978_v51 = vpop.permute.xlu1 %4977 }
 0x729   : > { %v11876_v28 = vpop.permute.xlu2 %6872 }
 0x72a   : > { %v6833_v4 = vpop.permute.xlu0 %6832  ;;  %v6875_v9 = vunpack.i.h.bf16 %v11876_v28 }
 0x72b   : > { %v6835_v11 = vunpack.i.h.bf16 %v6833_v4  ;;  %v6834_v41 = vunpack.i.l.bf16 %v6833_v4  ;;  %v5896_v4 = vrot.slane %v11254_v18, 4  ;;  %v12751_v18 = vld [vmem:[#allocation57_spill] sm:$0xff] }
 0x72c   : > { %v6009_v17 = vsel %vm319_vm0, %v6008_v29, %v12751_v18 }
 0x72d   : > { %v11871_v48 = vsel %vm693_vm7, %v4642_v40, %v6834_v41  ;;  %v11874_v20 = vsel %vm693_vm7, %v4649_v24, %v6835_v11  ;;  %v6704_v24 = vunpack.i.l.bf16 %v11541_v6  ;;  %v6740_v40 = vunpack.i.h.bf16 %v11718_v16 }
 0x72e   : > { %v6744_v11 = vunpack.i.l.bf16 %v11759_v3  ;;  %v5520_v41 = vrot.slane %v12701_v15, 4 }
 0x72f   : > { %v5339_v15 = vsel %vm695_vm8, %v11751_v30, %v6740_v40 }
 0x731   : > { %v11882_v37 = vpop.permute.xlu2 %6882 }
 0x732   : > { %12740 = vst [vmem:[#allocation24_spill] sm:$0xff] %v11882_v37  ;;  %v6804_v37 = vunpack.i.l.bf16 %v11850_v32 }
 0x736   : > { %v11878_v58 = vpop.permute.xlu1 %6852 }
 0x737   : > { %v11880_v27 = vpop.permute.xlu0 %6847  ;;  %v6855_v5 = vunpack.i.h.bf16 %v11878_v58 }
 0x738   : > { %v6850_v26 = vunpack.i.h.bf16 %v11880_v27 }
 0x739   : > { %v11891_v22 = vpop.permute.xlu2 %6892 }
 0x73a   : > { %12741 = vst [vmem:[#allocation36_spill] sm:$0xff] %v11891_v22  ;;  %v6854_v22 = vunpack.i.l.bf16 %v11878_v58 }
 0x73f   : > { %v11885_v1 = vpop.permute.xlu1 %6867 }
 0x741   : > { %v4962_v21 = vpop.permute.xlu0 %4961 }
 0x742   : > { %v5016_v57 = vsel %vm687_vm4, %v4833_v39, %v4962_v21  ;;  %v12747_v39 = vld [vmem:[#allocation55_spill] sm:$0xff]  ;;  %v11921_v2 = vpop.permute.xlu2 %4993  ;;  %v6809_v21 = vunpack.i.l.bf16 %v11838_v33 }
 0x743   : > { %v5017_v46 = vsel %vm689_vm5, %v5016_v57, %v4966_v10  ;;  %v12745_v10 = vld [vmem:[#allocation53_spill] sm:$0xff]  ;;  %12749 = vst [vmem:[#allocation27_spill] sm:$0xff] %v11921_v2  ;;  %v6844_v57 = vunpack.i.l.bf16 %v11848_v52  ;;  %v6860_v2 = vunpack.i.h.bf16 %v11868_v23 }
 0x744   : > { %v5018_v19 = vsel %vm691_vm6, %v5017_v46, %v4970_v7  ;;  %v6845_v7 = vunpack.i.h.bf16 %v11848_v52  ;;  %v6745_v46 = vunpack.i.h.bf16 %v11759_v3  ;;  %v6840_v52 = vunpack.i.h.bf16 %v11854_v25 }
 0x745   : > { %v6805_v3 = vunpack.i.h.bf16 %v11850_v32 }
 0x748   : > { %v11893_v42 = vpop.permute.xlu1 %4989 }
 0x749   : > { %12742 = vst [vmem:[#allocation28_spill] sm:$0xff] %v11893_v42  ;;  %v4974_v55 = vpop.permute.xlu0 %4973  ;;  %v6839_v42 = vunpack.i.l.bf16 %v11854_v25  ;;  %v4944_v25 = vrot.slane %v11580_v47, 4 }
 0x74a   : > { %v5019_v0 = vsel %vm693_vm7, %v5018_v19, %v4974_v55  ;;  %v6714_v19 = vunpack.i.l.bf16 %v11569_v14  ;;  %v11966_v29 = vpop.permute.xlu2 %4997 }
 0x74b   : > { %v11898_v49 = vsel %vm695_vm8, %v5019_v0, %v4978_v51  ;;  %v6739_v51 = vunpack.i.l.bf16 %v11718_v16  ;;  %v5897_v16 = vsel %vm319_vm0, %v5896_v4, %v12750_v31  ;;  %v6849_v31 = vunpack.i.l.bf16 %v11880_v27 }
 0x74c   : > { %v6080_v32 = vsel %vm687_vm4, %v5897_v16, %v6854_v22  ;;  %v5632_v4 = vrot.slane %v11409_v53, 4  ;;  %v11975_v22 = vsel %vm697_vm9, %v11898_v49, %v11862_v12  ;;  %v5521_v27 = vsel %vm319_vm0, %v5520_v41, %v11572_v8 }
 0x74d   : > { %v5332_v18 = vsel %vm695_vm8, %v11747_v61, %v6739_v51  ;;  %v11985_v16 = vsel %vm697_vm9, %v5339_v15, %v6745_v46  ;;  %v6869_v61 = vunpack.i.l.bf16 %v11885_v1  ;;  %v4644_v12 = vsel %vm695_vm8, %v11871_v48, %v6839_v42 }
 0x74e   : > { %v5633_v53 = vsel %vm319_vm0, %v5632_v4, %v11602_v60  ;;  %v4651_v49 = vsel %vm695_vm8, %v11874_v20, %v6840_v52  ;;  %v4645_v60 = vsel %vm697_vm9, %v4644_v12, %v6844_v57  ;;  %v12752_v48 = vunpack.i.l.bf16 %v12745_v10 }
 0x74f   : > { %v4652_v40 = vsel %vm697_vm9, %v4651_v49, %v6845_v7  ;;  %v11999_v41 = vsel %vm699_vm10, %v4645_v60, %v6849_v31  ;;  %v12753_v20 = vunpack.i.h.bf16 %v11541_v6  ;;  %v6870_v7 = vunpack.i.h.bf16 %v11885_v1 }
 0x750   : > { %v12002_v51 = vsel %vm699_vm10, %v4652_v40, %v6850_v26  ;;  %v12755_v26 = vunpack.i.l.bf16 %v11767_v56  ;;  %v12764_v49 = vunpack.i.h.bf16 %v11823_v54  ;;  %v12765_v40 = vunpack.i.l.bf16 %v12743_v13 }
 0x752   : > { %v11913_v55 = vpop.permute.xlu1 %6907  ;;  %v11915_v0 = vpop.permute.xlu0 %6862  ;;  %v3955_v46 = vsel %vm693_vm7, %v11843_v35, %v12755_v26  ;;  %v12771_v26 = vld [vmem:[#allocation47_spill] sm:$0xff] }
 0x753   : > { %12748 = vst [vmem:[#allocation23_spill] sm:$0xff] %v11913_v55  ;;  %v6859_v55 = vunpack.i.l.bf16 %v11868_v23  ;;  %v6087_v23 = vsel %vm687_vm4, %v6009_v17, %v6855_v5  ;;  %v11982_v5 = vsel %vm697_vm9, %v5332_v18, %v6744_v11  ;;  %v4268_v11 = vsel %vm695_vm8, %v11699_v62, %v6704_v24 }
 0x754   : > { %v6088_v8 = vsel %vm689_vm5, %v6087_v23, %v6860_v2  ;;  %v4269_v42 = vsel %vm697_vm9, %v4268_v11, %v12752_v48  ;;  %v4275_v2 = vsel %vm695_vm8, %v11688_v63, %v12753_v20  ;;  %v12754_v62 = vunpack.i.h.bf16 %v12745_v10 }
 0x755   : > { %v6081_v30 = vsel %vm689_vm5, %v6080_v32, %v6859_v55  ;;  %v12013_v57 = vsel %vm699_vm10, %v4269_v42, %v6714_v19  ;;  %v12756_v63 = vunpack.i.h.bf16 %v11569_v14  ;;  %v3956_v19 = vsel %vm695_vm8, %v3955_v46, %v6804_v37 }
 0x756   : > { %v4276_v24 = vsel %vm697_vm9, %v4275_v2, %v12754_v62  ;;  %v6082_v55 = vsel %vm691_vm6, %v6081_v30, %v6869_v61  ;;  %v12757_v10 = vunpack.i.h.bf16 %v11767_v56  ;;  %v6865_v32 = vunpack.i.h.bf16 %v11915_v0  ;;  %v12057_v30 = vpop.permute.xlu2 %5001  ;;  %v12770_v62 = vld [vmem:[#allocation62_spill] sm:$0xff] }
 0x757   : > { %v12028_v1 = vsel %vm699_vm10, %v4276_v24, %v12756_v63  ;;  %v6864_v35 = vunpack.i.l.bf16 %v11915_v0  ;;  %v3957_v14 = vsel %vm697_vm9, %v3956_v19, %v6809_v21  ;;  %v12758_v18 = vunpack.i.l.bf16 %v11591_v45  ;;  %v12774_v63 = vld [vmem:[#allocation12_spill] sm:$0xff] }
 0x758   : > { %v3962_v17 = vsel %vm693_vm7, %v11846_v36, %v12757_v10  ;;  %v12759_v37 = vunpack.i.h.bf16 %v11591_v45  ;;  %v12760_v61 = vunpack.i.l.bf16 %v11806_v50  ;;  %v12761_v21 = vunpack.i.h.bf16 %v11838_v33 }
 0x759   : > { %v3963_v23 = vsel %vm695_vm8, %v3962_v17, %v6805_v3  ;;  %v3579_v56 = vsel %vm693_vm7, %v11817_v59, %v12758_v18  ;;  %v12762_v59 = vunpack.i.h.bf16 %v11806_v50  ;;  %v3203_v33 = vsel %vm693_vm7, %v11499_v34, %v12765_v40 }
 0x75a   : > { %v3586_v36 = vsel %vm693_vm7, %v11820_v38, %v12759_v37  ;;  %v3964_v3 = vsel %vm697_vm9, %v3963_v23, %v12761_v21  ;;  %v12763_v38 = vunpack.i.l.bf16 %v11823_v54  ;;  %v12766_v11 = vunpack.i.l.bf16 %v11789_v44  ;;  %v6115_v23 = vld [vmem:[%s12225_s4] sm:$0xff] }
 0x75b   : > { %v11959_v58 = vpop.permute.xlu0 %6877  ;;  %v12062_v45 = vsel %vm699_vm10, %v3964_v3, %v12762_v59  ;;  %v3587_v60 = vsel %vm695_vm8, %v3586_v36, %v12764_v49  ;;  %v12767_v48 = vunpack.i.h.bf16 %v11789_v44  ;;  %v12768_v20 = vunpack.i.l.bf16 %v12747_v39  ;;  %6118 = vperm.xlu2 %6931, %v6115_v23  }
 0x75c   : > { %v11957_v43 = vpop.permute.xlu1 %6912  ;;  %v6880_v31 = vunpack.i.h.bf16 %v11959_v58  ;;  %v6879_v4 = vunpack.i.l.bf16 %v11959_v58  ;;  %v12052_v58 = vsel %vm699_vm10, %v3957_v14, %v12760_v61  ;;  %v3580_v12 = vsel %vm695_vm8, %v3579_v56, %v12763_v38  ;;  %v6165_v14 = vld [vmem:[%s12226_s5] sm:$0xff]  ;;  %v12777_v56 = vld [vmem:[#allocation30_spill] sm:$0xff] }
 0x75d   : > { %v3581_v50 = vsel %vm697_vm9, %v3580_v12, %v12766_v11  ;;  %v3588_v42 = vsel %vm697_vm9, %v3587_v60, %v12767_v48  ;;  %v3204_v2 = vsel %vm695_vm8, %v3203_v33, %v12768_v20  ;;  %v12769_v54 = vunpack.i.h.bf16 %v12743_v13  ;;  %6331 = vmatmul.msk.f32.vlgmr.msrb.gmra.mxu0 %vm6169_vm13, %v6165_v14  ;;  %6333 = vmatmul.msk.f32.vlgmr.msrb.gmra.mxu1 %vm6169_vm13, %v6165_v14  ;;  %v12781_v11 = vld [vmem:[#allocation23_spill] sm:$0xff] }
 0x75e   : > { %v12772_v46 = vunpack.i.l.bf16 %v12771_v26  ;;  %v12775_v19 = vunpack.i.l.bf16 %v12774_v63  ;;  %v12776_v17 = vunpack.i.h.bf16 %v12747_v39  ;;  %v6089_v18 = vsel %vm691_vm6, %v6088_v8, %v6870_v7 }
 0x75f   : > { %v3210_v24 = vsel %vm693_vm7, %v12770_v62, %v12769_v54  ;;  %v12778_v37 = vunpack.i.l.bf16 %v12777_v56  ;;  %v12779_v61 = vunpack.i.h.bf16 %v12774_v63  ;;  %v6874_v21 = vunpack.i.l.bf16 %v11876_v28  ;;  %v12784_v54 = vld [vmem:[#allocation28_spill] sm:$0xff]  ;;  %v6923_v62 = vpop.permute.xlu2 %6922 }
 0x760   : > { %v12090_v34 = vsel %vm699_vm10, %v3581_v50, %v12772_v46  ;;  %v3205_v10 = vsel %vm697_vm9, %v3204_v2, %v12775_v19  ;;  %v3211_v13 = vsel %vm695_vm8, %v3210_v24, %v12776_v17  ;;  %v5711_v3 = vsel %vm687_vm4, %v5633_v53, %v6865_v32 }
 0x761   : > { %v12113_v36 = vsel %vm699_vm10, %v3205_v10, %v12778_v37  ;;  %v3212_v39 = vsel %vm697_vm9, %v3211_v13, %v12779_v61  ;;  %v5704_v59 = vsel %vm687_vm4, %v5521_v27, %v6864_v35  ;;  %v12780_v8 = vunpack.i.h.bf16 %v12777_v56  ;;  %v12782_v35 = vld [vmem:[#allocation22_spill] sm:$0xff] }
 0x762   : > { %v6090_v49 = vsel %vm693_vm7, %v6089_v18, %v6880_v31  ;;  %v6083_v60 = vsel %vm693_vm7, %v6082_v55, %v6879_v4  ;;  %v6910_v50 = vunpack.i.h.bf16 %v12781_v11  ;;  %v6909_v53 = vunpack.i.l.bf16 %v12781_v11  ;;  %v12783_v4 = vld [vmem:[#allocation24_spill] sm:$0xff] }
 0x763   : > { %v6888_v52 = vpop.permute.xlu0 %6887  ;;  %v12124_v7 = vsel %vm699_vm10, %v3212_v39, %v12780_v8  ;;  %v4945_v48 = vsel %vm319_vm0, %v4944_v25, %v12782_v35  ;;  %v6884_v20 = vunpack.i.l.bf16 %v12783_v4  ;;  %v5712_v2 = vsel %vm689_vm5, %v5711_v3, %v6875_v9 }
 0x764   : > { %v12023_v6 = vpop.permute.xlu1 %6917  ;;  %v6890_v15 = vunpack.i.h.bf16 %v6888_v52  ;;  %v6889_v0 = vunpack.i.l.bf16 %v6888_v52  ;;  %v12773_v52 = vunpack.i.h.bf16 %v12771_v26  ;;  %v6885_v47 = vunpack.i.h.bf16 %v12783_v4  ;;  %v12785_v26 = vld [vmem:[#allocation36_spill] sm:$0xff] }
 0x765   : > { %v5023_v25 = vsel %vm687_vm4, %v4945_v48, %v12784_v54  ;;  %v6894_v46 = vunpack.i.l.bf16 %v12785_v26  ;;  %v6895_v9 = vunpack.i.h.bf16 %v12785_v26  ;;  %v6925_v10 = vunpack.i.h.bf16 %v6923_v62 }
 0x766   : > { %v12095_v44 = vsel %vm699_vm10, %v3588_v42, %v12773_v52  ;;  %v6084_v27 = vsel %vm695_vm8, %v6083_v60, %v6889_v0  ;;  %v6091_v32 = vsel %vm695_vm8, %v6090_v49, %v6890_v15  ;;  %v5705_v42 = vsel %vm689_vm5, %v5704_v59, %v6874_v21  ;;  %v12786_v52 = vld [vmem:[#allocation27_spill] sm:$0xff] }
 0x767   : > { %v5706_v24 = vsel %vm691_vm6, %v5705_v42, %v6884_v20  ;;  %v5713_v28 = vsel %vm691_vm6, %v5712_v2, %v6885_v47  ;;  %v5024_v63 = vsel %vm689_vm5, %v5023_v25, %v12786_v52  ;;  %v6924_v23 = vunpack.i.l.bf16 %v6923_v62 }
 0x768   : > { %v5707_v14 = vsel %vm693_vm7, %v5706_v24, %v6894_v46  ;;  %v6915_v18 = vunpack.i.h.bf16 %v11957_v43  ;;  %v6914_v56 = vunpack.i.l.bf16 %v11957_v43  ;;  %v5714_v61 = vsel %vm693_vm7, %v5713_v28, %v6895_v9 }
 0x769   : > { %v6920_v39 = vunpack.i.h.bf16 %v12023_v6  ;;  %v6919_v21 = vunpack.i.l.bf16 %v12023_v6  ;;  %v5341_v11 = vsel %vm699_vm10, %v11985_v16, %v6925_v10 }
 0x76b   : > { %v6898_v12 = vpop.permute.xlu0 %6897 }
 0x76c   : > { %v5006_v38 = vpop.permute.xlu1 %5005  ;;  %v6900_v40 = vunpack.i.h.bf16 %v6898_v12  ;;  %v6899_v33 = vunpack.i.l.bf16 %v6898_v12 }
 0x76e   : > { %v6085_v31 = vsel %vm697_vm9, %v6084_v27, %v6899_v33  ;;  %v6092_v55 = vsel %vm697_vm9, %v6091_v32, %v6900_v40  ;;  %v5025_v40 = vsel %vm691_vm6, %v5024_v63, %v11966_v29  ;;  %v5334_v33 = vsel %vm699_vm10, %v11982_v5, %v6924_v23 }
 0x76f   : > { %v6086_v0 = vsel %vm699_vm10, %v6085_v31, %v6909_v53  ;;  %v6093_v15 = vsel %vm699_vm10, %v6092_v55, %v6910_v50  ;;  %v5026_v6 = vsel %vm693_vm7, %v5025_v40, %v12057_v30 }
 0x770   : > { %6132 = vmatpush.msra.mxu2 %v6086_v0  ;;  %6152 = vmatpush.msra.mxu3 %v6093_v15  ;;  %v5027_v50 = vsel %vm695_vm8, %v5026_v6, %v5006_v38 }
 0x773   : > { %v6903_v19 = vpop.permute.xlu0 %6902 }
 0x774   : > { %v6905_v17 = vunpack.i.h.bf16 %v6903_v19  ;;  %v6904_v13 = vunpack.i.l.bf16 %v6903_v19  ;;  %v6928_v37 = vpop.permute.xlu1 %6927 }
 0x775   : > { %v6929_v49 = vunpack.i.l.bf16 %v6928_v37  ;;  %v6930_v53 = vunpack.i.h.bf16 %v6928_v37 }
 0x776   : > { %v5708_v3 = vsel %vm695_vm8, %v5707_v14, %v6904_v13  ;;  %v5715_v59 = vsel %vm695_vm8, %v5714_v61, %v6905_v17 }
 0x777   : > { %v5709_v12 = vsel %vm697_vm9, %v5708_v3, %v6914_v56  ;;  %v5716_v8 = vsel %vm697_vm9, %v5715_v59, %v6915_v18  ;;  %v5022_v29 = vsel %vm699_vm10, %v11975_v22, %v6929_v49  ;;  %v6096_v22 = vld [vmem:[#allocation6] sm:$0xff] }
 0x778   : > { %v5710_v60 = vsel %vm699_vm10, %v5709_v12, %v6919_v21  ;;  %v5717_v43 = vsel %vm699_vm10, %v5716_v8, %v6920_v39 }
 0x779   : > { %6133 = vmatpush.msra.mxu2 %v5710_v60  ;;  %6153 = vmatpush.msra.mxu3 %v5717_v43 }
 0x77b   : > { %v5010_v27 = vpop.permute.xlu0 %5009  ;;  %6134 = vmatpush.msra.mxu2 %v5334_v33  ;;  %6154 = vmatpush.msra.mxu3 %v5341_v11 }
 0x77c   : > { %v5028_v32 = vsel %vm697_vm9, %v5027_v50, %v5010_v27 }
 0x77d   : > { %6135 = vmatpush.msra.mxu2 %v5022_v29  ;;  %v5029_v30 = vsel %vm699_vm10, %v5028_v32, %v6930_v53 }
 0x77e   : > { %6155 = vmatpush.msra.mxu3 %v5029_v30 }
 0x77f   : > { %6136 = vmatpush.msra.mxu2 %v11999_v41 }
 0x780   : > { %6156 = vmatpush.msra.mxu3 %v12002_v51 }
 0x781   : > { %6137 = vmatpush.msra.mxu2 %v12013_v57 }
 0x782   : > { %6157 = vmatpush.msra.mxu3 %v12028_v1 }
 0x783   : > { %6138 = vmatpush.msra.mxu2 %v12052_v58 }
 0x784   : > { %6158 = vmatpush.msra.mxu3 %v12062_v45 }
 0x785   : > { %6139 = vmatpush.msra.mxu2 %v12090_v34 }
 0x786   : > { %6159 = vmatpush.msra.mxu3 %v12095_v44 }
 0x787   : > { %6140 = vmatpush.msra.mxu2 %v12113_v36 }
 0x788   : > { %6160 = vmatpush.msra.mxu3 %v12124_v7  ;;  %6328 = vmatmul.msk.f32.vlgmr.msra.gmra.mxu2 %vm6121_vm14, %v6096_v22 }
 0x789   : > { %6329 = vmatmul.msk.f32.vlgmr.msra.gmra.mxu3 %vm6121_vm14, %v6096_v22 }
 0x7b5   : > { %v6119_v5 = vpop.permute.xlu2 %6118 }
 0x7da   : > { %v6194_v41 = vpop.f32.mrf.mxu0  ;;  %v6214_v1 = vpop.f32.mrf.mxu1 }
 0x80b   : > { %v6142_v16 = vpop.f32.mrf.mxu2 }
 0x80c   : > { %v6143_v51 = vadd.f32 %v6142_v16, %v6119_v5  ;;  %v6162_v57 = vpop.f32.mrf.mxu3 }
 0x80d   : > { %v6163_v58 = vadd.f32 %v6162_v57, %v6119_v5 }
 0x80e   : > { %v6217_v45 = vadd.f32 %v6194_v41, %v6143_v51 }
 0x80f   : > { %v6218_v34 = vadd.f32 %v6214_v1, %v6163_v58 }
 0x810   : > { %v6219_v44 = vmax.f32 %v6217_v45, 0.0 }
 0x811   : > { %v6220_v36 = vmax.f32 %v6218_v34, 0.0 }
 0x812   : > { %6221 = vst [vmem:[%s259_s13] sm:$0xff] %v6219_v44 }
 0x813   : > { %6222 = vst [vmem:[%s259_s13 + $0x8] sm:$0xff] %v6220_v36 }
 0x814   : > { %6989 = shalt.err (!%p6986_p8)
}
 0x815   : > { %6345 = dma.vmem_to_hbm [thread:$0]  (%p7118_p5), %s6238_s14, 256, %s6240_s15, %s6224_s25  }
 0x816 PF: > { %p6357_p9 = scmp.ge.s32.totalorder %s7028_s24, 2  ;;  %s6251_s28 = sand.u32 1, %s7016_s21  }
 0x817   : > { %s6252_s9 = scalar_lea.sflag [#allocation8], %s6251_s28 }
 0x818   : > { %p6352_p10 = pnand %p6357_p9, %p7122_p6 }
 0x81a   : > { %p6353_p11 = pneg %p6352_p10 }
 0x81c   : > { %7011 = dma.done.wait (%p6353_p11), %s6252_s9, 256  }
 0x81d   : > { %7013 = vsyncadd (%p6353_p11), %s6252_s9, 4294967040  ;;  %p17_p12 = scmp.ge.s32.totalorder %s7105_s27, 4   ;;  %s12787_s21 = smov %s7020_s22 }
 0x81e   : > { %s12788_s22 = smov %s7024_s23  ;;  %s12789_s23 = smov %s7116_s30 }
 0x81f   : > { %s12790_s24 = smov %s7105_s27  ;;  %19 = sbr.rel (!%p17_p12) target bundleno = 4 (0x4), region = 91 }
 0x824   :  { %6258 = vsyncpa [#allocation7], 1 }
 0x825   :  { %6260 = vsyncpa [#allocation7 + $0x1], 1 }
 0x826   :  { %6261 = vsyncpa [#allocation8], 1 }
 0x827   :  { %6263 = vsyncpa [#allocation8 + $0x1], 1 }

</bundles_post_ra>
